<compile_context>
chip_gen: v5e
topology: v5e:2x2
jax: 0.10.0
libtpu: 0.0.40
codegen_flags: <defaults>
</compile_context>

<pallas_src>
import functools
import math

import jax
import jax.numpy as jnp
from jax.experimental import pallas as pl
from jax.experimental.pallas import tpu as pltpu

NEG_INF = -1e9  # additive mask value (avoids NaN of true -inf on fully-masked rows)


# ----------------------------------------------------------------------------
# In-kernel helpers (traced inline inside the Pallas kernels)
# ----------------------------------------------------------------------------
def _layernorm(x, g, b, eps):
    x = x.astype(jnp.float32)
    mu = jnp.mean(x, axis=-1, keepdims=True)
    xc = x - mu
    var = jnp.mean(xc * xc, axis=-1, keepdims=True)
    return xc * jax.lax.rsqrt(var + eps) * g + b


def _softmax_rows(s):
    m = jnp.max(s, axis=-1, keepdims=True)
    p = jnp.exp(s - m)
    denom = jnp.sum(p, axis=-1, keepdims=True)
    return p * pl.reciprocal(denom, approx=True)


def _attention(x_q, x_kv, w_ref, b_ref, wo_ref, bo_ref, *, num_heads, scale, bias):
    """Multi-head attention for one batch element, fully in registers/VMEM.

    x_q: (Sq, E), x_kv: (Sk, E)
    w_ref: (3H, E, Dh) head-blocked stack ordered [q heads | k heads | v heads]
    b_ref: (3H, 1, Dh), wo_ref: (H, Dh, E), bo_ref: (1, E)
    bias:  additive float, (Sq, Sk) or (1, Sk) or None
    """
    H = num_heads
    out = None
    for h in range(H):
        q = jnp.dot(x_q, w_ref[h], preferred_element_type=jnp.float32) + b_ref[h]
        k = jnp.dot(x_kv, w_ref[H + h], preferred_element_type=jnp.float32) + b_ref[H + h]
        v = jnp.dot(x_kv, w_ref[2 * H + h], preferred_element_type=jnp.float32) + b_ref[2 * H + h]
        s = jax.lax.dot_general(q, k, (((1,), (1,)), ((), ())),
                                preferred_element_type=jnp.float32) * scale
        if bias is not None:
            s = s + bias
        p = _softmax_rows(s)
        o = jnp.dot(p, v, preferred_element_type=jnp.float32)              # (Sq, Dh)
        c = jnp.dot(o, wo_ref[h], preferred_element_type=jnp.float32)      # (Sq, E)
        out = c if out is None else out + c
    return out + bo_ref[...]


# ----------------------------------------------------------------------------
# Pallas kernels (one fused kernel per encoder / decoder layer)
# ----------------------------------------------------------------------------
def _encoder_layer_kernel(x_ref, kpm_ref,
                          w_attn_ref, b_attn_ref, wo_ref, bo_ref,
                          ln1_g_ref, ln1_b_ref,
                          w1_ref, b1_ref, w2_ref, b2_ref,
                          ln2_g_ref, ln2_b_ref,
                          o_ref, *, num_heads, scale, eps):
    x = x_ref[0].astype(jnp.float32)                       # (S, E)
    kpm_bias = kpm_ref[0]                                  # (1, S) additive 0 / NEG_INF
    attn = _attention(x, x, w_attn_ref, b_attn_ref, wo_ref, bo_ref,
                      num_heads=num_heads, scale=scale, bias=kpm_bias)
    h1 = _layernorm(attn + x, ln1_g_ref[...], ln1_b_ref[...], eps)
    f = jnp.dot(h1, w1_ref[...], preferred_element_type=jnp.float32) + b1_ref[...]
    f = jnp.maximum(f, 0.0)
    f = jnp.dot(f, w2_ref[...], preferred_element_type=jnp.float32) + b2_ref[...]
    h2 = _layernorm(f + h1, ln2_g_ref[...], ln2_b_ref[...], eps)
    o_ref[0] = h2.astype(o_ref.dtype)


def _decoder_layer_kernel(y_ref, mem_ref,
                          sa_w_ref, sa_b_ref, sa_wo_ref, sa_bo_ref,
                          ln1_g_ref, ln1_b_ref,
                          ca_w_ref, ca_b_ref, ca_wo_ref, ca_bo_ref,
                          ln2_g_ref, ln2_b_ref,
                          w1_ref, b1_ref, w2_ref, b2_ref,
                          ln3_g_ref, ln3_b_ref,
                          o_ref, *, num_heads, scale, eps):
    y = y_ref[0].astype(jnp.float32)                       # (St, E)
    mem = mem_ref[0].astype(jnp.float32)                   # (Ss, E)
    St = y.shape[0]
    # causal mask built in-kernel (no HBM traffic)
    row = jax.lax.broadcasted_iota(jnp.int32, (St, St), 0)
    col = jax.lax.broadcasted_iota(jnp.int32, (St, St), 1)
    causal = jnp.where(col > row, NEG_INF, 0.0).astype(jnp.float32)

    sa = _attention(y, y, sa_w_ref, sa_b_ref, sa_wo_ref, sa_bo_ref,
                    num_heads=num_heads, scale=scale, bias=causal)
    y1 = _layernorm(sa + y, ln1_g_ref[...], ln1_b_ref[...], eps)

    ca = _attention(y1, mem, ca_w_ref, ca_b_ref, ca_wo_ref, ca_bo_ref,
                    num_heads=num_heads, scale=scale, bias=None)
    y2 = _layernorm(ca + y1, ln2_g_ref[...], ln2_b_ref[...], eps)

    f = jnp.dot(y2, w1_ref[...], preferred_element_type=jnp.float32) + b1_ref[...]
    f = jnp.maximum(f, 0.0)
    f = jnp.dot(f, w2_ref[...], preferred_element_type=jnp.float32) + b2_ref[...]
    y3 = _layernorm(f + y2, ln3_g_ref[...], ln3_b_ref[...], eps)
    o_ref[0] = y3.astype(o_ref.dtype)


def _layernorm_kernel(x_ref, g_ref, b_ref, o_ref, *, eps):
    o_ref[0] = _layernorm(x_ref[0], g_ref[...], b_ref[...], eps).astype(o_ref.dtype)


def _norm_project_kernel(x_ref, g_ref, b_ref, w_ref, bw_ref, o_ref, *, eps):
    h = _layernorm(x_ref[0], g_ref[...], b_ref[...], eps)
    logits = jnp.dot(h, w_ref[...], preferred_element_type=jnp.float32) + bw_ref[...]
    o_ref[0] = logits.astype(o_ref.dtype)


# ----------------------------------------------------------------------------
# pallas_call wrappers
# ----------------------------------------------------------------------------
_PARALLEL = pltpu.CompilerParams(dimension_semantics=("parallel",))


def _batch_spec(shape):
    nd = len(shape)
    return pl.BlockSpec((1,) + tuple(shape[1:]), lambda n, _nd=nd: (n,) + (0,) * (_nd - 1))


def _full_spec(shape):
    nd = len(shape)
    return pl.BlockSpec(tuple(shape), lambda n, _nd=nd: (0,) * _nd)


def encoder_layer(x, kpm_bias, p, num_heads, eps=1e-5):
    N, S, E = x.shape
    Dh = E // num_heads
    a = p["attn"]
    kernel = functools.partial(_encoder_layer_kernel, num_heads=num_heads,
                               scale=1.0 / math.sqrt(Dh), eps=eps)
    args = (x, kpm_bias, a["w"], a["b"], a["wo"], a["bo"],
            p["ln1_g"], p["ln1_b"], p["ff_w1"], p["ff_b1"],
            p["ff_w2"], p["ff_b2"], p["ln2_g"], p["ln2_b"])
    in_specs = [_batch_spec(x.shape), _batch_spec(kpm_bias.shape)] + \
               [_full_spec(a.shape) for a in args[2:]]
    return pl.pallas_call(
        kernel,
        out_shape=jax.ShapeDtypeStruct((N, S, E), x.dtype),
        grid=(N,),
        in_specs=in_specs,
        out_specs=pl.BlockSpec((1, S, E), lambda n: (n, 0, 0)),
        compiler_params=_PARALLEL,
    )(*args)


def decoder_layer(y, memory, p, num_heads, eps=1e-5):
    N, St, E = y.shape
    Dh = E // num_heads
    sa, ca = p["self_attn"], p["cross_attn"]
    kernel = functools.partial(_decoder_layer_kernel, num_heads=num_heads,
                               scale=1.0 / math.sqrt(Dh), eps=eps)
    args = (y, memory,
            sa["w"], sa["b"], sa["wo"], sa["bo"], p["ln1_g"], p["ln1_b"],
            ca["w"], ca["b"], ca["wo"], ca["bo"], p["ln2_g"], p["ln2_b"],
            p["ff_w1"], p["ff_b1"], p["ff_w2"], p["ff_b2"], p["ln3_g"], p["ln3_b"])
    in_specs = [_batch_spec(y.shape), _batch_spec(memory.shape)] + \
               [_full_spec(a.shape) for a in args[2:]]
    return pl.pallas_call(
        kernel,
        out_shape=jax.ShapeDtypeStruct((N, St, E), y.dtype),
        grid=(N,),
        in_specs=in_specs,
        out_specs=pl.BlockSpec((1, St, E), lambda n: (n, 0, 0)),
        compiler_params=_PARALLEL,
    )(*args)


def layernorm(x, g, b, eps=1e-5):
    N, S, E = x.shape
    kernel = functools.partial(_layernorm_kernel, eps=eps)
    return pl.pallas_call(
        kernel,
        out_shape=jax.ShapeDtypeStruct((N, S, E), x.dtype),
        grid=(N,),
        in_specs=[_batch_spec(x.shape), _full_spec(g.shape), _full_spec(b.shape)],
        out_specs=pl.BlockSpec((1, S, E), lambda n: (n, 0, 0)),
        compiler_params=_PARALLEL,
    )(x, g, b)


def norm_project(x, g, b, w, bw, eps=1e-5):
    N, S, E = x.shape
    V = w.shape[-1]
    kernel = functools.partial(_norm_project_kernel, eps=eps)
    return pl.pallas_call(
        kernel,
        out_shape=jax.ShapeDtypeStruct((N, S, V), x.dtype),
        grid=(N,),
        in_specs=[_batch_spec(x.shape), _full_spec(g.shape), _full_spec(b.shape),
                  _full_spec(w.shape), _full_spec(bw.shape)],
        out_specs=pl.BlockSpec((1, S, V), lambda n: (n, 0, 0)),
        compiler_params=_PARALLEL,
    )(x, g, b, w, bw)


# ----------------------------------------------------------------------------
# Model forward (embeddings / tiny mask prep in plain JAX, layers in Pallas)
# ----------------------------------------------------------------------------
def rswi_transformer_forward(params, src, trg, cfg):
    """src: (S_src, N) int32, trg: (S_trg, N) int32 -> (S_trg, N, trg_vocab)."""
    H = cfg["num_heads"]
    S_src, N = src.shape
    S_trg, _ = trg.shape

    src_bt = src.T                                                     # (N, S_src)
    trg_bt = trg.T                                                     # (N, S_trg)

    # --- embeddings (dropout == identity); batch-major layout (N, S, E) ---
    embed_src = jnp.take(params["src_word_emb"], src_bt, axis=0)       # (N, S_src, E)
    trg_word = jnp.take(params["trg_word_emb"], trg_bt, axis=0)        # (N, S_trg, E)
    trg_pos = jnp.take(params["trg_pos_emb"], jnp.arange(S_trg), axis=0)
    embed_trg = trg_word + trg_pos[None, :, :]
    # (the reference computes src positions but never adds them to embed_src)

    # --- key-padding mask as tiny additive bias, broadcast inside the kernel ---
    kpm_bias = jnp.where(src_bt == cfg["src_pad_idx"], NEG_INF, 0.0).astype(jnp.float32)
    kpm_bias = kpm_bias.reshape(N, 1, S_src)

    # --- encoder (one fused pallas_call per layer) ---
    x = embed_src
    for lp in params["encoder_layers"]:
        x = encoder_layer(x, kpm_bias, lp, H)
    memory = layernorm(x, params["enc_norm_g"], params["enc_norm_b"])

    # --- decoder (one fused pallas_call per layer; causal mask built in-kernel) ---
    y = embed_trg
    for lp in params["decoder_layers"]:
        y = decoder_layer(y, memory, lp, H)

    # --- final decoder LayerNorm fused with fc_out projection ---
    logits_bt = norm_project(y, params["dec_norm_g"], params["dec_norm_b"],
                             params["fc_out_w"], params["fc_out_b"])   # (N, S_trg, V)
    return jnp.transpose(logits_bt, (1, 0, 2))                         # (S_trg, N, V)


# ----------------------------------------------------------------------------
# Deterministic parameter initialization (shapes match the nn.Module __init__;
# attention weights stored head-blocked so the fused kernels index them by head)
# ----------------------------------------------------------------------------
def _normal(key, shape, scale=0.02):
    return (scale * jax.random.normal(key, shape)).astype(jnp.float32)


def _ln_params(E):
    return jnp.ones((1, E), jnp.float32), jnp.zeros((1, E), jnp.float32)


def _init_attn(key, E, H):
    Dh = E // H
    k1, k2 = jax.random.split(key)
    return {
        "w": _normal(k1, (3 * H, E, Dh)),            # [q heads | k heads | v heads]
        "b": jnp.zeros((3 * H, 1, Dh), jnp.float32),
        "wo": _normal(k2, (H, Dh, E)),
        "bo": jnp.zeros((1, E), jnp.float32),
    }


def _init_enc_layer(key, E, F, H):
    k0, k1, k2 = jax.random.split(key, 3)
    g1, b1 = _ln_params(E)
    g2, b2 = _ln_params(E)
    return {
        "attn": _init_attn(k0, E, H),
        "ln1_g": g1, "ln1_b": b1,
        "ff_w1": _normal(k1, (E, F)), "ff_b1": jnp.zeros((1, F), jnp.float32),
        "ff_w2": _normal(k2, (F, E)), "ff_b2": jnp.zeros((1, E), jnp.float32),
        "ln2_g": g2, "ln2_b": b2,
    }


def _init_dec_layer(key, E, F, H):
    k0, k1, k2, k3 = jax.random.split(key, 4)
    g1, b1 = _ln_params(E)
    g2, b2 = _ln_params(E)
    g3, b3 = _ln_params(E)
    return {
        "self_attn": _init_attn(k0, E, H),
        "cross_attn": _init_attn(k1, E, H),
        "ln1_g": g1, "ln1_b": b1,
        "ln2_g": g2, "ln2_b": b2,
        "ff_w1": _normal(k2, (E, F)), "ff_b1": jnp.zeros((1, F), jnp.float32),
        "ff_w2": _normal(k3, (F, E)), "ff_b2": jnp.zeros((1, E), jnp.float32),
        "ln3_g": g3, "ln3_b": b3,
    }


def init_params(key, cfg):
    E = cfg["embedding_size"]
    F = cfg["forward_expansion"] * E
    H = cfg["num_heads"]
    n_enc, n_dec = cfg["num_encoder_layers"], cfg["num_decoder_layers"]
    ks = jax.random.split(key, 8 + n_enc + n_dec)
    enc_g, enc_b = _ln_params(E)
    dec_g, dec_b = _ln_params(E)
    return {
        "src_word_emb": _normal(ks[0], (cfg["src_vocab_size"], E)),
        "src_pos_emb": _normal(ks[1], (cfg["max_len"], E)),   # present but unused (as in reference)
        "trg_word_emb": _normal(ks[2], (cfg["trg_vocab_size"], E)),
        "trg_pos_emb": _normal(ks[3], (cfg["max_len"], E)),
        "enc_norm_g": enc_g, "enc_norm_b": enc_b,
        "dec_norm_g": dec_g, "dec_norm_b": dec_b,
        "fc_out_w": _normal(ks[4], (E, cfg["trg_vocab_size"])),
        "fc_out_b": jnp.zeros((1, cfg["trg_vocab_size"]), jnp.float32),
        "encoder_layers": [_init_enc_layer(ks[8 + i], E, F, H) for i in range(n_enc)],
        "decoder_layers": [_init_dec_layer(ks[8 + n_enc + i], E, F, H) for i in range(n_dec)],
    }


# ----------------------------------------------------------------------------
if __name__ == "__main__":
    cfg = dict(
        embedding_size=32,
        num_heads=2,
        num_encoder_layers=1,
        num_decoder_layers=1,
        forward_expansion=4,
        src_vocab_size=50,
        trg_vocab_size=48,
        src_pad_idx=0,
        max_len=100,
    )

    root = jax.random.PRNGKey(0)
    k_params, k_src, k_trg = jax.random.split(root, 3)
    params = init_params(k_params, cfg)

    S_src, S_trg, N = 10, 8, 2
    src = jax.random.randint(k_src, (S_src, N), 1, cfg["src_vocab_size"], dtype=jnp.int32)
    src = src.at[-2:, 0].set(cfg["src_pad_idx"])  # a few pad tokens to exercise the mask
    trg = jax.random.randint(k_trg, (S_trg, N), 1, cfg["trg_vocab_size"], dtype=jnp.int32)

    fwd = jax.jit(functools.partial(rswi_transformer_forward, cfg=cfg))
    out = fwd(params, src, trg)
    out = jax.block_until_ready(out)
    assert out.shape == (S_trg, N, cfg["trg_vocab_size"]), out.shape
    assert bool(jnp.all(jnp.isfinite(out)))
    print("KERNEL_OK")
</pallas_src>

<mosaic_0001>
module attributes {stable_mosaic.version = 11 : i64} {
  func.func @_layernorm_kernel(%arg0: i32, %arg1: memref<1x10x32xf32, #tpu.memory_space<vmem>>, %arg2: memref<1x32xf32, #tpu.memory_space<vmem>>, %arg3: memref<1x32xf32, #tpu.memory_space<vmem>>, %arg4: memref<1x10x32xf32, #tpu.memory_space<vmem>>) attributes {dimension_semantics = [#tpu.dimension_semantics<parallel>], iteration_bounds = array<i64: 2>, scalar_prefetch = 0 : i64, scratch_operands = 0 : i64, tpu.core_type = #tpu.core_type<tc>, window_params = [{transform_indices = @transform_0, window_bounds = array<i64: 1, 10, 32>}, {pipeline_mode = #tpu.pipeline_mode<synchronous>, transform_indices = @transform_1, window_bounds = array<i64: 1, 32>}, {pipeline_mode = #tpu.pipeline_mode<synchronous>, transform_indices = @transform_2, window_bounds = array<i64: 1, 32>}, {transform_indices = @transform_3, window_bounds = array<i64: 1, 10, 32>}]} {
    %c0 = arith.constant 0 : index
    %c0_0 = arith.constant 0 : index
    %c0_1 = arith.constant 0 : index
    %0 = vector.load %arg1[%c0, %c0_0, %c0_1] : memref<1x10x32xf32, #tpu.memory_space<vmem>>, vector<1x10x32xf32>
    %1 = vector.shape_cast %0 : vector<1x10x32xf32> to vector<10x32xf32>
    %c0_2 = arith.constant 0 : index
    %c0_3 = arith.constant 0 : index
    %2 = vector.load %arg2[%c0_2, %c0_3] : memref<1x32xf32, #tpu.memory_space<vmem>>, vector<1x32xf32>
    %c0_4 = arith.constant 0 : index
    %c0_5 = arith.constant 0 : index
    %3 = vector.load %arg3[%c0_4, %c0_5] : memref<1x32xf32, #tpu.memory_space<vmem>>, vector<1x32xf32>
    %cst = arith.constant dense<0.000000e+00> : vector<10xf32>
    %4 = vector.multi_reduction <add>, %1, %cst [1] : vector<10x32xf32> to vector<10xf32>
    %5 = vector.shape_cast %4 : vector<10xf32> to vector<10x1xf32>
    %cst_6 = arith.constant 3.200000e+01 : f32
    %6 = vector.broadcast %cst_6 : f32 to vector<10x1xf32>
    %7 = arith.divf %5, %6 : vector<10x1xf32>
    %8 = vector.broadcast %7 : vector<10x1xf32> to vector<10x32xf32>
    %9 = arith.subf %1, %8 : vector<10x32xf32>
    %10 = arith.mulf %9, %9 : vector<10x32xf32>
    %cst_7 = arith.constant dense<0.000000e+00> : vector<10xf32>
    %11 = vector.multi_reduction <add>, %10, %cst_7 [1] : vector<10x32xf32> to vector<10xf32>
    %12 = vector.shape_cast %11 : vector<10xf32> to vector<10x1xf32>
    %cst_8 = arith.constant 3.200000e+01 : f32
    %13 = vector.broadcast %cst_8 : f32 to vector<10x1xf32>
    %14 = arith.divf %12, %13 : vector<10x1xf32>
    %cst_9 = arith.constant 9.99999974E-6 : f32
    %15 = vector.broadcast %cst_9 : f32 to vector<10x1xf32>
    %16 = arith.addf %14, %15 : vector<10x1xf32>
    %17 = math.rsqrt %16 : vector<10x1xf32>
    %18 = vector.broadcast %17 : vector<10x1xf32> to vector<10x32xf32>
    %19 = arith.mulf %9, %18 : vector<10x32xf32>
    %20 = vector.broadcast %2 : vector<1x32xf32> to vector<10x32xf32>
    %21 = arith.mulf %19, %20 : vector<10x32xf32>
    %22 = vector.broadcast %3 : vector<1x32xf32> to vector<10x32xf32>
    %23 = arith.addf %21, %22 : vector<10x32xf32>
    %c0_10 = arith.constant 0 : index
    %c0_11 = arith.constant 0 : index
    %c0_12 = arith.constant 0 : index
    %24 = vector.load %arg4[%c0_10, %c0_11, %c0_12] : memref<1x10x32xf32, #tpu.memory_space<vmem>>, vector<1x10x32xf32>
    %25 = vector.shape_cast %24 : vector<1x10x32xf32> to vector<10x32xf32>
    %26 = vector.shape_cast %23 : vector<10x32xf32> to vector<1x10x32xf32>
    tpu.vector_store %arg4[%c0_10, %c0_11, %c0_12], %26 {strides = array<i32>} : memref<1x10x32xf32, #tpu.memory_space<vmem>>, vector<1x10x32xf32>,
    return
  }
  func.func @transform_0(%arg0: i32) -> (i32, i32, i32) {
    %c0_i32 = arith.constant 0 : i32
    %c0_i32_0 = arith.constant 0 : i32
    %c0_i32_1 = arith.constant 0 : i32
    return %arg0, %c0_i32, %c0_i32_0 : i32, i32, i32
  }
  func.func @transform_1(%arg0: i32) -> (i32, i32) {
    %c0_i32 = arith.constant 0 : i32
    %c0_i32_0 = arith.constant 0 : i32
    %c0_i32_1 = arith.constant 0 : i32
    return %c0_i32, %c0_i32_0 : i32, i32
  }
  func.func @transform_2(%arg0: i32) -> (i32, i32) {
    %c0_i32 = arith.constant 0 : i32
    %c0_i32_0 = arith.constant 0 : i32
    %c0_i32_1 = arith.constant 0 : i32
    return %c0_i32, %c0_i32_0 : i32, i32
  }
  func.func @transform_3(%arg0: i32) -> (i32, i32, i32) {
    %c0_i32 = arith.constant 0 : i32
    %c0_i32_0 = arith.constant 0 : i32
    %c0_i32_1 = arith.constant 0 : i32
    return %arg0, %c0_i32, %c0_i32_0 : i32, i32, i32
  }
}

module attributes {stable_mosaic.version = 11 : i64} {
  func.func @_encoder_layer_kernel(%arg0: i32, %arg1: memref<1x10x32xf32, #tpu.memory_space<vmem>>, %arg2: memref<1x1x10xf32, #tpu.memory_space<vmem>>, %arg3: memref<6x32x16xf32, #tpu.memory_space<vmem>>, %arg4: memref<6x1x16xf32, #tpu.memory_space<vmem>>, %arg5: memref<2x16x32xf32, #tpu.memory_space<vmem>>, %arg6: memref<1x32xf32, #tpu.memory_space<vmem>>, %arg7: memref<1x32xf32, #tpu.memory_space<vmem>>, %arg8: memref<1x32xf32, #tpu.memory_space<vmem>>, %arg9: memref<32x128xf32, #tpu.memory_space<vmem>>, %arg10: memref<1x128xf32, #tpu.memory_space<vmem>>, %arg11: memref<128x32xf32, #tpu.memory_space<vmem>>, %arg12: memref<1x32xf32, #tpu.memory_space<vmem>>, %arg13: memref<1x32xf32, #tpu.memory_space<vmem>>, %arg14: memref<1x32xf32, #tpu.memory_space<vmem>>, %arg15: memref<1x10x32xf32, #tpu.memory_space<vmem>>) attributes {dimension_semantics = [#tpu.dimension_semantics<parallel>], iteration_bounds = array<i64: 2>, scalar_prefetch = 0 : i64, scratch_operands = 0 : i64, tpu.core_type = #tpu.core_type<tc>, window_params = [{transform_indices = @transform_0, window_bounds = array<i64: 1, 10, 32>}, {transform_indices = @transform_1, window_bounds = array<i64: 1, 1, 10>}, {pipeline_mode = #tpu.pipeline_mode<synchronous>, transform_indices = @transform_2, window_bounds = array<i64: 6, 32, 16>}, {pipeline_mode = #tpu.pipeline_mode<synchronous>, transform_indices = @transform_3, window_bounds = array<i64: 6, 1, 16>}, {pipeline_mode = #tpu.pipeline_mode<synchronous>, transform_indices = @transform_4, window_bounds = array<i64: 2, 16, 32>}, {pipeline_mode = #tpu.pipeline_mode<synchronous>, transform_indices = @transform_5, window_bounds = array<i64: 1, 32>}, {pipeline_mode = #tpu.pipeline_mode<synchronous>, transform_indices = @transform_6, window_bounds = array<i64: 1, 32>}, {pipeline_mode = #tpu.pipeline_mode<synchronous>, transform_indices = @transform_7, window_bounds = array<i64: 1, 32>}, {pipeline_mode = #tpu.pipeline_mode<synchronous>, transform_indices = @transform_8, window_bounds = array<i64: 32, 128>}, {pipeline_mode = #tpu.pipeline_mode<synchronous>, transform_indices = @transform_9, window_bounds = array<i64: 1, 128>}, {pipeline_mode = #tpu.pipeline_mode<synchronous>, transform_indices = @transform_10, window_bounds = array<i64: 128, 32>}, {pipeline_mode = #tpu.pipeline_mode<synchronous>, transform_indices = @transform_11, window_bounds = array<i64: 1, 32>}, {pipeline_mode = #tpu.pipeline_mode<synchronous>, transform_indices = @transform_12, window_bounds = array<i64: 1, 32>}, {pipeline_mode = #tpu.pipeline_mode<synchronous>, transform_indices = @transform_13, window_bounds = array<i64: 1, 32>}, {transform_indices = @transform_14, window_bounds = array<i64: 1, 10, 32>}]} {
    %c0 = arith.constant 0 : index
    %c0_0 = arith.constant 0 : index
    %c0_1 = arith.constant 0 : index
    %0 = vector.load %arg1[%c0, %c0_0, %c0_1] : memref<1x10x32xf32, #tpu.memory_space<vmem>>, vector<1x10x32xf32>
    %1 = vector.shape_cast %0 : vector<1x10x32xf32> to vector<10x32xf32>
    %c0_2 = arith.constant 0 : index
    %c0_3 = arith.constant 0 : index
    %c0_4 = arith.constant 0 : index
    %2 = vector.load %arg2[%c0_2, %c0_3, %c0_4] : memref<1x1x10xf32, #tpu.memory_space<vmem>>, vector<1x1x10xf32>
    %3 = vector.shape_cast %2 : vector<1x1x10xf32> to vector<1x10xf32>
    %c0_5 = arith.constant 0 : index
    %c0_6 = arith.constant 0 : index
    %c0_7 = arith.constant 0 : index
    %4 = vector.load %arg3[%c0_5, %c0_6, %c0_7] : memref<6x32x16xf32, #tpu.memory_space<vmem>>, vector<1x32x16xf32>
    %5 = vector.shape_cast %4 : vector<1x32x16xf32> to vector<32x16xf32>
    %cst = arith.constant dense<0.000000e+00> : vector<10x16xf32>
    %6 = tpu.matmul %1, %5, %cst {dimension_numbers = #tpu.dot_dimension_numbers<[1], [0], [0], [1], [0, 0, 1, 1], [], []>} : vector<10x32xf32>, vector<32x16xf32>, vector<10x16xf32> -> vector<10x16xf32>
    %c0_8 = arith.constant 0 : index
    %c0_9 = arith.constant 0 : index
    %c0_10 = arith.constant 0 : index
    %7 = vector.load %arg4[%c0_8, %c0_9, %c0_10] : memref<6x1x16xf32, #tpu.memory_space<vmem>>, vector<1x1x16xf32>
    %8 = vector.shape_cast %7 : vector<1x1x16xf32> to vector<1x16xf32>
    %9 = vector.broadcast %8 : vector<1x16xf32> to vector<10x16xf32>
    %10 = arith.addf %6, %9 : vector<10x16xf32>
    %c2 = arith.constant 2 : index
    %c0_11 = arith.constant 0 : index
    %c0_12 = arith.constant 0 : index
    %11 = vector.load %arg3[%c2, %c0_11, %c0_12] : memref<6x32x16xf32, #tpu.memory_space<vmem>>, vector<1x32x16xf32>
    %12 = vector.shape_cast %11 : vector<1x32x16xf32> to vector<32x16xf32>
    %cst_13 = arith.constant dense<0.000000e+00> : vector<10x16xf32>
    %13 = tpu.matmul %1, %12, %cst_13 {dimension_numbers = #tpu.dot_dimension_numbers<[1], [0], [0], [1], [0, 0, 1, 1], [], []>} : vector<10x32xf32>, vector<32x16xf32>, vector<10x16xf32> -> vector<10x16xf32>
    %c2_14 = arith.constant 2 : index
    %c0_15 = arith.constant 0 : index
    %c0_16 = arith.constant 0 : index
    %14 = vector.load %arg4[%c2_14, %c0_15, %c0_16] : memref<6x1x16xf32, #tpu.memory_space<vmem>>, vector<1x1x16xf32>
    %15 = vector.shape_cast %14 : vector<1x1x16xf32> to vector<1x16xf32>
    %16 = vector.broadcast %15 : vector<1x16xf32> to vector<10x16xf32>
    %17 = arith.addf %13, %16 : vector<10x16xf32>
    %c4 = arith.constant 4 : index
    %c0_17 = arith.constant 0 : index
    %c0_18 = arith.constant 0 : index
    %18 = vector.load %arg3[%c4, %c0_17, %c0_18] : memref<6x32x16xf32, #tpu.memory_space<vmem>>, vector<1x32x16xf32>
    %19 = vector.shape_cast %18 : vector<1x32x16xf32> to vector<32x16xf32>
    %cst_19 = arith.constant dense<0.000000e+00> : vector<10x16xf32>
    %20 = tpu.matmul %1, %19, %cst_19 {dimension_numbers = #tpu.dot_dimension_numbers<[1], [0], [0], [1], [0, 0, 1, 1], [], []>} : vector<10x32xf32>, vector<32x16xf32>, vector<10x16xf32> -> vector<10x16xf32>
    %c4_20 = arith.constant 4 : index
    %c0_21 = arith.constant 0 : index
    %c0_22 = arith.constant 0 : index
    %21 = vector.load %arg4[%c4_20, %c0_21, %c0_22] : memref<6x1x16xf32, #tpu.memory_space<vmem>>, vector<1x1x16xf32>
    %22 = vector.shape_cast %21 : vector<1x1x16xf32> to vector<1x16xf32>
    %23 = vector.broadcast %22 : vector<1x16xf32> to vector<10x16xf32>
    %24 = arith.addf %20, %23 : vector<10x16xf32>
    %cst_23 = arith.constant dense<0.000000e+00> : vector<10x10xf32>
    %25 = tpu.matmul %10, %17, %cst_23 {dimension_numbers = #tpu.dot_dimension_numbers<[1], [1], [0], [0], [0, 0, 1, 0], [], []>} : vector<10x16xf32>, vector<10x16xf32>, vector<10x10xf32> -> vector<10x10xf32>
    %cst_24 = arith.constant 2.500000e-01 : f32
    %26 = vector.broadcast %cst_24 : f32 to vector<10x10xf32>
    %27 = arith.mulf %25, %26 : vector<10x10xf32>
    %28 = vector.broadcast %3 : vector<1x10xf32> to vector<10x10xf32>
    %29 = arith.addf %27, %28 : vector<10x10xf32>
    %cst_25 = arith.constant dense<0xFF800000> : vector<10xf32>
    %30 = vector.multi_reduction <maximumf>, %29, %cst_25 [1] : vector<10x10xf32> to vector<10xf32>
    %31 = vector.shape_cast %30 : vector<10xf32> to vector<10x1xf32>
    %32 = vector.broadcast %31 : vector<10x1xf32> to vector<10x10xf32>
    %33 = arith.subf %29, %32 : vector<10x10xf32>
    %34 = math.exp %33 : vector<10x10xf32>
    %cst_26 = arith.constant dense<0.000000e+00> : vector<10xf32>
    %35 = vector.multi_reduction <add>, %34, %cst_26 [1] : vector<10x10xf32> to vector<10xf32>
    %36 = vector.shape_cast %35 : vector<10xf32> to vector<10x1xf32>
    %37 = tpu.reciprocal %36 {approx = true} : vector<10x1xf32> -> vector<10x1xf32>
    %38 = vector.broadcast %37 : vector<10x1xf32> to vector<10x10xf32>
    %39 = arith.mulf %34, %38 : vector<10x10xf32>
    %cst_27 = arith.constant dense<0.000000e+00> : vector<10x16xf32>
    %40 = tpu.matmul %39, %24, %cst_27 {dimension_numbers = #tpu.dot_dimension_numbers<[1], [0], [0], [1], [0, 0, 1, 1], [], []>} : vector<10x10xf32>, vector<10x16xf32>, vector<10x16xf32> -> vector<10x16xf32>
    %c0_28 = arith.constant 0 : index
    %c0_29 = arith.constant 0 : index
    %c0_30 = arith.constant 0 : index
    %41 = vector.load %arg5[%c0_28, %c0_29, %c0_30] : memref<2x16x32xf32, #tpu.memory_space<vmem>>, vector<1x16x32xf32>
    %42 = vector.shape_cast %41 : vector<1x16x32xf32> to vector<16x32xf32>
    %cst_31 = arith.constant dense<0.000000e+00> : vector<10x32xf32>
    %43 = tpu.matmul %40, %42, %cst_31 {dimension_numbers = #tpu.dot_dimension_numbers<[1], [0], [0], [1], [0, 0, 1, 1], [], []>} : vector<10x16xf32>, vector<16x32xf32>, vector<10x32xf32> -> vector<10x32xf32>
    %c1 = arith.constant 1 : index
    %c0_32 = arith.constant 0 : index
    %c0_33 = arith.constant 0 : index
    %44 = vector.load %arg3[%c1, %c0_32, %c0_33] : memref<6x32x16xf32, #tpu.memory_space<vmem>>, vector<1x32x16xf32>
    %45 = vector.shape_cast %44 : vector<1x32x16xf32> to vector<32x16xf32>
    %cst_34 = arith.constant dense<0.000000e+00> : vector<10x16xf32>
    %46 = tpu.matmul %1, %45, %cst_34 {dimension_numbers = #tpu.dot_dimension_numbers<[1], [0], [0], [1], [0, 0, 1, 1], [], []>} : vector<10x32xf32>, vector<32x16xf32>, vector<10x16xf32> -> vector<10x16xf32>
    %c1_35 = arith.constant 1 : index
    %c0_36 = arith.constant 0 : index
    %c0_37 = arith.constant 0 : index
    %47 = vector.load %arg4[%c1_35, %c0_36, %c0_37] : memref<6x1x16xf32, #tpu.memory_space<vmem>>, vector<1x1x16xf32>
    %48 = vector.shape_cast %47 : vector<1x1x16xf32> to vector<1x16xf32>
    %49 = vector.broadcast %48 : vector<1x16xf32> to vector<10x16xf32>
    %50 = arith.addf %46, %49 : vector<10x16xf32>
    %c3 = arith.constant 3 : index
    %c0_38 = arith.constant 0 : index
    %c0_39 = arith.constant 0 : index
    %51 = vector.load %arg3[%c3, %c0_38, %c0_39] : memref<6x32x16xf32, #tpu.memory_space<vmem>>, vector<1x32x16xf32>
    %52 = vector.shape_cast %51 : vector<1x32x16xf32> to vector<32x16xf32>
    %cst_40 = arith.constant dense<0.000000e+00> : vector<10x16xf32>
    %53 = tpu.matmul %1, %52, %cst_40 {dimension_numbers = #tpu.dot_dimension_numbers<[1], [0], [0], [1], [0, 0, 1, 1], [], []>} : vector<10x32xf32>, vector<32x16xf32>, vector<10x16xf32> -> vector<10x16xf32>
    %c3_41 = arith.constant 3 : index
    %c0_42 = arith.constant 0 : index
    %c0_43 = arith.constant 0 : index
    %54 = vector.load %arg4[%c3_41, %c0_42, %c0_43] : memref<6x1x16xf32, #tpu.memory_space<vmem>>, vector<1x1x16xf32>
    %55 = vector.shape_cast %54 : vector<1x1x16xf32> to vector<1x16xf32>
    %56 = vector.broadcast %55 : vector<1x16xf32> to vector<10x16xf32>
    %57 = arith.addf %53, %56 : vector<10x16xf32>
    %c5 = arith.constant 5 : index
    %c0_44 = arith.constant 0 : index
    %c0_45 = arith.constant 0 : index
    %58 = vector.load %arg3[%c5, %c0_44, %c0_45] : memref<6x32x16xf32, #tpu.memory_space<vmem>>, vector<1x32x16xf32>
    %59 = vector.shape_cast %58 : vector<1x32x16xf32> to vector<32x16xf32>
    %cst_46 = arith.constant dense<0.000000e+00> : vector<10x16xf32>
    %60 = tpu.matmul %1, %59, %cst_46 {dimension_numbers = #tpu.dot_dimension_numbers<[1], [0], [0], [1], [0, 0, 1, 1], [], []>} : vector<10x32xf32>, vector<32x16xf32>, vector<10x16xf32> -> vector<10x16xf32>
    %c5_47 = arith.constant 5 : index
    %c0_48 = arith.constant 0 : index
    %c0_49 = arith.constant 0 : index
    %61 = vector.load %arg4[%c5_47, %c0_48, %c0_49] : memref<6x1x16xf32, #tpu.memory_space<vmem>>, vector<1x1x16xf32>
    %62 = vector.shape_cast %61 : vector<1x1x16xf32> to vector<1x16xf32>
    %63 = vector.broadcast %62 : vector<1x16xf32> to vector<10x16xf32>
    %64 = arith.addf %60, %63 : vector<10x16xf32>
    %cst_50 = arith.constant dense<0.000000e+00> : vector<10x10xf32>
    %65 = tpu.matmul %50, %57, %cst_50 {dimension_numbers = #tpu.dot_dimension_numbers<[1], [1], [0], [0], [0, 0, 1, 0], [], []>} : vector<10x16xf32>, vector<10x16xf32>, vector<10x10xf32> -> vector<10x10xf32>
    %cst_51 = arith.constant 2.500000e-01 : f32
    %66 = vector.broadcast %cst_51 : f32 to vector<10x10xf32>
    %67 = arith.mulf %65, %66 : vector<10x10xf32>
    %68 = vector.broadcast %3 : vector<1x10xf32> to vector<10x10xf32>
    %69 = arith.addf %67, %68 : vector<10x10xf32>
    %cst_52 = arith.constant dense<0xFF800000> : vector<10xf32>
    %70 = vector.multi_reduction <maximumf>, %69, %cst_52 [1] : vector<10x10xf32> to vector<10xf32>
    %71 = vector.shape_cast %70 : vector<10xf32> to vector<10x1xf32>
    %72 = vector.broadcast %71 : vector<10x1xf32> to vector<10x10xf32>
    %73 = arith.subf %69, %72 : vector<10x10xf32>
    %74 = math.exp %73 : vector<10x10xf32>
    %cst_53 = arith.constant dense<0.000000e+00> : vector<10xf32>
    %75 = vector.multi_reduction <add>, %74, %cst_53 [1] : vector<10x10xf32> to vector<10xf32>
    %76 = vector.shape_cast %75 : vector<10xf32> to vector<10x1xf32>
    %77 = tpu.reciprocal %76 {approx = true} : vector<10x1xf32> -> vector<10x1xf32>
    %78 = vector.broadcast %77 : vector<10x1xf32> to vector<10x10xf32>
    %79 = arith.mulf %74, %78 : vector<10x10xf32>
    %cst_54 = arith.constant dense<0.000000e+00> : vector<10x16xf32>
    %80 = tpu.matmul %79, %64, %cst_54 {dimension_numbers = #tpu.dot_dimension_numbers<[1], [0], [0], [1], [0, 0, 1, 1], [], []>} : vector<10x10xf32>, vector<10x16xf32>, vector<10x16xf32> -> vector<10x16xf32>
    %c1_55 = arith.constant 1 : index
    %c0_56 = arith.constant 0 : index
    %c0_57 = arith.constant 0 : index
    %81 = vector.load %arg5[%c1_55, %c0_56, %c0_57] : memref<2x16x32xf32, #tpu.memory_space<vmem>>, vector<1x16x32xf32>
    %82 = vector.shape_cast %81 : vector<1x16x32xf32> to vector<16x32xf32>
    %cst_58 = arith.constant dense<0.000000e+00> : vector<10x32xf32>
    %83 = tpu.matmul %80, %82, %cst_58 {dimension_numbers = #tpu.dot_dimension_numbers<[1], [0], [0], [1], [0, 0, 1, 1], [], []>} : vector<10x16xf32>, vector<16x32xf32>, vector<10x32xf32> -> vector<10x32xf32>
    %84 = arith.addf %43, %83 : vector<10x32xf32>
    %c0_59 = arith.constant 0 : index
    %c0_60 = arith.constant 0 : index
    %85 = vector.load %arg6[%c0_59, %c0_60] : memref<1x32xf32, #tpu.memory_space<vmem>>, vector<1x32xf32>
    %86 = vector.broadcast %85 : vector<1x32xf32> to vector<10x32xf32>
    %87 = arith.addf %84, %86 : vector<10x32xf32>
    %88 = arith.addf %87, %1 : vector<10x32xf32>
    %c0_61 = arith.constant 0 : index
    %c0_62 = arith.constant 0 : index
    %89 = vector.load %arg7[%c0_61, %c0_62] : memref<1x32xf32, #tpu.memory_space<vmem>>, vector<1x32xf32>
    %c0_63 = arith.constant 0 : index
    %c0_64 = arith.constant 0 : index
    %90 = vector.load %arg8[%c0_63, %c0_64] : memref<1x32xf32, #tpu.memory_space<vmem>>, vector<1x32xf32>
    %cst_65 = arith.constant dense<0.000000e+00> : vector<10xf32>
    %91 = vector.multi_reduction <add>, %88, %cst_65 [1] : vector<10x32xf32> to vector<10xf32>
    %92 = vector.shape_cast %91 : vector<10xf32> to vector<10x1xf32>
    %cst_66 = arith.constant 3.200000e+01 : f32
    %93 = vector.broadcast %cst_66 : f32 to vector<10x1xf32>
    %94 = arith.divf %92, %93 : vector<10x1xf32>
    %95 = vector.broadcast %94 : vector<10x1xf32> to vector<10x32xf32>
    %96 = arith.subf %88, %95 : vector<10x32xf32>
    %97 = arith.mulf %96, %96 : vector<10x32xf32>
    %cst_67 = arith.constant dense<0.000000e+00> : vector<10xf32>
    %98 = vector.multi_reduction <add>, %97, %cst_67 [1] : vector<10x32xf32> to vector<10xf32>
    %99 = vector.shape_cast %98 : vector<10xf32> to vector<10x1xf32>
    %cst_68 = arith.constant 3.200000e+01 : f32
    %100 = vector.broadcast %cst_68 : f32 to vector<10x1xf32>
    %101 = arith.divf %99, %100 : vector<10x1xf32>
    %cst_69 = arith.constant 9.99999974E-6 : f32
    %102 = vector.broadcast %cst_69 : f32 to vector<10x1xf32>
    %103 = arith.addf %101, %102 : vector<10x1xf32>
    %104 = math.rsqrt %103 : vector<10x1xf32>
    %105 = vector.broadcast %104 : vector<10x1xf32> to vector<10x32xf32>
    %106 = arith.mulf %96, %105 : vector<10x32xf32>
    %107 = vector.broadcast %89 : vector<1x32xf32> to vector<10x32xf32>
    %108 = arith.mulf %106, %107 : vector<10x32xf32>
    %109 = vector.broadcast %90 : vector<1x32xf32> to vector<10x32xf32>
    %110 = arith.addf %108, %109 : vector<10x32xf32>
    %c0_70 = arith.constant 0 : index
    %c0_71 = arith.constant 0 : index
    %111 = vector.load %arg9[%c0_70, %c0_71] : memref<32x128xf32, #tpu.memory_space<vmem>>, vector<32x128xf32>
    %cst_72 = arith.constant dense<0.000000e+00> : vector<10x128xf32>
    %112 = tpu.matmul %110, %111, %cst_72 {dimension_numbers = #tpu.dot_dimension_numbers<[1], [0], [0], [1], [0, 0, 1, 1], [], []>} : vector<10x32xf32>, vector<32x128xf32>, vector<10x128xf32> -> vector<10x128xf32>
    %c0_73 = arith.constant 0 : index
    %c0_74 = arith.constant 0 : index
    %113 = vector.load %arg10[%c0_73, %c0_74] : memref<1x128xf32, #tpu.memory_space<vmem>>, vector<1x128xf32>
    %114 = vector.broadcast %113 : vector<1x128xf32> to vector<10x128xf32>
    %115 = arith.addf %112, %114 : vector<10x128xf32>
    %cst_75 = arith.constant 0.000000e+00 : f32
    %116 = vector.broadcast %cst_75 : f32 to vector<10x128xf32>
    %117 = arith.maximumf %115, %116 : vector<10x128xf32>
    %c0_76 = arith.constant 0 : index
    %c0_77 = arith.constant 0 : index
    %118 = vector.load %arg11[%c0_76, %c0_77] : memref<128x32xf32, #tpu.memory_space<vmem>>, vector<128x32xf32>
    %cst_78 = arith.constant dense<0.000000e+00> : vector<10x32xf32>
    %119 = tpu.matmul %117, %118, %cst_78 {dimension_numbers = #tpu.dot_dimension_numbers<[1], [0], [0], [1], [0, 0, 1, 1], [], []>} : vector<10x128xf32>, vector<128x32xf32>, vector<10x32xf32> -> vector<10x32xf32>
    %c0_79 = arith.constant 0 : index
    %c0_80 = arith.constant 0 : index
    %120 = vector.load %arg12[%c0_79, %c0_80] : memref<1x32xf32, #tpu.memory_space<vmem>>, vector<1x32xf32>
    %121 = vector.broadcast %120 : vector<1x32xf32> to vector<10x32xf32>
    %122 = arith.addf %119, %121 : vector<10x32xf32>
    %123 = arith.addf %122, %110 : vector<10x32xf32>
    %c0_81 = arith.constant 0 : index
    %c0_82 = arith.constant 0 : index
    %124 = vector.load %arg13[%c0_81, %c0_82] : memref<1x32xf32, #tpu.memory_space<vmem>>, vector<1x32xf32>
    %c0_83 = arith.constant 0 : index
    %c0_84 = arith.constant 0 : index
    %125 = vector.load %arg14[%c0_83, %c0_84] : memref<1x32xf32, #tpu.memory_space<vmem>>, vector<1x32xf32>
    %cst_85 = arith.constant dense<0.000000e+00> : vector<10xf32>
    %126 = vector.multi_reduction <add>, %123, %cst_85 [1] : vector<10x32xf32> to vector<10xf32>
    %127 = vector.shape_cast %126 : vector<10xf32> to vector<10x1xf32>
    %cst_86 = arith.constant 3.200000e+01 : f32
    %128 = vector.broadcast %cst_86 : f32 to vector<10x1xf32>
    %129 = arith.divf %127, %128 : vector<10x1xf32>
    %130 = vector.broadcast %129 : vector<10x1xf32> to vector<10x32xf32>
    %131 = arith.subf %123, %130 : vector<10x32xf32>
    %132 = arith.mulf %131, %131 : vector<10x32xf32>
    %cst_87 = arith.constant dense<0.000000e+00> : vector<10xf32>
    %133 = vector.multi_reduction <add>, %132, %cst_87 [1] : vector<10x32xf32> to vector<10xf32>
    %134 = vector.shape_cast %133 : vector<10xf32> to vector<10x1xf32>
    %cst_88 = arith.constant 3.200000e+01 : f32
    %135 = vector.broadcast %cst_88 : f32 to vector<10x1xf32>
    %136 = arith.divf %134, %135 : vector<10x1xf32>
    %cst_89 = arith.constant 9.99999974E-6 : f32
    %137 = vector.broadcast %cst_89 : f32 to vector<10x1xf32>
    %138 = arith.addf %136, %137 : vector<10x1xf32>
    %139 = math.rsqrt %138 : vector<10x1xf32>
    %140 = vector.broadcast %139 : vector<10x1xf32> to vector<10x32xf32>
    %141 = arith.mulf %131, %140 : vector<10x32xf32>
    %142 = vector.broadcast %124 : vector<1x32xf32> to vector<10x32xf32>
    %143 = arith.mulf %141, %142 : vector<10x32xf32>
    %144 = vector.broadcast %125 : vector<1x32xf32> to vector<10x32xf32>
    %145 = arith.addf %143, %144 : vector<10x32xf32>
    %c0_90 = arith.constant 0 : index
    %c0_91 = arith.constant 0 : index
    %c0_92 = arith.constant 0 : index
    %146 = vector.load %arg15[%c0_90, %c0_91, %c0_92] : memref<1x10x32xf32, #tpu.memory_space<vmem>>, vector<1x10x32xf32>
    %147 = vector.shape_cast %146 : vector<1x10x32xf32> to vector<10x32xf32>
    %148 = vector.shape_cast %145 : vector<10x32xf32> to vector<1x10x32xf32>
    tpu.vector_store %arg15[%c0_90, %c0_91, %c0_92], %148 {strides = array<i32>} : memref<1x10x32xf32, #tpu.memory_space<vmem>>, vector<1x10x32xf32>,
    return
  }
  func.func @transform_0(%arg0: i32) -> (i32, i32, i32) {
    %c0_i32 = arith.constant 0 : i32
    %c0_i32_0 = arith.constant 0 : i32
    %c0_i32_1 = arith.constant 0 : i32
    return %arg0, %c0_i32, %c0_i32_0 : i32, i32, i32
  }
  func.func @transform_1(%arg0: i32) -> (i32, i32, i32) {
    %c0_i32 = arith.constant 0 : i32
    %c0_i32_0 = arith.constant 0 : i32
    %c0_i32_1 = arith.constant 0 : i32
    return %arg0, %c0_i32, %c0_i32_0 : i32, i32, i32
  }
  func.func @transform_2(%arg0: i32) -> (i32, i32, i32) {
    %c0_i32 = arith.constant 0 : i32
    %c0_i32_0 = arith.constant 0 : i32
    %c0_i32_1 = arith.constant 0 : i32
    %c0_i32_2 = arith.constant 0 : i32
    return %c0_i32, %c0_i32_0, %c0_i32_1 : i32, i32, i32
  }
  func.func @transform_3(%arg0: i32) -> (i32, i32, i32) {
    %c0_i32 = arith.constant 0 : i32
    %c0_i32_0 = arith.constant 0 : i32
    %c0_i32_1 = arith.constant 0 : i32
    %c0_i32_2 = arith.constant 0 : i32
    return %c0_i32, %c0_i32_0, %c0_i32_1 : i32, i32, i32
  }
  func.func @transform_4(%arg0: i32) -> (i32, i32, i32) {
    %c0_i32 = arith.constant 0 : i32
    %c0_i32_0 = arith.constant 0 : i32
    %c0_i32_1 = arith.constant 0 : i32
    %c0_i32_2 = arith.constant 0 : i32
    return %c0_i32, %c0_i32_0, %c0_i32_1 : i32, i32, i32
  }
  func.func @transform_5(%arg0: i32) -> (i32, i32) {
    %c0_i32 = arith.constant 0 : i32
    %c0_i32_0 = arith.constant 0 : i32
    %c0_i32_1 = arith.constant 0 : i32
    return %c0_i32, %c0_i32_0 : i32, i32
  }
  func.func @transform_6(%arg0: i32) -> (i32, i32) {
    %c0_i32 = arith.constant 0 : i32
    %c0_i32_0 = arith.constant 0 : i32
    %c0_i32_1 = arith.constant 0 : i32
    return %c0_i32, %c0_i32_0 : i32, i32
  }
  func.func @transform_7(%arg0: i32) -> (i32, i32) {
    %c0_i32 = arith.constant 0 : i32
    %c0_i32_0 = arith.constant 0 : i32
    %c0_i32_1 = arith.constant 0 : i32
    return %c0_i32, %c0_i32_0 : i32, i32
  }
  func.func @transform_8(%arg0: i32) -> (i32, i32) {
    %c0_i32 = arith.constant 0 : i32
    %c0_i32_0 = arith.constant 0 : i32
    %c0_i32_1 = arith.constant 0 : i32
    return %c0_i32, %c0_i32_0 : i32, i32
  }
  func.func @transform_9(%arg0: i32) -> (i32, i32) {
    %c0_i32 = arith.constant 0 : i32
    %c0_i32_0 = arith.constant 0 : i32
    %c0_i32_1 = arith.constant 0 : i32
    return %c0_i32, %c0_i32_0 : i32, i32
  }
  func.func @transform_10(%arg0: i32) -> (i32, i32) {
    %c0_i32 = arith.constant 0 : i32
    %c0_i32_0 = arith.constant 0 : i32
    %c0_i32_1 = arith.constant 0 : i32
    return %c0_i32, %c0_i32_0 : i32, i32
  }
  func.func @transform_11(%arg0: i32) -> (i32, i32) {
    %c0_i32 = arith.constant 0 : i32
    %c0_i32_0 = arith.constant 0 : i32
    %c0_i32_1 = arith.constant 0 : i32
    return %c0_i32, %c0_i32_0 : i32, i32
  }
  func.func @transform_12(%arg0: i32) -> (i32, i32) {
    %c0_i32 = arith.constant 0 : i32
    %c0_i32_0 = arith.constant 0 : i32
    %c0_i32_1 = arith.constant 0 : i32
    return %c0_i32, %c0_i32_0 : i32, i32
  }
  func.func @transform_13(%arg0: i32) -> (i32, i32) {
    %c0_i32 = arith.constant 0 : i32
    %c0_i32_0 = arith.constant 0 : i32
    %c0_i32_1 = arith.constant 0 : i32
    return %c0_i32, %c0_i32_0 : i32, i32
  }
  func.func @transform_14(%arg0: i32) -> (i32, i32, i32) {
    %c0_i32 = arith.constant 0 : i32
    %c0_i32_0 = arith.constant 0 : i32
    %c0_i32_1 = arith.constant 0 : i32
    return %arg0, %c0_i32, %c0_i32_0 : i32, i32, i32
  }
}

module attributes {stable_mosaic.version = 11 : i64} {
  func.func @_norm_project_kernel(%arg0: i32, %arg1: memref<1x8x32xf32, #tpu.memory_space<vmem>>, %arg2: memref<1x32xf32, #tpu.memory_space<vmem>>, %arg3: memref<1x32xf32, #tpu.memory_space<vmem>>, %arg4: memref<32x48xf32, #tpu.memory_space<vmem>>, %arg5: memref<1x48xf32, #tpu.memory_space<vmem>>, %arg6: memref<1x8x48xf32, #tpu.memory_space<vmem>>) attributes {dimension_semantics = [#tpu.dimension_semantics<parallel>], iteration_bounds = array<i64: 2>, scalar_prefetch = 0 : i64, scratch_operands = 0 : i64, tpu.core_type = #tpu.core_type<tc>, window_params = [{transform_indices = @transform_0, window_bounds = array<i64: 1, 8, 32>}, {pipeline_mode = #tpu.pipeline_mode<synchronous>, transform_indices = @transform_1, window_bounds = array<i64: 1, 32>}, {pipeline_mode = #tpu.pipeline_mode<synchronous>, transform_indices = @transform_2, window_bounds = array<i64: 1, 32>}, {pipeline_mode = #tpu.pipeline_mode<synchronous>, transform_indices = @transform_3, window_bounds = array<i64: 32, 48>}, {pipeline_mode = #tpu.pipeline_mode<synchronous>, transform_indices = @transform_4, window_bounds = array<i64: 1, 48>}, {transform_indices = @transform_5, window_bounds = array<i64: 1, 8, 48>}]} {
    %c0 = arith.constant 0 : index
    %c0_0 = arith.constant 0 : index
    %c0_1 = arith.constant 0 : index
    %0 = vector.load %arg1[%c0, %c0_0, %c0_1] : memref<1x8x32xf32, #tpu.memory_space<vmem>>, vector<1x8x32xf32>
    %1 = vector.shape_cast %0 : vector<1x8x32xf32> to vector<8x32xf32>
    %c0_2 = arith.constant 0 : index
    %c0_3 = arith.constant 0 : index
    %2 = vector.load %arg2[%c0_2, %c0_3] : memref<1x32xf32, #tpu.memory_space<vmem>>, vector<1x32xf32>
    %c0_4 = arith.constant 0 : index
    %c0_5 = arith.constant 0 : index
    %3 = vector.load %arg3[%c0_4, %c0_5] : memref<1x32xf32, #tpu.memory_space<vmem>>, vector<1x32xf32>
    %cst = arith.constant dense<0.000000e+00> : vector<8xf32>
    %4 = vector.multi_reduction <add>, %1, %cst [1] : vector<8x32xf32> to vector<8xf32>
    %5 = vector.shape_cast %4 : vector<8xf32> to vector<8x1xf32>
    %cst_6 = arith.constant 3.200000e+01 : f32
    %6 = vector.broadcast %cst_6 : f32 to vector<8x1xf32>
    %7 = arith.divf %5, %6 : vector<8x1xf32>
    %8 = vector.broadcast %7 : vector<8x1xf32> to vector<8x32xf32>
    %9 = arith.subf %1, %8 : vector<8x32xf32>
    %10 = arith.mulf %9, %9 : vector<8x32xf32>
    %cst_7 = arith.constant dense<0.000000e+00> : vector<8xf32>
    %11 = vector.multi_reduction <add>, %10, %cst_7 [1] : vector<8x32xf32> to vector<8xf32>
    %12 = vector.shape_cast %11 : vector<8xf32> to vector<8x1xf32>
    %cst_8 = arith.constant 3.200000e+01 : f32
    %13 = vector.broadcast %cst_8 : f32 to vector<8x1xf32>
    %14 = arith.divf %12, %13 : vector<8x1xf32>
    %cst_9 = arith.constant 9.99999974E-6 : f32
    %15 = vector.broadcast %cst_9 : f32 to vector<8x1xf32>
    %16 = arith.addf %14, %15 : vector<8x1xf32>
    %17 = math.rsqrt %16 : vector<8x1xf32>
    %18 = vector.broadcast %17 : vector<8x1xf32> to vector<8x32xf32>
    %19 = arith.mulf %9, %18 : vector<8x32xf32>
    %20 = vector.broadcast %2 : vector<1x32xf32> to vector<8x32xf32>
    %21 = arith.mulf %19, %20 : vector<8x32xf32>
    %22 = vector.broadcast %3 : vector<1x32xf32> to vector<8x32xf32>
    %23 = arith.addf %21, %22 : vector<8x32xf32>
    %c0_10 = arith.constant 0 : index
    %c0_11 = arith.constant 0 : index
    %24 = vector.load %arg4[%c0_10, %c0_11] : memref<32x48xf32, #tpu.memory_space<vmem>>, vector<32x48xf32>
    %cst_12 = arith.constant dense<0.000000e+00> : vector<8x48xf32>
    %25 = tpu.matmul %23, %24, %cst_12 {dimension_numbers = #tpu.dot_dimension_numbers<[1], [0], [0], [1], [0, 0, 1, 1], [], []>} : vector<8x32xf32>, vector<32x48xf32>, vector<8x48xf32> -> vector<8x48xf32>
    %c0_13 = arith.constant 0 : index
    %c0_14 = arith.constant 0 : index
    %26 = vector.load %arg5[%c0_13, %c0_14] : memref<1x48xf32, #tpu.memory_space<vmem>>, vector<1x48xf32>
    %27 = vector.broadcast %26 : vector<1x48xf32> to vector<8x48xf32>
    %28 = arith.addf %25, %27 : vector<8x48xf32>
    %c0_15 = arith.constant 0 : index
    %c0_16 = arith.constant 0 : index
    %c0_17 = arith.constant 0 : index
    %29 = vector.load %arg6[%c0_15, %c0_16, %c0_17] : memref<1x8x48xf32, #tpu.memory_space<vmem>>, vector<1x8x48xf32>
    %30 = vector.shape_cast %29 : vector<1x8x48xf32> to vector<8x48xf32>
    %31 = vector.shape_cast %28 : vector<8x48xf32> to vector<1x8x48xf32>
    tpu.vector_store %arg6[%c0_15, %c0_16, %c0_17], %31 {strides = array<i32>} : memref<1x8x48xf32, #tpu.memory_space<vmem>>, vector<1x8x48xf32>,
    return
  }
  func.func @transform_0(%arg0: i32) -> (i32, i32, i32) {
    %c0_i32 = arith.constant 0 : i32
    %c0_i32_0 = arith.constant 0 : i32
    %c0_i32_1 = arith.constant 0 : i32
    return %arg0, %c0_i32, %c0_i32_0 : i32, i32, i32
  }
  func.func @transform_1(%arg0: i32) -> (i32, i32) {
    %c0_i32 = arith.constant 0 : i32
    %c0_i32_0 = arith.constant 0 : i32
    %c0_i32_1 = arith.constant 0 : i32
    return %c0_i32, %c0_i32_0 : i32, i32
  }
  func.func @transform_2(%arg0: i32) -> (i32, i32) {
    %c0_i32 = arith.constant 0 : i32
    %c0_i32_0 = arith.constant 0 : i32
    %c0_i32_1 = arith.constant 0 : i32
    return %c0_i32, %c0_i32_0 : i32, i32
  }
  func.func @transform_3(%arg0: i32) -> (i32, i32) {
    %c0_i32 = arith.constant 0 : i32
    %c0_i32_0 = arith.constant 0 : i32
    %c0_i32_1 = arith.constant 0 : i32
    return %c0_i32, %c0_i32_0 : i32, i32
  }
  func.func @transform_4(%arg0: i32) -> (i32, i32) {
    %c0_i32 = arith.constant 0 : i32
    %c0_i32_0 = arith.constant 0 : i32
    %c0_i32_1 = arith.constant 0 : i32
    return %c0_i32, %c0_i32_0 : i32, i32
  }
  func.func @transform_5(%arg0: i32) -> (i32, i32, i32) {
    %c0_i32 = arith.constant 0 : i32
    %c0_i32_0 = arith.constant 0 : i32
    %c0_i32_1 = arith.constant 0 : i32
    return %arg0, %c0_i32, %c0_i32_0 : i32, i32, i32
  }
}

module attributes {stable_mosaic.version = 11 : i64} {
  func.func @_decoder_layer_kernel(%arg0: i32, %arg1: memref<1x8x32xf32, #tpu.memory_space<vmem>>, %arg2: memref<1x10x32xf32, #tpu.memory_space<vmem>>, %arg3: memref<6x32x16xf32, #tpu.memory_space<vmem>>, %arg4: memref<6x1x16xf32, #tpu.memory_space<vmem>>, %arg5: memref<2x16x32xf32, #tpu.memory_space<vmem>>, %arg6: memref<1x32xf32, #tpu.memory_space<vmem>>, %arg7: memref<1x32xf32, #tpu.memory_space<vmem>>, %arg8: memref<1x32xf32, #tpu.memory_space<vmem>>, %arg9: memref<6x32x16xf32, #tpu.memory_space<vmem>>, %arg10: memref<6x1x16xf32, #tpu.memory_space<vmem>>, %arg11: memref<2x16x32xf32, #tpu.memory_space<vmem>>, %arg12: memref<1x32xf32, #tpu.memory_space<vmem>>, %arg13: memref<1x32xf32, #tpu.memory_space<vmem>>, %arg14: memref<1x32xf32, #tpu.memory_space<vmem>>, %arg15: memref<32x128xf32, #tpu.memory_space<vmem>>, %arg16: memref<1x128xf32, #tpu.memory_space<vmem>>, %arg17: memref<128x32xf32, #tpu.memory_space<vmem>>, %arg18: memref<1x32xf32, #tpu.memory_space<vmem>>, %arg19: memref<1x32xf32, #tpu.memory_space<vmem>>, %arg20: memref<1x32xf32, #tpu.memory_space<vmem>>, %arg21: memref<1x8x32xf32, #tpu.memory_space<vmem>>) attributes {dimension_semantics = [#tpu.dimension_semantics<parallel>], iteration_bounds = array<i64: 2>, scalar_prefetch = 0 : i64, scratch_operands = 0 : i64, tpu.core_type = #tpu.core_type<tc>, window_params = [{transform_indices = @transform_0, window_bounds = array<i64: 1, 8, 32>}, {transform_indices = @transform_1, window_bounds = array<i64: 1, 10, 32>}, {pipeline_mode = #tpu.pipeline_mode<synchronous>, transform_indices = @transform_2, window_bounds = array<i64: 6, 32, 16>}, {pipeline_mode = #tpu.pipeline_mode<synchronous>, transform_indices = @transform_3, window_bounds = array<i64: 6, 1, 16>}, {pipeline_mode = #tpu.pipeline_mode<synchronous>, transform_indices = @transform_4, window_bounds = array<i64: 2, 16, 32>}, {pipeline_mode = #tpu.pipeline_mode<synchronous>, transform_indices = @transform_5, window_bounds = array<i64: 1, 32>}, {pipeline_mode = #tpu.pipeline_mode<synchronous>, transform_indices = @transform_6, window_bounds = array<i64: 1, 32>}, {pipeline_mode = #tpu.pipeline_mode<synchronous>, transform_indices = @transform_7, window_bounds = array<i64: 1, 32>}, {pipeline_mode = #tpu.pipeline_mode<synchronous>, transform_indices = @transform_8, window_bounds = array<i64: 6, 32, 16>}, {pipeline_mode = #tpu.pipeline_mode<synchronous>, transform_indices = @transform_9, window_bounds = array<i64: 6, 1, 16>}, {pipeline_mode = #tpu.pipeline_mode<synchronous>, transform_indices = @transform_10, window_bounds = array<i64: 2, 16, 32>}, {pipeline_mode = #tpu.pipeline_mode<synchronous>, transform_indices = @transform_11, window_bounds = array<i64: 1, 32>}, {pipeline_mode = #tpu.pipeline_mode<synchronous>, transform_indices = @transform_12, window_bounds = array<i64: 1, 32>}, {pipeline_mode = #tpu.pipeline_mode<synchronous>, transform_indices = @transform_13, window_bounds = array<i64: 1, 32>}, {pipeline_mode = #tpu.pipeline_mode<synchronous>, transform_indices = @transform_14, window_bounds = array<i64: 32, 128>}, {pipeline_mode = #tpu.pipeline_mode<synchronous>, transform_indices = @transform_15, window_bounds = array<i64: 1, 128>}, {pipeline_mode = #tpu.pipeline_mode<synchronous>, transform_indices = @transform_16, window_bounds = array<i64: 128, 32>}, {pipeline_mode = #tpu.pipeline_mode<synchronous>, transform_indices = @transform_17, window_bounds = array<i64: 1, 32>}, {pipeline_mode = #tpu.pipeline_mode<synchronous>, transform_indices = @transform_18, window_bounds = array<i64: 1, 32>}, {pipeline_mode = #tpu.pipeline_mode<synchronous>, transform_indices = @transform_19, window_bounds = array<i64: 1, 32>}, {transform_indices = @transform_20, window_bounds = array<i64: 1, 8, 32>}]} {
    %c0 = arith.constant 0 : index
    %c0_0 = arith.constant 0 : index
    %c0_1 = arith.constant 0 : index
    %0 = vector.load %arg1[%c0, %c0_0, %c0_1] : memref<1x8x32xf32, #tpu.memory_space<vmem>>, vector<1x8x32xf32>
    %1 = vector.shape_cast %0 : vector<1x8x32xf32> to vector<8x32xf32>
    %c0_2 = arith.constant 0 : index
    %c0_3 = arith.constant 0 : index
    %c0_4 = arith.constant 0 : index
    %2 = vector.load %arg2[%c0_2, %c0_3, %c0_4] : memref<1x10x32xf32, #tpu.memory_space<vmem>>, vector<1x10x32xf32>
    %3 = vector.shape_cast %2 : vector<1x10x32xf32> to vector<10x32xf32>
    %4 = tpu.iota {dimensions = array<i32: 0>} : vector<8x8xi32>
    %5 = tpu.iota {dimensions = array<i32: 1>} : vector<8x8xi32>
    %6 = arith.cmpi sgt, %5, %4 : vector<8x8xi32>
    %cst = arith.constant -1.000000e+09 : f32
    %cst_5 = arith.constant 0.000000e+00 : f32
    %7 = vector.broadcast %cst : f32 to vector<8x8xf32>
    %8 = vector.broadcast %cst_5 : f32 to vector<8x8xf32>
    %9 = arith.select %6, %7, %8 : vector<8x8xi1>, vector<8x8xf32>
    %c0_6 = arith.constant 0 : index
    %c0_7 = arith.constant 0 : index
    %c0_8 = arith.constant 0 : index
    %10 = vector.load %arg3[%c0_6, %c0_7, %c0_8] : memref<6x32x16xf32, #tpu.memory_space<vmem>>, vector<1x32x16xf32>
    %11 = vector.shape_cast %10 : vector<1x32x16xf32> to vector<32x16xf32>
    %cst_9 = arith.constant dense<0.000000e+00> : vector<8x16xf32>
    %12 = tpu.matmul %1, %11, %cst_9 {dimension_numbers = #tpu.dot_dimension_numbers<[1], [0], [0], [1], [0, 0, 1, 1], [], []>} : vector<8x32xf32>, vector<32x16xf32>, vector<8x16xf32> -> vector<8x16xf32>
    %c0_10 = arith.constant 0 : index
    %c0_11 = arith.constant 0 : index
    %c0_12 = arith.constant 0 : index
    %13 = vector.load %arg4[%c0_10, %c0_11, %c0_12] : memref<6x1x16xf32, #tpu.memory_space<vmem>>, vector<1x1x16xf32>
    %14 = vector.shape_cast %13 : vector<1x1x16xf32> to vector<1x16xf32>
    %15 = vector.broadcast %14 : vector<1x16xf32> to vector<8x16xf32>
    %16 = arith.addf %12, %15 : vector<8x16xf32>
    %c2 = arith.constant 2 : index
    %c0_13 = arith.constant 0 : index
    %c0_14 = arith.constant 0 : index
    %17 = vector.load %arg3[%c2, %c0_13, %c0_14] : memref<6x32x16xf32, #tpu.memory_space<vmem>>, vector<1x32x16xf32>
    %18 = vector.shape_cast %17 : vector<1x32x16xf32> to vector<32x16xf32>
    %cst_15 = arith.constant dense<0.000000e+00> : vector<8x16xf32>
    %19 = tpu.matmul %1, %18, %cst_15 {dimension_numbers = #tpu.dot_dimension_numbers<[1], [0], [0], [1], [0, 0, 1, 1], [], []>} : vector<8x32xf32>, vector<32x16xf32>, vector<8x16xf32> -> vector<8x16xf32>
    %c2_16 = arith.constant 2 : index
    %c0_17 = arith.constant 0 : index
    %c0_18 = arith.constant 0 : index
    %20 = vector.load %arg4[%c2_16, %c0_17, %c0_18] : memref<6x1x16xf32, #tpu.memory_space<vmem>>, vector<1x1x16xf32>
    %21 = vector.shape_cast %20 : vector<1x1x16xf32> to vector<1x16xf32>
    %22 = vector.broadcast %21 : vector<1x16xf32> to vector<8x16xf32>
    %23 = arith.addf %19, %22 : vector<8x16xf32>
    %c4 = arith.constant 4 : index
    %c0_19 = arith.constant 0 : index
    %c0_20 = arith.constant 0 : index
    %24 = vector.load %arg3[%c4, %c0_19, %c0_20] : memref<6x32x16xf32, #tpu.memory_space<vmem>>, vector<1x32x16xf32>
    %25 = vector.shape_cast %24 : vector<1x32x16xf32> to vector<32x16xf32>
    %cst_21 = arith.constant dense<0.000000e+00> : vector<8x16xf32>
    %26 = tpu.matmul %1, %25, %cst_21 {dimension_numbers = #tpu.dot_dimension_numbers<[1], [0], [0], [1], [0, 0, 1, 1], [], []>} : vector<8x32xf32>, vector<32x16xf32>, vector<8x16xf32> -> vector<8x16xf32>
    %c4_22 = arith.constant 4 : index
    %c0_23 = arith.constant 0 : index
    %c0_24 = arith.constant 0 : index
    %27 = vector.load %arg4[%c4_22, %c0_23, %c0_24] : memref<6x1x16xf32, #tpu.memory_space<vmem>>, vector<1x1x16xf32>
    %28 = vector.shape_cast %27 : vector<1x1x16xf32> to vector<1x16xf32>
    %29 = vector.broadcast %28 : vector<1x16xf32> to vector<8x16xf32>
    %30 = arith.addf %26, %29 : vector<8x16xf32>
    %cst_25 = arith.constant dense<0.000000e+00> : vector<8x8xf32>
    %31 = tpu.matmul %16, %23, %cst_25 {dimension_numbers = #tpu.dot_dimension_numbers<[1], [1], [0], [0], [0, 0, 1, 0], [], []>} : vector<8x16xf32>, vector<8x16xf32>, vector<8x8xf32> -> vector<8x8xf32>
    %cst_26 = arith.constant 2.500000e-01 : f32
    %32 = vector.broadcast %cst_26 : f32 to vector<8x8xf32>
    %33 = arith.mulf %31, %32 : vector<8x8xf32>
    %34 = arith.addf %33, %9 : vector<8x8xf32>
    %cst_27 = arith.constant dense<0xFF800000> : vector<8xf32>
    %35 = vector.multi_reduction <maximumf>, %34, %cst_27 [1] : vector<8x8xf32> to vector<8xf32>
    %36 = vector.shape_cast %35 : vector<8xf32> to vector<8x1xf32>
    %37 = vector.broadcast %36 : vector<8x1xf32> to vector<8x8xf32>
    %38 = arith.subf %34, %37 : vector<8x8xf32>
    %39 = math.exp %38 : vector<8x8xf32>
    %cst_28 = arith.constant dense<0.000000e+00> : vector<8xf32>
    %40 = vector.multi_reduction <add>, %39, %cst_28 [1] : vector<8x8xf32> to vector<8xf32>
    %41 = vector.shape_cast %40 : vector<8xf32> to vector<8x1xf32>
    %42 = tpu.reciprocal %41 {approx = true} : vector<8x1xf32> -> vector<8x1xf32>
    %43 = vector.broadcast %42 : vector<8x1xf32> to vector<8x8xf32>
    %44 = arith.mulf %39, %43 : vector<8x8xf32>
    %cst_29 = arith.constant dense<0.000000e+00> : vector<8x16xf32>
    %45 = tpu.matmul %44, %30, %cst_29 {dimension_numbers = #tpu.dot_dimension_numbers<[1], [0], [0], [1], [0, 0, 1, 1], [], []>} : vector<8x8xf32>, vector<8x16xf32>, vector<8x16xf32> -> vector<8x16xf32>
    %c0_30 = arith.constant 0 : index
    %c0_31 = arith.constant 0 : index
    %c0_32 = arith.constant 0 : index
    %46 = vector.load %arg5[%c0_30, %c0_31, %c0_32] : memref<2x16x32xf32, #tpu.memory_space<vmem>>, vector<1x16x32xf32>
    %47 = vector.shape_cast %46 : vector<1x16x32xf32> to vector<16x32xf32>
    %cst_33 = arith.constant dense<0.000000e+00> : vector<8x32xf32>
    %48 = tpu.matmul %45, %47, %cst_33 {dimension_numbers = #tpu.dot_dimension_numbers<[1], [0], [0], [1], [0, 0, 1, 1], [], []>} : vector<8x16xf32>, vector<16x32xf32>, vector<8x32xf32> -> vector<8x32xf32>
    %c1 = arith.constant 1 : index
    %c0_34 = arith.constant 0 : index
    %c0_35 = arith.constant 0 : index
    %49 = vector.load %arg3[%c1, %c0_34, %c0_35] : memref<6x32x16xf32, #tpu.memory_space<vmem>>, vector<1x32x16xf32>
    %50 = vector.shape_cast %49 : vector<1x32x16xf32> to vector<32x16xf32>
    %cst_36 = arith.constant dense<0.000000e+00> : vector<8x16xf32>
    %51 = tpu.matmul %1, %50, %cst_36 {dimension_numbers = #tpu.dot_dimension_numbers<[1], [0], [0], [1], [0, 0, 1, 1], [], []>} : vector<8x32xf32>, vector<32x16xf32>, vector<8x16xf32> -> vector<8x16xf32>
    %c1_37 = arith.constant 1 : index
    %c0_38 = arith.constant 0 : index
    %c0_39 = arith.constant 0 : index
    %52 = vector.load %arg4[%c1_37, %c0_38, %c0_39] : memref<6x1x16xf32, #tpu.memory_space<vmem>>, vector<1x1x16xf32>
    %53 = vector.shape_cast %52 : vector<1x1x16xf32> to vector<1x16xf32>
    %54 = vector.broadcast %53 : vector<1x16xf32> to vector<8x16xf32>
    %55 = arith.addf %51, %54 : vector<8x16xf32>
    %c3 = arith.constant 3 : index
    %c0_40 = arith.constant 0 : index
    %c0_41 = arith.constant 0 : index
    %56 = vector.load %arg3[%c3, %c0_40, %c0_41] : memref<6x32x16xf32, #tpu.memory_space<vmem>>, vector<1x32x16xf32>
    %57 = vector.shape_cast %56 : vector<1x32x16xf32> to vector<32x16xf32>
    %cst_42 = arith.constant dense<0.000000e+00> : vector<8x16xf32>
    %58 = tpu.matmul %1, %57, %cst_42 {dimension_numbers = #tpu.dot_dimension_numbers<[1], [0], [0], [1], [0, 0, 1, 1], [], []>} : vector<8x32xf32>, vector<32x16xf32>, vector<8x16xf32> -> vector<8x16xf32>
    %c3_43 = arith.constant 3 : index
    %c0_44 = arith.constant 0 : index
    %c0_45 = arith.constant 0 : index
    %59 = vector.load %arg4[%c3_43, %c0_44, %c0_45] : memref<6x1x16xf32, #tpu.memory_space<vmem>>, vector<1x1x16xf32>
    %60 = vector.shape_cast %59 : vector<1x1x16xf32> to vector<1x16xf32>
    %61 = vector.broadcast %60 : vector<1x16xf32> to vector<8x16xf32>
    %62 = arith.addf %58, %61 : vector<8x16xf32>
    %c5 = arith.constant 5 : index
    %c0_46 = arith.constant 0 : index
    %c0_47 = arith.constant 0 : index
    %63 = vector.load %arg3[%c5, %c0_46, %c0_47] : memref<6x32x16xf32, #tpu.memory_space<vmem>>, vector<1x32x16xf32>
    %64 = vector.shape_cast %63 : vector<1x32x16xf32> to vector<32x16xf32>
    %cst_48 = arith.constant dense<0.000000e+00> : vector<8x16xf32>
    %65 = tpu.matmul %1, %64, %cst_48 {dimension_numbers = #tpu.dot_dimension_numbers<[1], [0], [0], [1], [0, 0, 1, 1], [], []>} : vector<8x32xf32>, vector<32x16xf32>, vector<8x16xf32> -> vector<8x16xf32>
    %c5_49 = arith.constant 5 : index
    %c0_50 = arith.constant 0 : index
    %c0_51 = arith.constant 0 : index
    %66 = vector.load %arg4[%c5_49, %c0_50, %c0_51] : memref<6x1x16xf32, #tpu.memory_space<vmem>>, vector<1x1x16xf32>
    %67 = vector.shape_cast %66 : vector<1x1x16xf32> to vector<1x16xf32>
    %68 = vector.broadcast %67 : vector<1x16xf32> to vector<8x16xf32>
    %69 = arith.addf %65, %68 : vector<8x16xf32>
    %cst_52 = arith.constant dense<0.000000e+00> : vector<8x8xf32>
    %70 = tpu.matmul %55, %62, %cst_52 {dimension_numbers = #tpu.dot_dimension_numbers<[1], [1], [0], [0], [0, 0, 1, 0], [], []>} : vector<8x16xf32>, vector<8x16xf32>, vector<8x8xf32> -> vector<8x8xf32>
    %cst_53 = arith.constant 2.500000e-01 : f32
    %71 = vector.broadcast %cst_53 : f32 to vector<8x8xf32>
    %72 = arith.mulf %70, %71 : vector<8x8xf32>
    %73 = arith.addf %72, %9 : vector<8x8xf32>
    %cst_54 = arith.constant dense<0xFF800000> : vector<8xf32>
    %74 = vector.multi_reduction <maximumf>, %73, %cst_54 [1] : vector<8x8xf32> to vector<8xf32>
    %75 = vector.shape_cast %74 : vector<8xf32> to vector<8x1xf32>
    %76 = vector.broadcast %75 : vector<8x1xf32> to vector<8x8xf32>
    %77 = arith.subf %73, %76 : vector<8x8xf32>
    %78 = math.exp %77 : vector<8x8xf32>
    %cst_55 = arith.constant dense<0.000000e+00> : vector<8xf32>
    %79 = vector.multi_reduction <add>, %78, %cst_55 [1] : vector<8x8xf32> to vector<8xf32>
    %80 = vector.shape_cast %79 : vector<8xf32> to vector<8x1xf32>
    %81 = tpu.reciprocal %80 {approx = true} : vector<8x1xf32> -> vector<8x1xf32>
    %82 = vector.broadcast %81 : vector<8x1xf32> to vector<8x8xf32>
    %83 = arith.mulf %78, %82 : vector<8x8xf32>
    %cst_56 = arith.constant dense<0.000000e+00> : vector<8x16xf32>
    %84 = tpu.matmul %83, %69, %cst_56 {dimension_numbers = #tpu.dot_dimension_numbers<[1], [0], [0], [1], [0, 0, 1, 1], [], []>} : vector<8x8xf32>, vector<8x16xf32>, vector<8x16xf32> -> vector<8x16xf32>
    %c1_57 = arith.constant 1 : index
    %c0_58 = arith.constant 0 : index
    %c0_59 = arith.constant 0 : index
    %85 = vector.load %arg5[%c1_57, %c0_58, %c0_59] : memref<2x16x32xf32, #tpu.memory_space<vmem>>, vector<1x16x32xf32>
    %86 = vector.shape_cast %85 : vector<1x16x32xf32> to vector<16x32xf32>
    %cst_60 = arith.constant dense<0.000000e+00> : vector<8x32xf32>
    %87 = tpu.matmul %84, %86, %cst_60 {dimension_numbers = #tpu.dot_dimension_numbers<[1], [0], [0], [1], [0, 0, 1, 1], [], []>} : vector<8x16xf32>, vector<16x32xf32>, vector<8x32xf32> -> vector<8x32xf32>
    %88 = arith.addf %48, %87 : vector<8x32xf32>
    %c0_61 = arith.constant 0 : index
    %c0_62 = arith.constant 0 : index
    %89 = vector.load %arg6[%c0_61, %c0_62] : memref<1x32xf32, #tpu.memory_space<vmem>>, vector<1x32xf32>
    %90 = vector.broadcast %89 : vector<1x32xf32> to vector<8x32xf32>
    %91 = arith.addf %88, %90 : vector<8x32xf32>
    %92 = arith.addf %91, %1 : vector<8x32xf32>
    %c0_63 = arith.constant 0 : index
    %c0_64 = arith.constant 0 : index
    %93 = vector.load %arg7[%c0_63, %c0_64] : memref<1x32xf32, #tpu.memory_space<vmem>>, vector<1x32xf32>
    %c0_65 = arith.constant 0 : index
    %c0_66 = arith.constant 0 : index
    %94 = vector.load %arg8[%c0_65, %c0_66] : memref<1x32xf32, #tpu.memory_space<vmem>>, vector<1x32xf32>
    %cst_67 = arith.constant dense<0.000000e+00> : vector<8xf32>
    %95 = vector.multi_reduction <add>, %92, %cst_67 [1] : vector<8x32xf32> to vector<8xf32>
    %96 = vector.shape_cast %95 : vector<8xf32> to vector<8x1xf32>
    %cst_68 = arith.constant 3.200000e+01 : f32
    %97 = vector.broadcast %cst_68 : f32 to vector<8x1xf32>
    %98 = arith.divf %96, %97 : vector<8x1xf32>
    %99 = vector.broadcast %98 : vector<8x1xf32> to vector<8x32xf32>
    %100 = arith.subf %92, %99 : vector<8x32xf32>
    %101 = arith.mulf %100, %100 : vector<8x32xf32>
    %cst_69 = arith.constant dense<0.000000e+00> : vector<8xf32>
    %102 = vector.multi_reduction <add>, %101, %cst_69 [1] : vector<8x32xf32> to vector<8xf32>
    %103 = vector.shape_cast %102 : vector<8xf32> to vector<8x1xf32>
    %cst_70 = arith.constant 3.200000e+01 : f32
    %104 = vector.broadcast %cst_70 : f32 to vector<8x1xf32>
    %105 = arith.divf %103, %104 : vector<8x1xf32>
    %cst_71 = arith.constant 9.99999974E-6 : f32
    %106 = vector.broadcast %cst_71 : f32 to vector<8x1xf32>
    %107 = arith.addf %105, %106 : vector<8x1xf32>
    %108 = math.rsqrt %107 : vector<8x1xf32>
    %109 = vector.broadcast %108 : vector<8x1xf32> to vector<8x32xf32>
    %110 = arith.mulf %100, %109 : vector<8x32xf32>
    %111 = vector.broadcast %93 : vector<1x32xf32> to vector<8x32xf32>
    %112 = arith.mulf %110, %111 : vector<8x32xf32>
    %113 = vector.broadcast %94 : vector<1x32xf32> to vector<8x32xf32>
    %114 = arith.addf %112, %113 : vector<8x32xf32>
    %c0_72 = arith.constant 0 : index
    %c0_73 = arith.constant 0 : index
    %c0_74 = arith.constant 0 : index
    %115 = vector.load %arg9[%c0_72, %c0_73, %c0_74] : memref<6x32x16xf32, #tpu.memory_space<vmem>>, vector<1x32x16xf32>
    %116 = vector.shape_cast %115 : vector<1x32x16xf32> to vector<32x16xf32>
    %cst_75 = arith.constant dense<0.000000e+00> : vector<8x16xf32>
    %117 = tpu.matmul %114, %116, %cst_75 {dimension_numbers = #tpu.dot_dimension_numbers<[1], [0], [0], [1], [0, 0, 1, 1], [], []>} : vector<8x32xf32>, vector<32x16xf32>, vector<8x16xf32> -> vector<8x16xf32>
    %c0_76 = arith.constant 0 : index
    %c0_77 = arith.constant 0 : index
    %c0_78 = arith.constant 0 : index
    %118 = vector.load %arg10[%c0_76, %c0_77, %c0_78] : memref<6x1x16xf32, #tpu.memory_space<vmem>>, vector<1x1x16xf32>
    %119 = vector.shape_cast %118 : vector<1x1x16xf32> to vector<1x16xf32>
    %120 = vector.broadcast %119 : vector<1x16xf32> to vector<8x16xf32>
    %121 = arith.addf %117, %120 : vector<8x16xf32>
    %c2_79 = arith.constant 2 : index
    %c0_80 = arith.constant 0 : index
    %c0_81 = arith.constant 0 : index
    %122 = vector.load %arg9[%c2_79, %c0_80, %c0_81] : memref<6x32x16xf32, #tpu.memory_space<vmem>>, vector<1x32x16xf32>
    %123 = vector.shape_cast %122 : vector<1x32x16xf32> to vector<32x16xf32>
    %cst_82 = arith.constant dense<0.000000e+00> : vector<10x16xf32>
    %124 = tpu.matmul %3, %123, %cst_82 {dimension_numbers = #tpu.dot_dimension_numbers<[1], [0], [0], [1], [0, 0, 1, 1], [], []>} : vector<10x32xf32>, vector<32x16xf32>, vector<10x16xf32> -> vector<10x16xf32>
    %c2_83 = arith.constant 2 : index
    %c0_84 = arith.constant 0 : index
    %c0_85 = arith.constant 0 : index
    %125 = vector.load %arg10[%c2_83, %c0_84, %c0_85] : memref<6x1x16xf32, #tpu.memory_space<vmem>>, vector<1x1x16xf32>
    %126 = vector.shape_cast %125 : vector<1x1x16xf32> to vector<1x16xf32>
    %127 = vector.broadcast %126 : vector<1x16xf32> to vector<10x16xf32>
    %128 = arith.addf %124, %127 : vector<10x16xf32>
    %c4_86 = arith.constant 4 : index
    %c0_87 = arith.constant 0 : index
    %c0_88 = arith.constant 0 : index
    %129 = vector.load %arg9[%c4_86, %c0_87, %c0_88] : memref<6x32x16xf32, #tpu.memory_space<vmem>>, vector<1x32x16xf32>
    %130 = vector.shape_cast %129 : vector<1x32x16xf32> to vector<32x16xf32>
    %cst_89 = arith.constant dense<0.000000e+00> : vector<10x16xf32>
    %131 = tpu.matmul %3, %130, %cst_89 {dimension_numbers = #tpu.dot_dimension_numbers<[1], [0], [0], [1], [0, 0, 1, 1], [], []>} : vector<10x32xf32>, vector<32x16xf32>, vector<10x16xf32> -> vector<10x16xf32>
    %c4_90 = arith.constant 4 : index
    %c0_91 = arith.constant 0 : index
    %c0_92 = arith.constant 0 : index
    %132 = vector.load %arg10[%c4_90, %c0_91, %c0_92] : memref<6x1x16xf32, #tpu.memory_space<vmem>>, vector<1x1x16xf32>
    %133 = vector.shape_cast %132 : vector<1x1x16xf32> to vector<1x16xf32>
    %134 = vector.broadcast %133 : vector<1x16xf32> to vector<10x16xf32>
    %135 = arith.addf %131, %134 : vector<10x16xf32>
    %cst_93 = arith.constant dense<0.000000e+00> : vector<8x10xf32>
    %136 = tpu.matmul %121, %128, %cst_93 {dimension_numbers = #tpu.dot_dimension_numbers<[1], [1], [0], [0], [0, 0, 1, 0], [], []>} : vector<8x16xf32>, vector<10x16xf32>, vector<8x10xf32> -> vector<8x10xf32>
    %cst_94 = arith.constant 2.500000e-01 : f32
    %137 = vector.broadcast %cst_94 : f32 to vector<8x10xf32>
    %138 = arith.mulf %136, %137 : vector<8x10xf32>
    %cst_95 = arith.constant dense<0xFF800000> : vector<8xf32>
    %139 = vector.multi_reduction <maximumf>, %138, %cst_95 [1] : vector<8x10xf32> to vector<8xf32>
    %140 = vector.shape_cast %139 : vector<8xf32> to vector<8x1xf32>
    %141 = vector.broadcast %140 : vector<8x1xf32> to vector<8x10xf32>
    %142 = arith.subf %138, %141 : vector<8x10xf32>
    %143 = math.exp %142 : vector<8x10xf32>
    %cst_96 = arith.constant dense<0.000000e+00> : vector<8xf32>
    %144 = vector.multi_reduction <add>, %143, %cst_96 [1] : vector<8x10xf32> to vector<8xf32>
    %145 = vector.shape_cast %144 : vector<8xf32> to vector<8x1xf32>
    %146 = tpu.reciprocal %145 {approx = true} : vector<8x1xf32> -> vector<8x1xf32>
    %147 = vector.broadcast %146 : vector<8x1xf32> to vector<8x10xf32>
    %148 = arith.mulf %143, %147 : vector<8x10xf32>
    %cst_97 = arith.constant dense<0.000000e+00> : vector<8x16xf32>
    %149 = tpu.matmul %148, %135, %cst_97 {dimension_numbers = #tpu.dot_dimension_numbers<[1], [0], [0], [1], [0, 0, 1, 1], [], []>} : vector<8x10xf32>, vector<10x16xf32>, vector<8x16xf32> -> vector<8x16xf32>
    %c0_98 = arith.constant 0 : index
    %c0_99 = arith.constant 0 : index
    %c0_100 = arith.constant 0 : index
    %150 = vector.load %arg11[%c0_98, %c0_99, %c0_100] : memref<2x16x32xf32, #tpu.memory_space<vmem>>, vector<1x16x32xf32>
    %151 = vector.shape_cast %150 : vector<1x16x32xf32> to vector<16x32xf32>
    %cst_101 = arith.constant dense<0.000000e+00> : vector<8x32xf32>
    %152 = tpu.matmul %149, %151, %cst_101 {dimension_numbers = #tpu.dot_dimension_numbers<[1], [0], [0], [1], [0, 0, 1, 1], [], []>} : vector<8x16xf32>, vector<16x32xf32>, vector<8x32xf32> -> vector<8x32xf32>
    %c1_102 = arith.constant 1 : index
    %c0_103 = arith.constant 0 : index
    %c0_104 = arith.constant 0 : index
    %153 = vector.load %arg9[%c1_102, %c0_103, %c0_104] : memref<6x32x16xf32, #tpu.memory_space<vmem>>, vector<1x32x16xf32>
    %154 = vector.shape_cast %153 : vector<1x32x16xf32> to vector<32x16xf32>
    %cst_105 = arith.constant dense<0.000000e+00> : vector<8x16xf32>
    %155 = tpu.matmul %114, %154, %cst_105 {dimension_numbers = #tpu.dot_dimension_numbers<[1], [0], [0], [1], [0, 0, 1, 1], [], []>} : vector<8x32xf32>, vector<32x16xf32>, vector<8x16xf32> -> vector<8x16xf32>
    %c1_106 = arith.constant 1 : index
    %c0_107 = arith.constant 0 : index
    %c0_108 = arith.constant 0 : index
    %156 = vector.load %arg10[%c1_106, %c0_107, %c0_108] : memref<6x1x16xf32, #tpu.memory_space<vmem>>, vector<1x1x16xf32>
    %157 = vector.shape_cast %156 : vector<1x1x16xf32> to vector<1x16xf32>
    %158 = vector.broadcast %157 : vector<1x16xf32> to vector<8x16xf32>
    %159 = arith.addf %155, %158 : vector<8x16xf32>
    %c3_109 = arith.constant 3 : index
    %c0_110 = arith.constant 0 : index
    %c0_111 = arith.constant 0 : index
    %160 = vector.load %arg9[%c3_109, %c0_110, %c0_111] : memref<6x32x16xf32, #tpu.memory_space<vmem>>, vector<1x32x16xf32>
    %161 = vector.shape_cast %160 : vector<1x32x16xf32> to vector<32x16xf32>
    %cst_112 = arith.constant dense<0.000000e+00> : vector<10x16xf32>
    %162 = tpu.matmul %3, %161, %cst_112 {dimension_numbers = #tpu.dot_dimension_numbers<[1], [0], [0], [1], [0, 0, 1, 1], [], []>} : vector<10x32xf32>, vector<32x16xf32>, vector<10x16xf32> -> vector<10x16xf32>
    %c3_113 = arith.constant 3 : index
    %c0_114 = arith.constant 0 : index
    %c0_115 = arith.constant 0 : index
    %163 = vector.load %arg10[%c3_113, %c0_114, %c0_115] : memref<6x1x16xf32, #tpu.memory_space<vmem>>, vector<1x1x16xf32>
    %164 = vector.shape_cast %163 : vector<1x1x16xf32> to vector<1x16xf32>
    %165 = vector.broadcast %164 : vector<1x16xf32> to vector<10x16xf32>
    %166 = arith.addf %162, %165 : vector<10x16xf32>
    %c5_116 = arith.constant 5 : index
    %c0_117 = arith.constant 0 : index
    %c0_118 = arith.constant 0 : index
    %167 = vector.load %arg9[%c5_116, %c0_117, %c0_118] : memref<6x32x16xf32, #tpu.memory_space<vmem>>, vector<1x32x16xf32>
    %168 = vector.shape_cast %167 : vector<1x32x16xf32> to vector<32x16xf32>
    %cst_119 = arith.constant dense<0.000000e+00> : vector<10x16xf32>
    %169 = tpu.matmul %3, %168, %cst_119 {dimension_numbers = #tpu.dot_dimension_numbers<[1], [0], [0], [1], [0, 0, 1, 1], [], []>} : vector<10x32xf32>, vector<32x16xf32>, vector<10x16xf32> -> vector<10x16xf32>
    %c5_120 = arith.constant 5 : index
    %c0_121 = arith.constant 0 : index
    %c0_122 = arith.constant 0 : index
    %170 = vector.load %arg10[%c5_120, %c0_121, %c0_122] : memref<6x1x16xf32, #tpu.memory_space<vmem>>, vector<1x1x16xf32>
    %171 = vector.shape_cast %170 : vector<1x1x16xf32> to vector<1x16xf32>
    %172 = vector.broadcast %171 : vector<1x16xf32> to vector<10x16xf32>
    %173 = arith.addf %169, %172 : vector<10x16xf32>
    %cst_123 = arith.constant dense<0.000000e+00> : vector<8x10xf32>
    %174 = tpu.matmul %159, %166, %cst_123 {dimension_numbers = #tpu.dot_dimension_numbers<[1], [1], [0], [0], [0, 0, 1, 0], [], []>} : vector<8x16xf32>, vector<10x16xf32>, vector<8x10xf32> -> vector<8x10xf32>
    %cst_124 = arith.constant 2.500000e-01 : f32
    %175 = vector.broadcast %cst_124 : f32 to vector<8x10xf32>
    %176 = arith.mulf %174, %175 : vector<8x10xf32>
    %cst_125 = arith.constant dense<0xFF800000> : vector<8xf32>
    %177 = vector.multi_reduction <maximumf>, %176, %cst_125 [1] : vector<8x10xf32> to vector<8xf32>
    %178 = vector.shape_cast %177 : vector<8xf32> to vector<8x1xf32>
    %179 = vector.broadcast %178 : vector<8x1xf32> to vector<8x10xf32>
    %180 = arith.subf %176, %179 : vector<8x10xf32>
    %181 = math.exp %180 : vector<8x10xf32>
    %cst_126 = arith.constant dense<0.000000e+00> : vector<8xf32>
    %182 = vector.multi_reduction <add>, %181, %cst_126 [1] : vector<8x10xf32> to vector<8xf32>
    %183 = vector.shape_cast %182 : vector<8xf32> to vector<8x1xf32>
    %184 = tpu.reciprocal %183 {approx = true} : vector<8x1xf32> -> vector<8x1xf32>
    %185 = vector.broadcast %184 : vector<8x1xf32> to vector<8x10xf32>
    %186 = arith.mulf %181, %185 : vector<8x10xf32>
    %cst_127 = arith.constant dense<0.000000e+00> : vector<8x16xf32>
    %187 = tpu.matmul %186, %173, %cst_127 {dimension_numbers = #tpu.dot_dimension_numbers<[1], [0], [0], [1], [0, 0, 1, 1], [], []>} : vector<8x10xf32>, vector<10x16xf32>, vector<8x16xf32> -> vector<8x16xf32>
    %c1_128 = arith.constant 1 : index
    %c0_129 = arith.constant 0 : index
    %c0_130 = arith.constant 0 : index
    %188 = vector.load %arg11[%c1_128, %c0_129, %c0_130] : memref<2x16x32xf32, #tpu.memory_space<vmem>>, vector<1x16x32xf32>
    %189 = vector.shape_cast %188 : vector<1x16x32xf32> to vector<16x32xf32>
    %cst_131 = arith.constant dense<0.000000e+00> : vector<8x32xf32>
    %190 = tpu.matmul %187, %189, %cst_131 {dimension_numbers = #tpu.dot_dimension_numbers<[1], [0], [0], [1], [0, 0, 1, 1], [], []>} : vector<8x16xf32>, vector<16x32xf32>, vector<8x32xf32> -> vector<8x32xf32>
    %191 = arith.addf %152, %190 : vector<8x32xf32>
    %c0_132 = arith.constant 0 : index
    %c0_133 = arith.constant 0 : index
    %192 = vector.load %arg12[%c0_132, %c0_133] : memref<1x32xf32, #tpu.memory_space<vmem>>, vector<1x32xf32>
    %193 = vector.broadcast %192 : vector<1x32xf32> to vector<8x32xf32>
    %194 = arith.addf %191, %193 : vector<8x32xf32>
    %195 = arith.addf %194, %114 : vector<8x32xf32>
    %c0_134 = arith.constant 0 : index
    %c0_135 = arith.constant 0 : index
    %196 = vector.load %arg13[%c0_134, %c0_135] : memref<1x32xf32, #tpu.memory_space<vmem>>, vector<1x32xf32>
    %c0_136 = arith.constant 0 : index
    %c0_137 = arith.constant 0 : index
    %197 = vector.load %arg14[%c0_136, %c0_137] : memref<1x32xf32, #tpu.memory_space<vmem>>, vector<1x32xf32>
    %cst_138 = arith.constant dense<0.000000e+00> : vector<8xf32>
    %198 = vector.multi_reduction <add>, %195, %cst_138 [1] : vector<8x32xf32> to vector<8xf32>
    %199 = vector.shape_cast %198 : vector<8xf32> to vector<8x1xf32>
    %cst_139 = arith.constant 3.200000e+01 : f32
    %200 = vector.broadcast %cst_139 : f32 to vector<8x1xf32>
    %201 = arith.divf %199, %200 : vector<8x1xf32>
    %202 = vector.broadcast %201 : vector<8x1xf32> to vector<8x32xf32>
    %203 = arith.subf %195, %202 : vector<8x32xf32>
    %204 = arith.mulf %203, %203 : vector<8x32xf32>
    %cst_140 = arith.constant dense<0.000000e+00> : vector<8xf32>
    %205 = vector.multi_reduction <add>, %204, %cst_140 [1] : vector<8x32xf32> to vector<8xf32>
    %206 = vector.shape_cast %205 : vector<8xf32> to vector<8x1xf32>
    %cst_141 = arith.constant 3.200000e+01 : f32
    %207 = vector.broadcast %cst_141 : f32 to vector<8x1xf32>
    %208 = arith.divf %206, %207 : vector<8x1xf32>
    %cst_142 = arith.constant 9.99999974E-6 : f32
    %209 = vector.broadcast %cst_142 : f32 to vector<8x1xf32>
    %210 = arith.addf %208, %209 : vector<8x1xf32>
    %211 = math.rsqrt %210 : vector<8x1xf32>
    %212 = vector.broadcast %211 : vector<8x1xf32> to vector<8x32xf32>
    %213 = arith.mulf %203, %212 : vector<8x32xf32>
    %214 = vector.broadcast %196 : vector<1x32xf32> to vector<8x32xf32>
    %215 = arith.mulf %213, %214 : vector<8x32xf32>
    %216 = vector.broadcast %197 : vector<1x32xf32> to vector<8x32xf32>
    %217 = arith.addf %215, %216 : vector<8x32xf32>
    %c0_143 = arith.constant 0 : index
    %c0_144 = arith.constant 0 : index
    %218 = vector.load %arg15[%c0_143, %c0_144] : memref<32x128xf32, #tpu.memory_space<vmem>>, vector<32x128xf32>
    %cst_145 = arith.constant dense<0.000000e+00> : vector<8x128xf32>
    %219 = tpu.matmul %217, %218, %cst_145 {dimension_numbers = #tpu.dot_dimension_numbers<[1], [0], [0], [1], [0, 0, 1, 1], [], []>} : vector<8x32xf32>, vector<32x128xf32>, vector<8x128xf32> -> vector<8x128xf32>
    %c0_146 = arith.constant 0 : index
    %c0_147 = arith.constant 0 : index
    %220 = vector.load %arg16[%c0_146, %c0_147] : memref<1x128xf32, #tpu.memory_space<vmem>>, vector<1x128xf32>
    %221 = vector.broadcast %220 : vector<1x128xf32> to vector<8x128xf32>
    %222 = arith.addf %219, %221 : vector<8x128xf32>
    %cst_148 = arith.constant 0.000000e+00 : f32
    %223 = vector.broadcast %cst_148 : f32 to vector<8x128xf32>
    %224 = arith.maximumf %222, %223 : vector<8x128xf32>
    %c0_149 = arith.constant 0 : index
    %c0_150 = arith.constant 0 : index
    %225 = vector.load %arg17[%c0_149, %c0_150] : memref<128x32xf32, #tpu.memory_space<vmem>>, vector<128x32xf32>
    %cst_151 = arith.constant dense<0.000000e+00> : vector<8x32xf32>
    %226 = tpu.matmul %224, %225, %cst_151 {dimension_numbers = #tpu.dot_dimension_numbers<[1], [0], [0], [1], [0, 0, 1, 1], [], []>} : vector<8x128xf32>, vector<128x32xf32>, vector<8x32xf32> -> vector<8x32xf32>
    %c0_152 = arith.constant 0 : index
    %c0_153 = arith.constant 0 : index
    %227 = vector.load %arg18[%c0_152, %c0_153] : memref<1x32xf32, #tpu.memory_space<vmem>>, vector<1x32xf32>
    %228 = vector.broadcast %227 : vector<1x32xf32> to vector<8x32xf32>
    %229 = arith.addf %226, %228 : vector<8x32xf32>
    %230 = arith.addf %229, %217 : vector<8x32xf32>
    %c0_154 = arith.constant 0 : index
    %c0_155 = arith.constant 0 : index
    %231 = vector.load %arg19[%c0_154, %c0_155] : memref<1x32xf32, #tpu.memory_space<vmem>>, vector<1x32xf32>
    %c0_156 = arith.constant 0 : index
    %c0_157 = arith.constant 0 : index
    %232 = vector.load %arg20[%c0_156, %c0_157] : memref<1x32xf32, #tpu.memory_space<vmem>>, vector<1x32xf32>
    %cst_158 = arith.constant dense<0.000000e+00> : vector<8xf32>
    %233 = vector.multi_reduction <add>, %230, %cst_158 [1] : vector<8x32xf32> to vector<8xf32>
    %234 = vector.shape_cast %233 : vector<8xf32> to vector<8x1xf32>
    %cst_159 = arith.constant 3.200000e+01 : f32
    %235 = vector.broadcast %cst_159 : f32 to vector<8x1xf32>
    %236 = arith.divf %234, %235 : vector<8x1xf32>
    %237 = vector.broadcast %236 : vector<8x1xf32> to vector<8x32xf32>
    %238 = arith.subf %230, %237 : vector<8x32xf32>
    %239 = arith.mulf %238, %238 : vector<8x32xf32>
    %cst_160 = arith.constant dense<0.000000e+00> : vector<8xf32>
    %240 = vector.multi_reduction <add>, %239, %cst_160 [1] : vector<8x32xf32> to vector<8xf32>
    %241 = vector.shape_cast %240 : vector<8xf32> to vector<8x1xf32>
    %cst_161 = arith.constant 3.200000e+01 : f32
    %242 = vector.broadcast %cst_161 : f32 to vector<8x1xf32>
    %243 = arith.divf %241, %242 : vector<8x1xf32>
    %cst_162 = arith.constant 9.99999974E-6 : f32
    %244 = vector.broadcast %cst_162 : f32 to vector<8x1xf32>
    %245 = arith.addf %243, %244 : vector<8x1xf32>
    %246 = math.rsqrt %245 : vector<8x1xf32>
    %247 = vector.broadcast %246 : vector<8x1xf32> to vector<8x32xf32>
    %248 = arith.mulf %238, %247 : vector<8x32xf32>
    %249 = vector.broadcast %231 : vector<1x32xf32> to vector<8x32xf32>
    %250 = arith.mulf %248, %249 : vector<8x32xf32>
    %251 = vector.broadcast %232 : vector<1x32xf32> to vector<8x32xf32>
    %252 = arith.addf %250, %251 : vector<8x32xf32>
    %c0_163 = arith.constant 0 : index
    %c0_164 = arith.constant 0 : index
    %c0_165 = arith.constant 0 : index
    %253 = vector.load %arg21[%c0_163, %c0_164, %c0_165] : memref<1x8x32xf32, #tpu.memory_space<vmem>>, vector<1x8x32xf32>
    %254 = vector.shape_cast %253 : vector<1x8x32xf32> to vector<8x32xf32>
    %255 = vector.shape_cast %252 : vector<8x32xf32> to vector<1x8x32xf32>
    tpu.vector_store %arg21[%c0_163, %c0_164, %c0_165], %255 {strides = array<i32>} : memref<1x8x32xf32, #tpu.memory_space<vmem>>, vector<1x8x32xf32>,
    return
  }
  func.func @transform_0(%arg0: i32) -> (i32, i32, i32) {
    %c0_i32 = arith.constant 0 : i32
    %c0_i32_0 = arith.constant 0 : i32
    %c0_i32_1 = arith.constant 0 : i32
    return %arg0, %c0_i32, %c0_i32_0 : i32, i32, i32
  }
  func.func @transform_1(%arg0: i32) -> (i32, i32, i32) {
    %c0_i32 = arith.constant 0 : i32
    %c0_i32_0 = arith.constant 0 : i32
    %c0_i32_1 = arith.constant 0 : i32
    return %arg0, %c0_i32, %c0_i32_0 : i32, i32, i32
  }
  func.func @transform_2(%arg0: i32) -> (i32, i32, i32) {
    %c0_i32 = arith.constant 0 : i32
    %c0_i32_0 = arith.constant 0 : i32
    %c0_i32_1 = arith.constant 0 : i32
    %c0_i32_2 = arith.constant 0 : i32
    return %c0_i32, %c0_i32_0, %c0_i32_1 : i32, i32, i32
  }
  func.func @transform_3(%arg0: i32) -> (i32, i32, i32) {
    %c0_i32 = arith.constant 0 : i32
    %c0_i32_0 = arith.constant 0 : i32
    %c0_i32_1 = arith.constant 0 : i32
    %c0_i32_2 = arith.constant 0 : i32
    return %c0_i32, %c0_i32_0, %c0_i32_1 : i32, i32, i32
  }
  func.func @transform_4(%arg0: i32) -> (i32, i32, i32) {
    %c0_i32 = arith.constant 0 : i32
    %c0_i32_0 = arith.constant 0 : i32
    %c0_i32_1 = arith.constant 0 : i32
    %c0_i32_2 = arith.constant 0 : i32
    return %c0_i32, %c0_i32_0, %c0_i32_1 : i32, i32, i32
  }
  func.func @transform_5(%arg0: i32) -> (i32, i32) {
    %c0_i32 = arith.constant 0 : i32
    %c0_i32_0 = arith.constant 0 : i32
    %c0_i32_1 = arith.constant 0 : i32
    return %c0_i32, %c0_i32_0 : i32, i32
  }
  func.func @transform_6(%arg0: i32) -> (i32, i32) {
    %c0_i32 = arith.constant 0 : i32
    %c0_i32_0 = arith.constant 0 : i32
    %c0_i32_1 = arith.constant 0 : i32
    return %c0_i32, %c0_i32_0 : i32, i32
  }
  func.func @transform_7(%arg0: i32) -> (i32, i32) {
    %c0_i32 = arith.constant 0 : i32
    %c0_i32_0 = arith.constant 0 : i32
    %c0_i32_1 = arith.constant 0 : i32
    return %c0_i32, %c0_i32_0 : i32, i32
  }
  func.func @transform_8(%arg0: i32) -> (i32, i32, i32) {
    %c0_i32 = arith.constant 0 : i32
    %c0_i32_0 = arith.constant 0 : i32
    %c0_i32_1 = arith.constant 0 : i32
    %c0_i32_2 = arith.constant 0 : i32
    return %c0_i32, %c0_i32_0, %c0_i32_1 : i32, i32, i32
  }
  func.func @transform_9(%arg0: i32) -> (i32, i32, i32) {
    %c0_i32 = arith.constant 0 : i32
    %c0_i32_0 = arith.constant 0 : i32
    %c0_i32_1 = arith.constant 0 : i32
    %c0_i32_2 = arith.constant 0 : i32
    return %c0_i32, %c0_i32_0, %c0_i32_1 : i32, i32, i32
  }
  func.func @transform_10(%arg0: i32) -> (i32, i32, i32) {
    %c0_i32 = arith.constant 0 : i32
    %c0_i32_0 = arith.constant 0 : i32
    %c0_i32_1 = arith.constant 0 : i32
    %c0_i32_2 = arith.constant 0 : i32
    return %c0_i32, %c0_i32_0, %c0_i32_1 : i32, i32, i32
  }
  func.func @transform_11(%arg0: i32) -> (i32, i32) {
    %c0_i32 = arith.constant 0 : i32
    %c0_i32_0 = arith.constant 0 : i32
    %c0_i32_1 = arith.constant 0 : i32
    return %c0_i32, %c0_i32_0 : i32, i32
  }
  func.func @transform_12(%arg0: i32) -> (i32, i32) {
    %c0_i32 = arith.constant 0 : i32
    %c0_i32_0 = arith.constant 0 : i32
    %c0_i32_1 = arith.constant 0 : i32
    return %c0_i32, %c0_i32_0 : i32, i32
  }
  func.func @transform_13(%arg0: i32) -> (i32, i32) {
    %c0_i32 = arith.constant 0 : i32
    %c0_i32_0 = arith.constant 0 : i32
    %c0_i32_1 = arith.constant 0 : i32
    return %c0_i32, %c0_i32_0 : i32, i32
  }
  func.func @transform_14(%arg0: i32) -> (i32, i32) {
    %c0_i32 = arith.constant 0 : i32
    %c0_i32_0 = arith.constant 0 : i32
    %c0_i32_1 = arith.constant 0 : i32
    return %c0_i32, %c0_i32_0 : i32, i32
  }
  func.func @transform_15(%arg0: i32) -> (i32, i32) {
    %c0_i32 = arith.constant 0 : i32
    %c0_i32_0 = arith.constant 0 : i32
    %c0_i32_1 = arith.constant 0 : i32
    return %c0_i32, %c0_i32_0 : i32, i32
  }
  func.func @transform_16(%arg0: i32) -> (i32, i32) {
    %c0_i32 = arith.constant 0 : i32
    %c0_i32_0 = arith.constant 0 : i32
    %c0_i32_1 = arith.constant 0 : i32
    return %c0_i32, %c0_i32_0 : i32, i32
  }
  func.func @transform_17(%arg0: i32) -> (i32, i32) {
    %c0_i32 = arith.constant 0 : i32
    %c0_i32_0 = arith.constant 0 : i32
    %c0_i32_1 = arith.constant 0 : i32
    return %c0_i32, %c0_i32_0 : i32, i32
  }
  func.func @transform_18(%arg0: i32) -> (i32, i32) {
    %c0_i32 = arith.constant 0 : i32
    %c0_i32_0 = arith.constant 0 : i32
    %c0_i32_1 = arith.constant 0 : i32
    return %c0_i32, %c0_i32_0 : i32, i32
  }
  func.func @transform_19(%arg0: i32) -> (i32, i32) {
    %c0_i32 = arith.constant 0 : i32
    %c0_i32_0 = arith.constant 0 : i32
    %c0_i32_1 = arith.constant 0 : i32
    return %c0_i32, %c0_i32_0 : i32, i32
  }
  func.func @transform_20(%arg0: i32) -> (i32, i32, i32) {
    %c0_i32 = arith.constant 0 : i32
    %c0_i32_0 = arith.constant 0 : i32
    %c0_i32_1 = arith.constant 0 : i32
    return %arg0, %c0_i32, %c0_i32_0 : i32, i32, i32
  }
}

</mosaic_0001>

<bundles_post_ra>
// kernel: rswi_transformer_forward.5
= control target key start
LH: loop header
LB: loop body
LE: loop exit
PB: predicated region body
PF: predicated region fallthrough
CT: control target
= control target key end

     0   :  { %s354_s12 = smov 0   ;;  %s390_s0 = inlined_call_operand.vmem [shape: f32[2,10,32], index: 0, kind: input, shape index: {}]   ;;  %s391_s1 = inlined_call_operand.vmem [shape: f32[1,32], index: 1, kind: input, shape index: {}]   ;;  %s392_s2 = inlined_call_operand.vmem [shape: f32[1,32], index: 2, kind: input, shape index: {}]   ;;  %s393_s3 = inlined_call_operand.vmem [shape: f32[2,10,32], index: 3, kind: output, shape index: {}]  }
   0x1 LB: > { %s295_s13 = sadd.s32 4294967295, %s331_s12   ;;  %p299_p0 = scmp.ge.s32.totalorder %s331_s12, 1  ;;  %s331_s12 = sphi %s354_s12, %s13_s12  }
   0x2   : > { %p137_p1 = scmp.lt.s32.totalorder %s331_s12, 3 }
   0x4   : > { %p138_p2 = pnand %p299_p0, %p137_p1 }
   0x5   : > { %p161_p3 = scmp.lt.s32.totalorder (!%p138_p2), %s295_s13, 1 }
   0x6   : > { %141 = sbr.rel (%p138_p2) target bundleno = 292 (0x124), region = 32 }
   0xb   : > { %s395_s13 = smov (!%p161_p3, %s295_s13), 1  ;;  %vm175_vm0 = vcmask 261120   ;;  %vm179_vm1 = vcmask 254976   ;;  %v333_v4 = vmov 32.0   ;;  %v317_v35 = vld [vmem:[%s391_s1] ss:$0 sm:$0xff] }
   0xc   : > { %s306_s14 = sshll.u32 %s395_s13, 4  ;;  %319 = vrcp.f32 %v333_v4  ;;  %v318_v38 = vld [vmem:[%s392_s2] ss:$0 sm:$0xff] }
   0xd   : > { %s165_s17 = scalar_lea.vmem %s390_s0, %s306_s14  ;;  %s170_s24 = scalar_lea.vmem %s393_s3, %s306_s14 }
   0xe   : > { %v171_v0 = vld [vmem:[%s165_s17] sm:$0xff]  ;;  %v172_v2 = vld [vmem:[%s165_s17 + $0x8] sm:$0x3] }
   0xf   : > { %v176_v1 = vsel %vm175_vm0, %v171_v0, 0.0  ;;  %v180_v3 = vsel %vm179_vm1, %v172_v2, 0.0 }
  0x10   : > { %177 = vadd.xlane.f32.xlu0 %v176_v1 }
  0x12   : > { %v320_v5 = vpop.eup %319 }
  0x13   : > { %v184_v6 = vmul.f32 32.0, %v320_v5  ;;  %vm188_vm2 = vweird.f32 %v320_v5 }
  0x15   : > { %v185_v7 = vsub.f32 1.0, %v184_v6 }
  0x17   : > { %v186_v8 = vmul.f32 %v320_v5, %v185_v7 }
  0x18   : > { %181 = vadd.xlane.f32.xlu0 %v180_v3 }
  0x19   : > { %v187_v9 = vadd.f32 %v320_v5, %v186_v8 }
  0x1b   : > { %v189_v10 = vsel %vm188_vm2, %v320_v5, %v187_v9 }
  0x83   : > { %v178_v11 = vpop.xlane.xlu0 %177 }
  0x84   : > { %v190_v12 = vmul.f32 %v189_v10, %v178_v11 }
  0x86   : > { %v192_v13 = vsub.f32 %v171_v0, %v190_v12 }
  0x88   : > { %v194_v14 = vmul.f32 %v192_v13, %v192_v13 }
  0x8a   : > { %v196_v15 = vsel %vm175_vm0, %v194_v14, 0.0 }
  0x8b   : > { %197 = vadd.xlane.f32.xlu1 %v196_v15  ;;  %v182_v16 = vpop.xlane.xlu0 %181 }
  0x8c   : > { %v191_v17 = vmul.f32 %v189_v10, %v182_v16 }
  0x8e   : > { %v193_v18 = vsub.f32 %v172_v2, %v191_v17 }
  0x90   : > { %v195_v19 = vmul.f32 %v193_v18, %v193_v18 }
  0x92   : > { %v199_v20 = vsel %vm179_vm1, %v195_v19, 0.0 }
  0x93   : > { %200 = vadd.xlane.f32.xlu1 %v199_v20 }
  0xfe   : > { %v198_v21 = vpop.xlane.xlu1 %197 }
  0xff   : > { %v202_v22 = vmul.f32 %v198_v21, %v189_v10 }
 0x101   : > { %v204_v23 = vadd.f32 1e-05, %v202_v22 }
 0x103   : > { %321 = vrsqrt.f32 %v204_v23  ;;  %vm212_vm4 = vweird.f32 %v204_v23 }
 0x106   : > { %v201_v24 = vpop.xlane.xlu1 %200 }
 0x107   : > { %v203_v25 = vmul.f32 %v201_v24, %v189_v10 }
 0x109   : > { %v322_v26 = vpop.eup %321  ;;  %v205_v27 = vadd.f32 1e-05, %v203_v25 }
 0x10a   : > { %v207_v28 = vmul.f32 %v322_v26, %v204_v23  ;;  %vm213_vm3 = vweird.f32 %v322_v26 }
 0x10b   : > { %323 = vrsqrt.f32 %v205_v27  ;;  %vm214_vm5 = vmor %vm212_vm4, %vm213_vm3  ;;  %vm222_vm7 = vweird.f32 %v205_v27 }
 0x10c   : > { %v208_v29 = vmul.f32 %v322_v26, %v207_v28 }
 0x10e   : > { %v209_v30 = vmul.f32 0.5, %v208_v29 }
 0x110   : > { %v210_v31 = vsub.f32 1.5, %v209_v30 }
 0x111   : > { %v324_v32 = vpop.eup %323 }
 0x112   : > { %v211_v33 = vmul.f32 %v322_v26, %v210_v31  ;;  %v217_v34 = vmul.f32 %v324_v32, %v205_v27  ;;  %vm223_vm6 = vweird.f32 %v324_v32 }
 0x113   : > { %vm224_vm8 = vmor %vm222_vm7, %vm223_vm6 }
 0x114   : > { %v215_v36 = vsel %vm214_vm5, %v322_v26, %v211_v33  ;;  %v218_v37 = vmul.f32 %v324_v32, %v217_v34 }
 0x115   : > { %v226_v39 = vmul.f32 %v215_v36, %v192_v13 }
 0x116   : > { %v219_v40 = vmul.f32 0.5, %v218_v37 }
 0x117   : > { %v231_v41 = vmul.f32 %v317_v35, %v226_v39 }
 0x118   : > { %v220_v42 = vsub.f32 1.5, %v219_v40 }
 0x119   : > { %v236_v43 = vadd.f32 %v318_v38, %v231_v41 }
 0x11a   : > { %v221_v44 = vmul.f32 %v324_v32, %v220_v42 }
 0x11b   : > { %238 = vst.msk [vmem:[%s170_s24] sm:$0xff] %vm175_vm0, %v236_v43 }
 0x11c   : > { %v225_v45 = vsel %vm224_vm8, %v324_v32, %v221_v44 }
 0x11d   : > { %v227_v46 = vmul.f32 %v225_v45, %v193_v18 }
 0x11f   : > { %v232_v47 = vmul.f32 %v317_v35, %v227_v46 }
 0x121   : > { %v237_v48 = vadd.f32 %v318_v38, %v232_v47 }
 0x123   : > { %239 = vst.msk [vmem:[%s170_s24 + $0x8] sm:$0x3] %vm179_vm1, %v237_v48 }
 0x124 PF: > { %s13_s12 = sadd.s32 1, %s331_s12  }
 0x125   : > { %p10_p4 = scmp.ge.s32.totalorder %s13_s12, 4  }
 0x127   :  { %12 = sbr.rel (!%p10_p4) target bundleno = 1 (0x1), region = 62 }

// kernel: rswi_transformer_forward.7
= control target key start
LH: loop header
LB: loop body
LE: loop exit
PB: predicated region body
PF: predicated region fallthrough
CT: control target
= control target key end

     0   :  { %s412_s18 = smov 0   ;;  %s460_s0 = inlined_call_operand.vmem [shape: f32[2,8,32], index: 0, kind: input, shape index: {}]   ;;  %s461_s1 = inlined_call_operand.vmem [shape: f32[1,32], index: 1, kind: input, shape index: {}]   ;;  %s462_s2 = inlined_call_operand.vmem [shape: f32[1,32], index: 2, kind: input, shape index: {}]   ;;  %s463_s3 = inlined_call_operand.vmem [shape: f32[32,48], index: 3, kind: input, shape index: {}]   ;;  %s464_s4 = inlined_call_operand.vmem [shape: f32[1,48], index: 4, kind: input, shape index: {}]   ;;  %s465_s5 = inlined_call_operand.vmem [shape: f32[2,8,48], index: 5, kind: output, shape index: {}]  }
   0x1 LB: > { %s347_s19 = sadd.s32 4294967295, %s379_s18   ;;  %p351_p0 = scmp.ge.s32.totalorder %s379_s18, 1  ;;  %s379_s18 = sphi %s412_s18, %s15_s18  }
   0x2   : > { %p186_p1 = scmp.lt.s32.totalorder %s379_s18, 3 }
   0x4   : > { %p187_p2 = pnand %p351_p0, %p186_p1 }
   0x5   : > { %p212_p3 = scmp.lt.s32.totalorder (!%p187_p2), %s347_s19, 1 }
   0x6   : > { %190 = sbr.rel (%p187_p2) target bundleno = 412 (0x19c), region = 40 }
   0xb   : > { %s467_s19 = smov (!%p212_p3, %s347_s19), 1  ;;  %vm223_vm0 = vcmask 261120   ;;  %v381_v2 = vmov 32.0   ;;  %v264_v14 = vld [vmem:[%s463_s3 + $0x18] sm:$0xff]  ;;  %v263_v15 = vld [vmem:[%s463_s3 + $0x10] sm:$0xff]  ;;  %v262_v16 = vld [vmem:[%s463_s3 + $0x8] sm:$0xff] }
   0xc   : > { %s352_s20 = sshll.u32 %s467_s19, 3  ;;  %369 = vrcp.f32 %v381_v2  ;;  %284 = vmatpush.msra.mxu0 %v264_v14  ;;  %v261_v17 = vld [vmem:[%s463_s3] sm:$0xff]  ;;  %vm292_vm5 = vcmask 392192  }
   0xd   : > { %s215_s23 = scalar_lea.vmem %s460_s0, %s352_s20  ;;  %v366_v27 = vld [vmem:[%s461_s1] ss:$0 sm:$0xff]  ;;  %s219_s15 = scalar_lea.vmem %s465_s5, %s352_s20 }
   0xe   : > { %v220_v0 = vld [vmem:[%s215_s23] sm:$0xff]  ;;  %285 = vmatpush.msra.mxu0 %v263_v15 }
   0xf   : > { %v224_v1 = vsel %vm223_vm0, %v220_v0, 0.0  ;;  %v367_v30 = vld [vmem:[%s462_s2] ss:$0 sm:$0xff] }
  0x10   : > { %225 = vadd.xlane.f32.xlu0 %v224_v1  ;;  %286 = vmatpush.msra.mxu0 %v262_v16  ;;  %v368_v33 = vld [vmem:[%s464_s4] ss:$0 sm:$0xff] }
  0x12   : > { %v370_v3 = vpop.eup %369  ;;  %287 = vmatpush.msra.mxu0 %v261_v17 }
  0x13   : > { %v228_v4 = vmul.f32 32.0, %v370_v3  ;;  %vm232_vm1 = vweird.f32 %v370_v3 }
  0x15   : > { %v229_v5 = vsub.f32 1.0, %v228_v4 }
  0x17   : > { %v230_v6 = vmul.f32 %v370_v3, %v229_v5 }
  0x19   : > { %v231_v7 = vadd.f32 %v370_v3, %v230_v6 }
  0x1b   : > { %v233_v8 = vsel %vm232_vm1, %v370_v3, %v231_v7 }
  0x83   : > { %v226_v9 = vpop.xlane.xlu0 %225 }
  0x84   : > { %v234_v10 = vmul.f32 %v233_v8, %v226_v9 }
  0x86   : > { %v235_v11 = vsub.f32 %v220_v0, %v234_v10 }
  0x88   : > { %v236_v12 = vmul.f32 %v235_v11, %v235_v11 }
  0x8a   : > { %v237_v13 = vsel %vm223_vm0, %v236_v12, 0.0 }
  0x8b   : > { %238 = vadd.xlane.f32.xlu0 %v237_v13 }
  0xfe   : > { %v239_v18 = vpop.xlane.xlu0 %238 }
  0xff   : > { %v240_v19 = vmul.f32 %v239_v18, %v233_v8 }
 0x101   : > { %v241_v20 = vadd.f32 1e-05, %v240_v19 }
 0x103   : > { %371 = vrsqrt.f32 %v241_v20  ;;  %vm248_vm3 = vweird.f32 %v241_v20 }
 0x109   : > { %v372_v21 = vpop.eup %371 }
 0x10a   : > { %v243_v22 = vmul.f32 %v372_v21, %v241_v20  ;;  %vm249_vm2 = vweird.f32 %v372_v21 }
 0x10b   : > { %vm250_vm4 = vmor %vm248_vm3, %vm249_vm2 }
 0x10c   : > { %v244_v23 = vmul.f32 %v372_v21, %v243_v22 }
 0x10e   : > { %v245_v24 = vmul.f32 0.5, %v244_v23 }
 0x110   : > { %v246_v25 = vsub.f32 1.5, %v245_v24 }
 0x112   : > { %v247_v26 = vmul.f32 %v372_v21, %v246_v25 }
 0x114   : > { %v251_v28 = vsel %vm250_vm4, %v372_v21, %v247_v26 }
 0x115   : > { %v252_v29 = vmul.f32 %v251_v28, %v235_v11 }
 0x117   : > { %v256_v31 = vmul.f32 %v366_v27, %v252_v29 }
 0x119   : > { %v260_v32 = vadd.f32 %v367_v30, %v256_v31 }
 0x11b   : > { %354 = vmatmul.msk.f32.vlgmr.msra.gmra.mxu0 %vm223_vm0, %v260_v32 }
 0x198   : > { %v289_v34 = vpop.f32.mrf.mxu0 }
 0x199   : > { %v290_v35 = vadd.f32 %v368_v33, %v289_v34 }
 0x19b   : > { %293 = vst.msk [vmem:[%s219_s15] sm:$0xff] %vm292_vm5, %v290_v35 }
 0x19c PF: > { %s15_s18 = sadd.s32 1, %s379_s18  }
 0x19d   : > { %p12_p4 = scmp.ge.s32.totalorder %s15_s18, 4  }
 0x19f   :  { %14 = sbr.rel (!%p12_p4) target bundleno = 1 (0x1), region = 70 }

// kernel: rswi_transformer_forward.4
= control target key start
LH: loop header
LB: loop body
LE: loop exit
PB: predicated region body
PF: predicated region fallthrough
CT: control target
= control target key end

     0   :  { %s1431_s29 = smov 0   ;;  %s1731_s0 = inlined_call_operand.vmem [shape: f32[2,10,32], index: 0, kind: input, shape index: {}]   ;;  %s1732_s1 = inlined_call_operand.vmem [shape: f32[2,1,10], index: 1, kind: input, shape index: {}]   ;;  %s1733_s2 = inlined_call_operand.vmem [shape: f32[6,32,16], index: 2, kind: input, shape index: {}]   ;;  %s1734_s3 = inlined_call_operand.vmem [shape: f32[6,1,16], index: 3, kind: input, shape index: {}]   ;;  %s1735_s4 = inlined_call_operand.vmem [shape: f32[2,16,32], index: 4, kind: input, shape index: {}]   ;;  %s1736_s5 = inlined_call_operand.vmem [shape: f32[1,32], index: 5, kind: input, shape index: {}]   ;;  %s1737_s6 = inlined_call_operand.vmem [shape: f32[1,32], index: 6, kind: input, shape index: {}]   ;;  %s1738_s7 = inlined_call_operand.vmem [shape: f32[1,32], index: 7, kind: input, shape index: {}]   ;;  %s1739_s8 = inlined_call_operand.vmem [shape: f32[32,128], index: 8, kind: input, shape index: {}]   ;;  %s1740_s9 = inlined_call_operand.vmem [shape: f32[1,128], index: 9, kind: input, shape index: {}]   ;;  %s1741_s10 = inlined_call_operand.vmem [shape: f32[128,32], index: 10, kind: input, shape index: {}]   ;;  %s1742_s11 = inlined_call_operand.vmem [shape: f32[1,32], index: 11, kind: input, shape index: {}]   ;;  %s1743_s12 = inlined_call_operand.vmem [shape: f32[1,32], index: 12, kind: input, shape index: {}]   ;;  %s1744_s13 = inlined_call_operand.vmem [shape: f32[1,32], index: 13, kind: input, shape index: {}]   ;;  %s1745_s14 = inlined_call_operand.vmem [shape: f32[2,10,32], index: 14, kind: output, shape index: {}]  }
   0x1 LB: > { %s1222_s30 = sadd.s32 4294967295, %s1353_s29   ;;  %p1226_p0 = scmp.ge.s32.totalorder %s1353_s29, 1  ;;  %s1353_s29 = sphi %s1431_s29, %s24_s29  }
   0x2   : > { %p420_p1 = scmp.lt.s32.totalorder %s1353_s29, 3 }
   0x4   : > { %p421_p2 = pnand %p1226_p0, %p420_p1 }
   0x5   : > { %p469_p3 = scmp.lt.s32.totalorder (!%p421_p2), %s1222_s30, 1 }
   0x6   : > { %424 = sbr.rel (%p421_p2) target bundleno = 2027 (0x7eb), region = 76 }
   0xb   : > { %v1236_v0 = vld [vmem:[%s1733_s2 + $0x58] sm:$0xff]  ;;  %v1235_v1 = vld [vmem:[%s1733_s2 + $0x50] sm:$0xff]  ;;  %v1234_v4 = vld [vmem:[%s1733_s2 + $0x48] sm:$0xff]  ;;  %s1747_s30 = smov (!%p469_p3, %s1222_s30), 1  ;;  %vm493_vm0 = vcmask 261120   ;;  %vm589_vm1 = vcmask 130048  }
   0xc   : > { %545 = vmatpush.msra.mxu2 %v1236_v0  ;;  %v488_v2 = vld [vmem:[%s1733_s2 + $0x18] sm:$0xff]  ;;  %v487_v3 = vld [vmem:[%s1733_s2 + $0x10] sm:$0xff]  ;;  %v1233_v5 = vld [vmem:[%s1733_s2 + $0x40] sm:$0xff]  ;;  %s1292_s15 = sshll.u32 %s1747_s30, 4  ;;  %s476_s27 = scalar_lea.vmem %s1732_s1, %s1747_s30  ;;  %vm632_vm2 = vcmask 80896   ;;  %vm636_vm3 = vcmask 74752  }
   0xd   : > { %512 = vmatpush.msra.mxu0 %v488_v2  ;;  %1294 = vmatpush.msra.mxu3 %v488_v2  ;;  %v486_v6 = vld [vmem:[%s1733_s2 + $0x8] sm:$0xff]  ;;  %v485_v7 = vld [vmem:[%s1733_s2] sm:$0xff]  ;;  %s473_s20 = scalar_lea.vmem %s1731_s0, %s1292_s15  ;;  %v1243_v20 = vld [vmem:[%s1733_s2 + $0x98] sm:$0xff]  ;;  %vm662_vm4 = vcmask 1041408   ;;  %vm957_vm5 = vcmask 254976   ;;  %s481_s16 = scalar_lea.vmem %s1745_s14, %s1292_s15 }
   0xe   : > { %546 = vmatpush.msra.mxu2 %v1235_v1  ;;  %v1471_v8 = vld [vmem:[%s473_s20] sm:$0xff]  ;;  %v1475_v9 = vld [vmem:[%s473_s20 + $0x8] sm:$0x3]  ;;  %v1242_v21 = vld [vmem:[%s1733_s2 + $0x90] sm:$0xff] }
   0xf   : > { %513 = vmatpush.msra.mxu0 %v487_v3  ;;  %1295 = vmatpush.msra.mxu3 %v487_v3  ;;  %v1307_v11 = vld [vmem:[%s1734_s3 + $0x2] ss:$0 sm:$0xff]  ;;  %v1308_v14 = vld [vmem:[%s1734_s3] ss:$0 sm:$0xff]  ;;  %v1241_v22 = vld [vmem:[%s1733_s2 + $0x88] sm:$0xff] }
  0x10   : > { %547 = vmatpush.msra.mxu2 %v1234_v4  ;;  %v1240_v23 = vld [vmem:[%s1733_s2 + $0x80] sm:$0xff]  ;;  %v1264_v24 = vld [vmem:[%s1733_s2 + $0x78] sm:$0xff]  ;;  %v1263_v25 = vld [vmem:[%s1733_s2 + $0x70] sm:$0xff] }
  0x11   : > { %514 = vmatpush.msra.mxu0 %v486_v6  ;;  %1296 = vmatpush.msra.mxu3 %v486_v6  ;;  %v1262_v26 = vld [vmem:[%s1733_s2 + $0x68] sm:$0xff]  ;;  %v1261_v27 = vld [vmem:[%s1733_s2 + $0x60] sm:$0xff]  ;;  %v1257_v37 = vld [vmem:[%s1733_s2 + $0x38] sm:$0xff] }
  0x12   : > { %548 = vmatpush.msra.mxu2 %v1233_v5  ;;  %v1525_v28 = vld [vmem:[%s476_s27] ss:$0 sm:$0xff]  ;;  %v1256_v38 = vld [vmem:[%s1733_s2 + $0x30] sm:$0xff]  ;;  %713 = vmatpush.msra.mxu1 %v1257_v37  ;;  %v1255_v39 = vld [vmem:[%s1733_s2 + $0x28] sm:$0xff] }
  0x13   : > { %1238 = vmatmul.msk.f32.vlgmr.msra.gmra.mxu2 %vm493_vm0, %v1471_v8  ;;  %515 = vmatpush.msra.mxu0 %v485_v7  ;;  %v1254_v40 = vld [vmem:[%s1733_s2 + $0x20] sm:$0xff]  ;;  %v1271_v62 = vld [vmem:[%s1733_s2 + $0xb8] sm:$0xff]  ;;  %v1270_v63 = vld [vmem:[%s1733_s2 + $0xb0] sm:$0xff] }
  0x14   : > { %1231 = vmatmul.msk.f32.vlgmr.msra.gmra.mxu0 %vm493_vm0, %v1471_v8  ;;  %1297 = vmatpush.msra.mxu3 %v485_v7  ;;  %v1310_v45 = vld [vmem:[%s1734_s3 + $0x4] ss:$0 sm:$0xff]  ;;  %v1311_v57 = vld [vmem:[%s1734_s3 + $0x3] ss:$0 sm:$0xff]  ;;  %v1269_v0 = vld [vmem:[%s1733_s2 + $0xa8] sm:$0xff] }
  0x15   : > { %1232 = vmatmul.msk.f32.vlgmr.msra.gmra.mxu3 %vm493_vm0, %v1475_v9  ;;  %578 = vmatpush.msrb.mxu2 %v1243_v20  ;;  %v1268_v1 = vld [vmem:[%s1733_s2 + $0xa0] sm:$0xff]  ;;  %v690_v5 = vld [vmem:[%s1735_s4 + $0x8] sm:$0xff] }
  0x16   : > { %714 = vmatpush.msra.mxu1 %v1256_v38 }
  0x17   : > { %579 = vmatpush.msrb.mxu2 %v1242_v21 }
  0x18   : > { %715 = vmatpush.msra.mxu1 %v1255_v39 }
  0x19   : > { %580 = vmatpush.msrb.mxu2 %v1241_v22 }
  0x1a   : > { %716 = vmatpush.msra.mxu1 %v1254_v40 }
  0x1b   : > { %1239 = vmatmul.msk.f32.gmra.mxu2 %vm493_vm0, %v1475_v9  ;;  %1259 = vmatmul.msk.f32.vlgmr.msra.gmra.mxu1 %vm493_vm0, %v1471_v8 }
  0x1c   : > { %581 = vmatpush.msrb.mxu2 %v1240_v23 }
  0x1e   : > { %746 = vmatpush.msra.mxu2 %v1264_v24 }
  0x20   : > { %747 = vmatpush.msra.mxu2 %v1263_v25 }
  0x22   : > { %748 = vmatpush.msra.mxu2 %v1262_v26 }
  0x23   : > { %1245 = vmatmul.msk.f32.vlgmr.msrb.gmra.mxu2 %vm493_vm0, %v1471_v8  ;;  %1260 = vmatmul.msk.f32.gmra.mxu1 %vm493_vm0, %v1475_v9 }
  0x24   : > { %749 = vmatpush.msra.mxu2 %v1261_v27 }
  0x2b   : > { %1246 = vmatmul.msk.f32.gmra.mxu2 %vm493_vm0, %v1475_v9 }
  0x33   : > { %1266 = vmatmul.msk.f32.vlgmr.msra.gmra.mxu2 %vm493_vm0, %v1471_v8 }
  0x3b   : > { %1267 = vmatmul.msk.f32.gmra.mxu2 %vm493_vm0, %v1475_v9 }
  0x91   : > { %v517_v15 = vpop.f32.mrf.mxu0 }
  0x92   : > { %v518_v17 = vadd.f32 %v1308_v14, %v517_v15  ;;  %v689_v15 = vld [vmem:[%s1735_s4] sm:$0xff] }
  0x96   : > { %v550_v10 = vpop.f32.mrf.mxu2 }
  0x97   : > { %v551_v16 = vadd.f32 %v1307_v11, %v550_v10 }
  0x98   : > { %v520_v18 = vpop.f32.mrf.mxu3  ;;  %v718_v10 = vpop.f32.mrf.mxu1 }
  0x99   : > { %v521_v19 = vadd.f32 %v1308_v14, %v520_v18 }
  0x9e   : > { %v553_v12 = vpop.f32.mrf.mxu2 }
  0x9f   : > { %v554_v13 = vadd.f32 %v1307_v11, %v553_v12  ;;  %v1312_v11 = vld [vmem:[%s1734_s3 + $0x1] ss:$0 sm:$0xff] }
  0xa0   : > { %v719_v12 = vadd.f32 %v1312_v11, %v718_v10 }
  0xa1   : > { %1247 = vmatpush.xpose.msk.msrb.mxu3 %vm589_vm1, %v554_v13  ;;  %v721_v13 = vpop.f32.mrf.mxu1 }
  0xa2   : > { %v722_v14 = vadd.f32 %v1312_v11, %v721_v13 }
  0xa5   : > { %1248 = vmatpush.xpose.msk.msrb.mxu3 %vm589_vm1, %v551_v16 }
  0xa6   : > { %v583_v42 = vpop.f32.mrf.mxu2 }
  0xa7   : > { %v584_v49 = vadd.f32 %v1310_v45, %v583_v42  ;;  %v1282_v42 = vld [vmem:[%s1735_s4 + $0x10] sm:$0xff] }
  0xa8   : > { %1249 = vmatmul.msk.f32.vlgmr.msrb.gmra.mxu3 %vm589_vm1, %v518_v17 }
  0xa9   : > { %779 = vmatpush.msra.mxu3 %v1271_v62 }
  0xab   : > { %780 = vmatpush.msra.mxu3 %v1270_v63 }
  0xad   : > { %781 = vmatpush.msra.mxu3 %v1269_v0  ;;  %v1355_v0 = vmov 32.0  }
  0xae   : > { %v586_v47 = vpop.f32.mrf.mxu2 }
  0xaf   : > { %v587_v50 = vadd.f32 %v1310_v45, %v586_v47  ;;  %782 = vmatpush.msra.mxu3 %v1268_v1 }
  0xb0   : > { %1250 = vmatmul.msk.f32.gmra.mxu3 %vm589_vm1, %v521_v19  ;;  %v1313_v19 = vld [vmem:[%s1734_s3 + $0x5] ss:$0 sm:$0xff] }
  0xb1   : > { %1251 = vmatpush.msk.msrb.mxu0 %vm662_vm4, %v587_v50  ;;  %935 = vmatpush.msrb.mxu3 %v690_v5 }
  0xb3   : > { %681 = vmatpush.msrb.mxu0 %v584_v49  ;;  %936 = vmatpush.msrb.mxu3 %v689_v15 }
  0xb6   : > { %v751_v54 = vpop.f32.mrf.mxu2 }
  0xb7   : > { %v752_v60 = vadd.f32 %v1311_v57, %v751_v54 }
  0xb8   : > { %1273 = vmatmul.msk.f32.vlgmr.msra.gmra.mxu3 %vm493_vm0, %v1471_v8 }
  0xbe   : > { %v754_v58 = vpop.f32.mrf.mxu2 }
  0xbf   : > { %v755_v59 = vadd.f32 %v1311_v57, %v754_v58 }
  0xc0   : > { %1274 = vmatmul.msk.f32.gmra.mxu3 %vm493_vm0, %v1475_v9 }
  0xc1   : > { %1275 = vmatpush.xpose.msk.msra.mxu0 %vm589_vm1, %v755_v59 }
  0xc5   : > { %1276 = vmatpush.xpose.msk.msra.mxu0 %vm589_vm1, %v752_v60 }
 0x12b   : > { %v619_v29 = vpop.f32.mrf.mxu3 }
 0x12c   : > { %v625_v30 = vmul.f32 0.25, %v619_v29 }
 0x12e   : > { %v630_v31 = vadd.f32 %v1525_v28, %v625_v30 }
 0x130   : > { %v633_v32 = vsel %vm632_vm2, %v630_v31, -inf }
 0x131   : > { %634 = vmax.xlane.f32.xlu0 %v633_v32 }
 0x133   : > { %v622_v33 = vpop.f32.mrf.mxu3 }
 0x134   : > { %v626_v34 = vmul.f32 0.25, %v622_v33 }
 0x136   : > { %v631_v35 = vadd.f32 %v1525_v28, %v626_v34 }
 0x138   : > { %v637_v36 = vsel %vm636_vm3, %v631_v35, -inf }
 0x139   : > { %638 = vmax.xlane.f32.xlu0 %v637_v36 }
 0x13b   : > { %v784_v17 = vpop.f32.mrf.mxu3 }
 0x13c   : > { %v785_v21 = vadd.f32 %v1313_v19, %v784_v17  ;;  %v1019_v17 = vld [vmem:[%s1739_s8 + $0x18] sm:$0xff] }
 0x143   : > { %v787_v20 = vpop.f32.mrf.mxu3 }
 0x144   : > { %v788_v22 = vadd.f32 %v1313_v19, %v787_v20  ;;  %v1017_v19 = vld [vmem:[%s1739_s8 + $0x8] sm:$0xff]  ;;  %v1016_v20 = vld [vmem:[%s1739_s8] sm:$0xff] }
 0x146   : > { %1279 = vmatpush.msk.msrb.mxu1 %vm662_vm4, %v788_v22 }
 0x148   : > { %875 = vmatpush.msrb.mxu1 %v785_v21 }
 0x1a4   : > { %v635_v41 = vpop.xlane.xlu0 %634 }
 0x1a5   : > { %v640_v43 = vsub.f32 %v630_v31, %v635_v41 }
 0x1a7   : > { %v642_v44 = vmul.f32 1.442695, %v640_v43 }
 0x1a9   : > { %1321 = vpow2.f32 %v642_v44 }
 0x1ac   : > { %v639_v46 = vpop.xlane.xlu0 %638 }
 0x1ad   : > { %v641_v48 = vsub.f32 %v631_v35, %v639_v46 }
 0x1af   : > { %v1322_v51 = vpop.eup %1321  ;;  %v644_v52 = vmul.f32 1.442695, %v641_v48 }
 0x1b0   : > { %v646_v53 = vsel %vm632_vm2, %v1322_v51, 0.0 }
 0x1b1   : > { %1323 = vpow2.f32 %v644_v52  ;;  %647 = vadd.xlane.f32.xlu1 %v646_v53  ;;  %v1314_v52 = vld [vmem:[%s1736_s5] ss:$0 sm:$0xff] }
 0x1b7   : > { %v1324_v55 = vpop.eup %1323 }
 0x1b8   : > { %v649_v56 = vsel %vm636_vm3, %v1324_v55, 0.0 }
 0x1b9   : > { %650 = vadd.xlane.f32.xlu1 %v649_v56 }
 0x224   : > { %v648_v61 = vpop.xlane.xlu1 %647 }
 0x225   : > { %1325 = vrcp.f32 %v648_v61 }
 0x22b   : > { %v1326_v2 = vpop.eup %1325 }
 0x22c   : > { %v651_v3 = vpop.xlane.xlu1 %650  ;;  %v654_v4 = vmul.f32 %v1326_v2, %v1322_v51 }
 0x22d   : > { %1327 = vrcp.f32 %v651_v3 }
 0x22e   : > { %1252 = vmatmul.msk.f32.vlgmr.msrb.gmra.mxu0 %vm632_vm2, %v654_v4 }
 0x22f   : > { %1042 = vmatpush.msrb.mxu0 %v1019_v17 }
 0x233   : > { %v1328_v6 = vpop.eup %1327 }
 0x234   : > { %v655_v7 = vmul.f32 %v1328_v6, %v1324_v55 }
 0x236   : > { %1253 = vmatmul.msk.f32.gmra.mxu0 %vm632_vm2, %v655_v7 }
 0x23e   : > { %1277 = vmatmul.msk.f32.vlgmr.msra.gmra.mxu0 %vm589_vm1, %v719_v12 }
 0x246   : > { %1278 = vmatmul.msk.f32.gmra.mxu0 %vm589_vm1, %v722_v14 }
 0x2ab   : > { %v683_v16 = vpop.f32.mrf.mxu0 }
 0x2ac   : > { %1286 = vmatmul.msk.f32.vlgmr.msrb.gmra.mxu3 %vm589_vm1, %v683_v16 }
 0x2b3   : > { %v686_v18 = vpop.f32.mrf.mxu0 }
 0x2b4   : > { %1287 = vmatmul.msk.f32.gmra.mxu3 %vm589_vm1, %v686_v18  ;;  %v1018_v18 = vld [vmem:[%s1739_s8 + $0x10] sm:$0xff] }
 0x2b5   : > { %1043 = vmatpush.msrb.mxu0 %v1018_v18 }
 0x2b7   : > { %1044 = vmatpush.msrb.mxu0 %v1017_v19 }
 0x2b9   : > { %1045 = vmatpush.msrb.mxu0 %v1016_v20 }
 0x2bb   : > { %v819_v23 = vpop.f32.mrf.mxu0 }
 0x2bc   : > { %v825_v24 = vmul.f32 0.25, %v819_v23 }
 0x2be   : > { %v827_v25 = vadd.f32 %v1525_v28, %v825_v24  ;;  %v1070_v24 = vld [vmem:[%s1741_s10 + $0x78] sm:$0xff] }
 0x2bf   : > { %1075 = vmatpush.msra.mxu1 %v1070_v24 }
 0x2c0   : > { %v829_v26 = vsel %vm632_vm2, %v827_v25, -inf }
 0x2c1   : > { %830 = vmax.xlane.f32.xlu2 %v829_v26  ;;  %v1068_v26 = vld [vmem:[%s1741_s10 + $0x68] sm:$0xff] }
 0x2c3   : > { %v822_v27 = vpop.f32.mrf.mxu0 }
 0x2c4   : > { %v826_v29 = vmul.f32 0.25, %v822_v27 }
 0x2c6   : > { %v828_v30 = vadd.f32 %v1525_v28, %v826_v29  ;;  %v1283_v28 = vld [vmem:[%s1735_s4 + $0x18] sm:$0xff] }
 0x2c7   : > { %906 = vmatpush.msrb.mxu2 %v1283_v28  ;;  %v1062_v28 = vld [vmem:[%s1741_s10 + $0x38] sm:$0xff] }
 0x2c8   : > { %v832_v31 = vsel %vm636_vm3, %v828_v30, -inf }
 0x2c9   : > { %833 = vmax.xlane.f32.xlu2 %v832_v31  ;;  %907 = vmatpush.msrb.mxu2 %v1282_v42 }
 0x32f   : > { %v938_v51 = vpop.f32.mrf.mxu3 }
 0x334   : > { %v831_v32 = vpop.xlane.xlu2 %830 }
 0x335   : > { %v835_v33 = vsub.f32 %v827_v25, %v831_v32  ;;  %v1069_v25 = vld [vmem:[%s1741_s10 + $0x70] sm:$0xff] }
 0x336   : > { %1076 = vmatpush.msra.mxu1 %v1069_v25 }
 0x337   : > { %v837_v34 = vmul.f32 1.442695, %v835_v33  ;;  %v941_v58 = vpop.f32.mrf.mxu3  ;;  %v1066_v33 = vld [vmem:[%s1741_s10 + $0x58] sm:$0xff] }
 0x338   : > { %1077 = vmatpush.msra.mxu1 %v1068_v26 }
 0x339   : > { %1329 = vpow2.f32 %v837_v34 }
 0x33c   : > { %v834_v35 = vpop.xlane.xlu2 %833 }
 0x33d   : > { %v836_v36 = vsub.f32 %v828_v30, %v834_v35  ;;  %v1067_v30 = vld [vmem:[%s1741_s10 + $0x60] sm:$0xff]  ;;  %v1065_v35 = vld [vmem:[%s1741_s10 + $0x50] sm:$0xff] }
 0x33e   : > { %1078 = vmatpush.msra.mxu1 %v1067_v30 }
 0x33f   : > { %v1330_v37 = vpop.eup %1329  ;;  %v839_v38 = vmul.f32 1.442695, %v836_v36 }
 0x340   : > { %v841_v39 = vsel %vm632_vm2, %v1330_v37, 0.0  ;;  %1079 = vmatpush.msra.mxu1 %v1066_v33 }
 0x341   : > { %1331 = vpow2.f32 %v839_v38  ;;  %842 = vadd.xlane.f32.xlu0 %v841_v39  ;;  %v1063_v39 = vld [vmem:[%s1741_s10 + $0x40] sm:$0xff] }
 0x342   : > { %1080 = vmatpush.msra.mxu1 %v1065_v35 }
 0x347   : > { %v1332_v40 = vpop.eup %1331 }
 0x348   : > { %v844_v41 = vsel %vm636_vm3, %v1332_v40, 0.0 }
 0x349   : > { %845 = vadd.xlane.f32.xlu1 %v844_v41 }
 0x3b4   : > { %v843_v43 = vpop.xlane.xlu0 %842 }
 0x3b5   : > { %1333 = vrcp.f32 %v843_v43 }
 0x3bb   : > { %v1334_v44 = vpop.eup %1333 }
 0x3bc   : > { %v846_v45 = vpop.xlane.xlu1 %845  ;;  %v849_v46 = vmul.f32 %v1334_v44, %v1330_v37  ;;  %v1064_v37 = vld [vmem:[%s1741_s10 + $0x48] sm:$0xff]  ;;  %v1315_v44 = vld [vmem:[%s1737_s6] ss:$0 sm:$0xff] }
 0x3bd   : > { %1335 = vrcp.f32 %v846_v45  ;;  %1081 = vmatpush.msra.mxu1 %v1064_v37  ;;  %v1061_v45 = vld [vmem:[%s1741_s10 + $0x30] sm:$0xff] }
 0x3be   : > { %1280 = vmatmul.msk.f32.vlgmr.msrb.gmra.mxu1 %vm632_vm2, %v849_v46  ;;  %1337 = vrcp.f32 %v1355_v0  ;;  %v1055_v0 = vld [vmem:[%s1741_s10] sm:$0xff] }
 0x3bf   : > { %1082 = vmatpush.msra.mxu1 %v1063_v39 }
 0x3c1   : > { %1083 = vmatpush.msra.mxu1 %v1062_v28 }
 0x3c3   : > { %v1336_v47 = vpop.eup %1335  ;;  %1084 = vmatpush.msra.mxu1 %v1061_v45 }
 0x3c4   : > { %v850_v48 = vmul.f32 %v1336_v47, %v1332_v40  ;;  %v1338_v1 = vpop.eup %1337 }
 0x3c5   : > { %v962_v2 = vmul.f32 32.0, %v1338_v1  ;;  %vm966_vm6 = vweird.f32 %v1338_v1 }
 0x3c6   : > { %1281 = vmatmul.msk.f32.gmra.mxu1 %vm632_vm2, %v850_v48 }
 0x3c7   : > { %v963_v3 = vsub.f32 1.0, %v962_v2 }
 0x3c9   : > { %v964_v4 = vmul.f32 %v1338_v1, %v963_v3 }
 0x43b   : > { %v877_v49 = vpop.f32.mrf.mxu1 }
 0x43c   : > { %1284 = vmatmul.msk.f32.vlgmr.msrb.gmra.mxu2 %vm589_vm1, %v877_v49  ;;  %v1316_v49 = vld [vmem:[%s1738_s7] ss:$0 sm:$0xff] }
 0x443   : > { %v880_v50 = vpop.f32.mrf.mxu1 }
 0x444   : > { %1285 = vmatmul.msk.f32.gmra.mxu2 %vm589_vm1, %v880_v50  ;;  %v1060_v50 = vld [vmem:[%s1741_s10 + $0x28] sm:$0xff] }
 0x445   : > { %1085 = vmatpush.msra.mxu1 %v1060_v50 }
 0x4bf   : > { %v909_v53 = vpop.f32.mrf.mxu2 }
 0x4c0   : > { %v939_v54 = vadd.f32 %v938_v51, %v909_v53  ;;  %v1059_v53 = vld [vmem:[%s1741_s10 + $0x20] sm:$0xff] }
 0x4c1   : > { %1086 = vmatpush.msra.mxu1 %v1059_v53 }
 0x4c2   : > { %v948_v55 = vadd.f32 %v1314_v52, %v939_v54 }
 0x4c4   : > { %v950_v56 = vadd.f32 %v948_v55, %v1471_v8  ;;  %v965_v8 = vadd.f32 %v1338_v1, %v964_v4 }
 0x4c6   : > { %v954_v57 = vsel %vm493_vm0, %v950_v56, 0.0  ;;  %v1620_v5 = vsel %vm966_vm6, %v1338_v1, %v965_v8  ;;  %v1317_v1 = vld [vmem:[%s1740_s9] ss:$0 sm:$0xff] }
 0x4c7   : > { %955 = vadd.xlane.f32.xlu2 %v954_v57  ;;  %v912_v59 = vpop.f32.mrf.mxu2 }
 0x4c8   : > { %v942_v60 = vadd.f32 %v941_v58, %v912_v59 }
 0x4ca   : > { %v949_v61 = vadd.f32 %v1314_v52, %v942_v60 }
 0x4cc   : > { %v951_v62 = vadd.f32 %v949_v61, %v1475_v9 }
 0x4ce   : > { %v958_v63 = vsel %vm957_vm5, %v951_v62, 0.0 }
 0x4cf   : > { %959 = vadd.xlane.f32.xlu0 %v958_v63  ;;  %v1056_v63 = vld [vmem:[%s1741_s10 + $0x8] sm:$0xff] }
 0x53a   : > { %v956_v6 = vpop.xlane.xlu2 %955 }
 0x53b   : > { %v968_v7 = vmul.f32 %v1620_v5, %v956_v6 }
 0x53d   : > { %v970_v10 = vsub.f32 %v950_v56, %v968_v7  ;;  %v1058_v56 = vld [vmem:[%s1741_s10 + $0x18] sm:$0xff] }
 0x53e   : > { %1087 = vmatpush.msra.mxu1 %v1058_v56 }
 0x53f   : > { %v972_v11 = vmul.f32 %v970_v10, %v970_v10 }
 0x541   : > { %v974_v9 = vsel %vm493_vm0, %v972_v11, 0.0 }
 0x542   : > { %v960_v12 = vpop.xlane.xlu0 %959  ;;  %975 = vadd.xlane.f32.xlu1 %v974_v9 }
 0x543   : > { %v969_v13 = vmul.f32 %v1620_v5, %v960_v12 }
 0x545   : > { %v1625_v14 = vsub.f32 %v951_v62, %v969_v13  ;;  %v1057_v62 = vld [vmem:[%s1741_s10 + $0x10] sm:$0xff] }
 0x546   : > { %1088 = vmatpush.msra.mxu1 %v1057_v62 }
 0x547   : > { %v973_v15 = vmul.f32 %v1625_v14, %v1625_v14 }
 0x548   : > { %1089 = vmatpush.msra.mxu1 %v1056_v63 }
 0x549   : > { %v977_v16 = vsel %vm957_vm5, %v973_v15, 0.0 }
 0x54a   : > { %978 = vadd.xlane.f32.xlu2 %v977_v16  ;;  %1090 = vmatpush.msra.mxu1 %v1055_v0 }
 0x5b5   : > { %v976_v21 = vpop.xlane.xlu1 %975 }
 0x5b6   : > { %v980_v22 = vmul.f32 %v976_v21, %v1620_v5 }
 0x5b8   : > { %v982_v23 = vadd.f32 1e-05, %v980_v22 }
 0x5ba   : > { %1339 = vrsqrt.f32 %v982_v23  ;;  %vm990_vm8 = vweird.f32 %v982_v23 }
 0x5bd   : > { %v979_v27 = vpop.xlane.xlu2 %978 }
 0x5be   : > { %v981_v29 = vmul.f32 %v979_v27, %v1620_v5 }
 0x5c0   : > { %v1340_v31 = vpop.eup %1339  ;;  %v983_v32 = vadd.f32 1e-05, %v981_v29 }
 0x5c1   : > { %v985_v34 = vmul.f32 %v1340_v31, %v982_v23  ;;  %vm991_vm7 = vweird.f32 %v1340_v31 }
 0x5c2   : > { %1341 = vrsqrt.f32 %v983_v32  ;;  %vm992_vm9 = vmor %vm990_vm8, %vm991_vm7  ;;  %vm1000_vm11 = vweird.f32 %v983_v32 }
 0x5c3   : > { %v986_v36 = vmul.f32 %v1340_v31, %v985_v34 }
 0x5c5   : > { %v987_v38 = vmul.f32 0.5, %v986_v36 }
 0x5c7   : > { %v988_v40 = vsub.f32 1.5, %v987_v38 }
 0x5c8   : > { %v1342_v41 = vpop.eup %1341 }
 0x5c9   : > { %v989_v42 = vmul.f32 %v1340_v31, %v988_v40  ;;  %v995_v43 = vmul.f32 %v1342_v41, %v983_v32  ;;  %vm1001_vm10 = vweird.f32 %v1342_v41 }
 0x5ca   : > { %vm1002_vm12 = vmor %vm1000_vm11, %vm1001_vm10 }
 0x5cb   : > { %v993_v46 = vsel %vm992_vm9, %v1340_v31, %v989_v42  ;;  %v996_v47 = vmul.f32 %v1342_v41, %v995_v43  ;;  %v1319_v42 = vld [vmem:[%s1743_s12] ss:$0 sm:$0xff] }
 0x5cc   : > { %v1004_v48 = vmul.f32 %v993_v46, %v970_v10  ;;  %v1318_v10 = vld [vmem:[%s1742_s11] ss:$0 sm:$0xff] }
 0x5cd   : > { %v997_v51 = vmul.f32 0.5, %v996_v47 }
 0x5ce   : > { %v1009_v52 = vmul.f32 %v1315_v44, %v1004_v48 }
 0x5cf   : > { %v998_v54 = vsub.f32 1.5, %v997_v51 }
 0x5d0   : > { %v1014_v55 = vadd.f32 %v1316_v49, %v1009_v52 }
 0x5d1   : > { %v999_v57 = vmul.f32 %v1342_v41, %v998_v54 }
 0x5d2   : > { %1288 = vmatmul.msk.f32.vlgmr.msrb.gmra.mxu0 %vm493_vm0, %v1014_v55 }
 0x5d3   : > { %v1003_v58 = vsel %vm1002_vm12, %v1342_v41, %v999_v57 }
 0x5d4   : > { %v1005_v59 = vmul.f32 %v1003_v58, %v1625_v14 }
 0x5d6   : > { %v1010_v60 = vmul.f32 %v1315_v44, %v1005_v59  ;;  %v1320_v44 = vld [vmem:[%s1744_s13] ss:$0 sm:$0xff] }
 0x5d8   : > { %v1015_v61 = vadd.f32 %v1316_v49, %v1010_v60 }
 0x5da   : > { %1289 = vmatmul.msk.f32.gmra.mxu0 %vm493_vm0, %v1015_v61 }
 0x64f   : > { %v1047_v2 = vpop.f32.mrf.mxu0 }
 0x650   : > { %v1048_v3 = vadd.f32 %v1317_v1, %v1047_v2 }
 0x652   : > { %v1053_v4 = vmax.f32 %v1048_v3, 0.0 }
 0x654   : > { %1091 = vmatmul.f32.vlgmr.msra.gmra.mxu1 %v1053_v4 }
 0x657   : > { %v1050_v8 = vpop.f32.mrf.mxu0 }
 0x658   : > { %v1051_v6 = vadd.f32 %v1317_v1, %v1050_v8 }
 0x65a   : > { %v1054_v7 = vmax.f32 %v1051_v6, 0.0 }
 0x65c   : > { %1094 = vmatmul.f32.gmra.mxu1 %v1054_v7 }
 0x6d1   : > { %v1092_v11 = vpop.f32.mrf.mxu1 }
 0x6d2   : > { %v1093_v9 = vadd.f32 %v1318_v10, %v1092_v11 }
 0x6d4   : > { %v1098_v12 = vadd.f32 %v1093_v9, %v1014_v55 }
 0x6d6   : > { %v1102_v13 = vsel %vm493_vm0, %v1098_v12, 0.0 }
 0x6d7   : > { %1103 = vadd.xlane.f32.xlu0 %v1102_v13 }
 0x6d9   : > { %v1095_v14 = vpop.f32.mrf.mxu1 }
 0x6da   : > { %v1096_v15 = vadd.f32 %v1318_v10, %v1095_v14 }
 0x6dc   : > { %v1099_v16 = vadd.f32 %v1096_v15, %v1015_v61 }
 0x6de   : > { %v1105_v17 = vsel %vm957_vm5, %v1099_v16, 0.0 }
 0x6df   : > { %1106 = vadd.xlane.f32.xlu1 %v1105_v17 }
 0x74a   : > { %v1104_v18 = vpop.xlane.xlu0 %1103 }
 0x74b   : > { %v1108_v19 = vmul.f32 %v1104_v18, %v1620_v5 }
 0x74d   : > { %v1110_v20 = vsub.f32 %v1098_v12, %v1108_v19 }
 0x74f   : > { %v1112_v21 = vmul.f32 %v1110_v20, %v1110_v20 }
 0x751   : > { %v1114_v22 = vsel %vm493_vm0, %v1112_v21, 0.0 }
 0x752   : > { %1115 = vadd.xlane.f32.xlu2 %v1114_v22  ;;  %v1107_v23 = vpop.xlane.xlu1 %1106 }
 0x753   : > { %v1109_v24 = vmul.f32 %v1107_v23, %v1620_v5 }
 0x755   : > { %v1111_v25 = vsub.f32 %v1099_v16, %v1109_v24 }
 0x757   : > { %v1113_v26 = vmul.f32 %v1111_v25, %v1111_v25 }
 0x759   : > { %v1117_v27 = vsel %vm957_vm5, %v1113_v26, 0.0 }
 0x75a   : > { %1118 = vadd.xlane.f32.xlu0 %v1117_v27 }
 0x7c5   : > { %v1116_v29 = vpop.xlane.xlu2 %1115 }
 0x7c6   : > { %v1120_v30 = vmul.f32 %v1116_v29, %v1620_v5 }
 0x7c8   : > { %v1122_v31 = vadd.f32 1e-05, %v1120_v30 }
 0x7ca   : > { %1343 = vrsqrt.f32 %v1122_v31  ;;  %vm1130_vm14 = vweird.f32 %v1122_v31 }
 0x7cd   : > { %v1119_v32 = vpop.xlane.xlu0 %1118 }
 0x7ce   : > { %v1121_v33 = vmul.f32 %v1119_v32, %v1620_v5 }
 0x7d0   : > { %v1344_v34 = vpop.eup %1343  ;;  %v1123_v35 = vadd.f32 1e-05, %v1121_v33 }
 0x7d1   : > { %v1125_v36 = vmul.f32 %v1344_v34, %v1122_v31  ;;  %vm1131_vm13 = vweird.f32 %v1344_v34 }
 0x7d2   : > { %1345 = vrsqrt.f32 %v1123_v35  ;;  %vm1132_vm15 = vmor %vm1130_vm14, %vm1131_vm13  ;;  %vm1140_vm2 = vweird.f32 %v1123_v35 }
 0x7d3   : > { %v1126_v37 = vmul.f32 %v1344_v34, %v1125_v36 }
 0x7d5   : > { %v1127_v38 = vmul.f32 0.5, %v1126_v37 }
 0x7d7   : > { %v1128_v39 = vsub.f32 1.5, %v1127_v38 }
 0x7d8   : > { %v1346_v40 = vpop.eup %1345 }
 0x7d9   : > { %v1129_v41 = vmul.f32 %v1344_v34, %v1128_v39  ;;  %v1135_v28 = vmul.f32 %v1346_v40, %v1123_v35  ;;  %vm1141_vm1 = vweird.f32 %v1346_v40 }
 0x7da   : > { %vm1142_vm3 = vmor %vm1140_vm2, %vm1141_vm1 }
 0x7db   : > { %v1133_v43 = vsel %vm1132_vm15, %v1344_v34, %v1129_v41  ;;  %v1136_v5 = vmul.f32 %v1346_v40, %v1135_v28 }
 0x7dc   : > { %v1144_v45 = vmul.f32 %v1133_v43, %v1110_v20 }
 0x7dd   : > { %v1137_v46 = vmul.f32 0.5, %v1136_v5 }
 0x7de   : > { %v1149_v47 = vmul.f32 %v1319_v42, %v1144_v45 }
 0x7df   : > { %v1138_v48 = vsub.f32 1.5, %v1137_v46 }
 0x7e0   : > { %v1154_v49 = vadd.f32 %v1320_v44, %v1149_v47 }
 0x7e1   : > { %v1139_v50 = vmul.f32 %v1346_v40, %v1138_v48 }
 0x7e2   : > { %1156 = vst.msk [vmem:[%s481_s16] sm:$0xff] %vm493_vm0, %v1154_v49 }
 0x7e3   : > { %v1143_v51 = vsel %vm1142_vm3, %v1346_v40, %v1139_v50 }
 0x7e4   : > { %v1145_v52 = vmul.f32 %v1143_v51, %v1111_v25 }
 0x7e6   : > { %v1150_v53 = vmul.f32 %v1319_v42, %v1145_v52 }
 0x7e8   : > { %v1155_v54 = vadd.f32 %v1320_v44, %v1150_v53 }
 0x7ea   : > { %1157 = vst.msk [vmem:[%s481_s16 + $0x8] sm:$0x3] %vm957_vm5, %v1155_v54 }
 0x7eb PF: > { %s24_s29 = sadd.s32 1, %s1353_s29  }
 0x7ec   : > { %p21_p4 = scmp.ge.s32.totalorder %s24_s29, 4  }
 0x7ee   :  { %23 = sbr.rel (!%p21_p4) target bundleno = 1 (0x1), region = 120 }

// kernel: rswi_transformer_forward.6
= control target key start
LH: loop header
LB: loop body
LE: loop exit
PB: predicated region body
PF: predicated region fallthrough
CT: control target
= control target key end

     0   :  { %s2339_s0 = inlined_call_operand.vmem [shape: f32[2,8,32], index: 0, kind: input, shape index: {}]   ;;  %s2340_s1 = inlined_call_operand.vmem [shape: f32[2,10,32], index: 1, kind: input, shape index: {}]   ;;  %s2341_s2 = inlined_call_operand.vmem [shape: f32[6,32,16], index: 2, kind: input, shape index: {}]   ;;  %s2342_s3 = inlined_call_operand.vmem [shape: f32[6,1,16], index: 3, kind: input, shape index: {}]   ;;  %s2343_s4 = inlined_call_operand.vmem [shape: f32[2,16,32], index: 4, kind: input, shape index: {}]   ;;  %s2344_s5 = inlined_call_operand.vmem [shape: f32[1,32], index: 5, kind: input, shape index: {}]   ;;  %s2345_s6 = inlined_call_operand.vmem [shape: f32[1,32], index: 6, kind: input, shape index: {}]   ;;  %s2346_s7 = inlined_call_operand.vmem [shape: f32[1,32], index: 7, kind: input, shape index: {}]   ;;  %s2347_s8 = inlined_call_operand.vmem [shape: f32[6,32,16], index: 8, kind: input, shape index: {}]   ;;  %s2348_s9 = inlined_call_operand.vmem [shape: f32[6,1,16], index: 9, kind: input, shape index: {}]   ;;  %s2349_s10 = inlined_call_operand.vmem [shape: f32[2,16,32], index: 10, kind: input, shape index: {}]   ;;  %s2350_s11 = inlined_call_operand.vmem [shape: f32[1,32], index: 11, kind: input, shape index: {}]   ;;  %s2351_s12 = inlined_call_operand.vmem [shape: f32[1,32], index: 12, kind: input, shape index: {}]   ;;  %s2352_s13 = inlined_call_operand.vmem [shape: f32[1,32], index: 13, kind: input, shape index: {}]   ;;  %s2353_s14 = inlined_call_operand.vmem [shape: f32[32,128], index: 14, kind: input, shape index: {}]   ;;  %s2354_s15 = inlined_call_operand.vmem [shape: f32[1,128], index: 15, kind: input, shape index: {}]   ;;  %s2355_s16 = inlined_call_operand.vmem [shape: f32[128,32], index: 16, kind: input, shape index: {}]   ;;  %s2356_s17 = inlined_call_operand.vmem [shape: f32[1,32], index: 17, kind: input, shape index: {}]   ;;  %s2357_s18 = inlined_call_operand.vmem [shape: f32[1,32], index: 18, kind: input, shape index: {}]   ;;  %s2358_s19 = inlined_call_operand.vmem [shape: f32[1,32], index: 19, kind: input, shape index: {}]   ;;  %s2359_s20 = inlined_call_operand.vmem [shape: f32[2,8,32], index: 20, kind: output, shape index: {}]  }
   0x1   :  { %2366 = sst [smem:[#allocation2_spill]] %s2339_s0 }
   0x2   :  { %2367 = sst [smem:[#allocation3_spill]] %s2340_s1  ;;  %s1927_s1 = smov 0  }
   0x3   :  { %2368 = sst [smem:[#allocation4_spill]] %s2341_s2 }
   0x4   :  { %2369 = sst [smem:[#allocation5_spill]] %s2342_s3 }
   0x5   :  { %2370 = sst [smem:[#allocation6_spill]] %s2343_s4 }
   0x6   :  { %2371 = sst [smem:[#allocation7_spill]] %s2344_s5 }
   0x7 LB: > { %s1653_s22 = sadd.s32 4294967295, %s1818_s1   ;;  %p1657_p0 = scmp.ge.s32.totalorder %s1818_s1, 1  ;;  %s1818_s1 = sphi %s1927_s1, %s30_s1  }
   0x8   : > { %p571_p1 = scmp.lt.s32.totalorder %s1818_s1, 3 }
   0xa   : > { %p572_p2 = pnand %p1657_p0, %p571_p1 }
   0xb   : > { %s2372_s2 = sld [smem:[#allocation4_spill]] (!%p572_p2)  ;;  %p632_p3 = scmp.lt.s32.totalorder (!%p572_p2), %s1653_s22, 1 }
   0xc   : > { %575 = sbr.rel (%p572_p2) target bundleno = 3606 (0xe16), region = 100  ;;  %s2373_s24 = sld [smem:[#allocation2_spill]] (!%p572_p2) }
   0xd   : > { %s2374_s23 = sld [smem:[#allocation5_spill]] (!%p572_p2) }
   0xe   : > { %s2376_s5 = sld [smem:[#allocation7_spill]] (!%p572_p2) }
  0x11   : > { %v657_v0 = vld [vmem:[%s2372_s2 + $0x18] sm:$0xff]  ;;  %v656_v1 = vld [vmem:[%s2372_s2 + $0x10] sm:$0xff]  ;;  %v655_v2 = vld [vmem:[%s2372_s2 + $0x8] sm:$0xff]  ;;  %s2380_s22 = smov (!%p632_p3, %s1653_s22), 1  ;;  %vm662_vm0 = vcmask 261120   ;;  %vm746_vm1 = vcmask 130048   ;;  %v648_v18 = vlaneseq }
  0x12   : > { %678 = vmatpush.msra.mxu1 %v657_v0  ;;  %v654_v3 = vld [vmem:[%s2372_s2] sm:$0xff]  ;;  %s2363_s29 = sshll.u32 %s2380_s22, 3  ;;  %v1666_v4 = vld [vmem:[%s2372_s2 + $0x58] sm:$0xff]  ;;  %v1665_v6 = vld [vmem:[%s2372_s2 + $0x50] sm:$0xff]  ;;  %v1820_v22 = vmov 0.0   ;;  %vm775_vm3 = vcmask 64512  }
  0x13   : > { %s635_s25 = scalar_lea.vmem %s2373_s24, %s2363_s29  ;;  %v1664_v7 = vld [vmem:[%s2372_s2 + $0x48] sm:$0xff]  ;;  %v1663_v8 = vld [vmem:[%s2372_s2 + $0x40] sm:$0xff]  ;;  %v1672_v15 = vld [vmem:[%s2372_s2 + $0x98] sm:$0xff]  ;;  %v649_v19 = vshrl.u32 %v648_v18, 7  ;;  %v651_v20 = vand.u32 127, %v648_v18  ;;  %s2375_s29 = sld [smem:[#allocation6_spill]] }
  0x14   : > { %679 = vmatpush.msra.mxu1 %v656_v1  ;;  %v1958_v5 = vld [vmem:[%s635_s25] sm:$0xff]  ;;  %v1671_v16 = vld [vmem:[%s2372_s2 + $0x90] sm:$0xff]  ;;  %738 = vmatpush.msra.mxu2 %v1672_v15  ;;  %v1670_v17 = vld [vmem:[%s2372_s2 + $0x88] sm:$0xff]  ;;  %s1755_s27 = sshll.u32 %s2380_s22, 4  ;;  %s2377_s25 = sld [smem:[#allocation3_spill]]  ;;  %vm1191_vm8 = vcmask 80896  }
  0x15   : > { %v1767_v10 = vld [vmem:[%s2374_s23 + $0x2] ss:$0 sm:$0xff]  ;;  %v1766_v11 = vld [vmem:[%s2374_s23] ss:$0 sm:$0xff]  ;;  %vm652_vm2 = vcmp.gt.s32.totalorder %v651_v20, %v649_v19  ;;  %v1681_v28 = vld [vmem:[%s2372_s2 + $0x38] sm:$0xff]  ;;  %vm1206_vm9 = vcmask 1041408  }
  0x16   : > { %680 = vmatpush.msra.mxu1 %v655_v2  ;;  %739 = vmatpush.msra.mxu2 %v1671_v16  ;;  %v1990_v23 = vsel %vm652_vm2, -1e+09, %v1820_v22  ;;  %v1669_v27 = vld [vmem:[%s2372_s2 + $0x80] sm:$0xff]  ;;  %v1680_v29 = vld [vmem:[%s2372_s2 + $0x30] sm:$0xff]  ;;  %v1687_v30 = vld [vmem:[%s2372_s2 + $0x78] sm:$0xff]  ;;  %v1821_v22 = vmov 32.0  }
  0x17   : > { %v1679_v31 = vld [vmem:[%s2372_s2 + $0x28] sm:$0xff]  ;;  %v1686_v32 = vld [vmem:[%s2372_s2 + $0x70] sm:$0xff]  ;;  %v1678_v34 = vld [vmem:[%s2372_s2 + $0x20] sm:$0xff]  ;;  %s2378_s26 = sshll.u32 %s2380_s22, 3 }
  0x18   : > { %681 = vmatpush.msra.mxu1 %v654_v3  ;;  %740 = vmatpush.msra.mxu2 %v1670_v17  ;;  %v1685_v33 = vld [vmem:[%s2372_s2 + $0x68] sm:$0xff]  ;;  %v1684_v35 = vld [vmem:[%s2372_s2 + $0x60] sm:$0xff]  ;;  %v1693_v47 = vld [vmem:[%s2372_s2 + $0xb8] sm:$0xff] }
  0x19   : > { %1662 = vmatmul.msk.f32.vlgmr.msra.gmra.mxu1 %vm662_vm0, %v1958_v5  ;;  %v1768_v41 = vld [vmem:[%s2374_s23 + $0x4] ss:$0 sm:$0xff]  ;;  %v1769_v44 = vld [vmem:[%s2374_s23 + $0x3] ss:$0 sm:$0xff]  ;;  %v1692_v48 = vld [vmem:[%s2372_s2 + $0xb0] sm:$0xff] }
  0x1a   : > { %708 = vmatpush.msrb.mxu1 %v1666_v4  ;;  %741 = vmatpush.msra.mxu2 %v1669_v27  ;;  %v1691_v49 = vld [vmem:[%s2372_s2 + $0xa8] sm:$0xff]  ;;  %v1690_v50 = vld [vmem:[%s2372_s2 + $0xa0] sm:$0xff]  ;;  %s640_s2 = scalar_lea.vmem %s2377_s25, %s1755_s27 }
  0x1b   : > { %1674 = vmatmul.msk.f32.vlgmr.msra.gmra.mxu2 %vm662_vm0, %v1958_v5  ;;  %v811_v51 = vld [vmem:[%s2375_s29 + $0x8] sm:$0xff]  ;;  %v1770_v55 = vld [vmem:[%s2374_s23 + $0x1] ss:$0 sm:$0xff]  ;;  %v1772_v15 = vld [vmem:[%s2376_s5] ss:$0 sm:$0xff]  ;;  %s644_s5 = scalar_lea.vmem %s2359_s20, %s2378_s26 }
  0x1c   : > { %709 = vmatpush.msrb.mxu1 %v1665_v6  ;;  %834 = vmatpush.msrb.mxu2 %v1681_v28  ;;  %v810_v58 = vld [vmem:[%s2375_s29] sm:$0xff] }
  0x1d   : > { %v1771_v6 = vld [vmem:[%s2374_s23 + $0x5] ss:$0 sm:$0xff] }
  0x1e   : > { %710 = vmatpush.msrb.mxu1 %v1664_v7  ;;  %835 = vmatpush.msrb.mxu2 %v1680_v29 }
  0x20   : > { %711 = vmatpush.msrb.mxu1 %v1663_v8  ;;  %836 = vmatpush.msrb.mxu2 %v1679_v31 }
  0x21   : > { %1668 = vmatmul.msk.f32.vlgmr.msrb.gmra.mxu1 %vm662_vm0, %v1958_v5 }
  0x22   : > { %864 = vmatpush.msra.mxu1 %v1687_v30  ;;  %837 = vmatpush.msrb.mxu2 %v1678_v34  ;;  %v1706_v34 = vld [vmem:[%s2347_s8 + $0x50] sm:$0xff] }
  0x23   : > { %1683 = vmatmul.msk.f32.vlgmr.msrb.gmra.mxu2 %vm662_vm0, %v1958_v5 }
  0x24   : > { %865 = vmatpush.msra.mxu1 %v1686_v32  ;;  %894 = vmatpush.msra.mxu2 %v1693_v47 }
  0x26   : > { %866 = vmatpush.msra.mxu1 %v1685_v33  ;;  %895 = vmatpush.msra.mxu2 %v1692_v48  ;;  %v1707_v33 = vld [vmem:[%s2347_s8 + $0x58] sm:$0xff] }
  0x28   : > { %867 = vmatpush.msra.mxu1 %v1684_v35  ;;  %896 = vmatpush.msra.mxu2 %v1691_v49  ;;  %v1705_v35 = vld [vmem:[%s2347_s8 + $0x48] sm:$0xff] }
  0x29   : > { %1689 = vmatmul.msk.f32.vlgmr.msra.gmra.mxu1 %vm662_vm0, %v1958_v5 }
  0x2a   : > { %897 = vmatpush.msra.mxu2 %v1690_v50 }
  0x2b   : > { %1695 = vmatmul.msk.f32.vlgmr.msra.gmra.mxu2 %vm662_vm0, %v1958_v5 }
  0x2c   : > { %1007 = vmatpush.msrb.mxu2 %v811_v51 }
  0x2e   : > { %1008 = vmatpush.msrb.mxu2 %v810_v58 }
  0x96   : > { %v683_v9 = vpop.f32.mrf.mxu1 }
  0x97   : > { %v684_v14 = vadd.f32 %v1766_v11, %v683_v9  ;;  %v1700_v9 = vld [vmem:[%s2375_s29 + $0x18] sm:$0xff] }
  0x98   : > { %984 = vmatpush.msrb.mxu1 %v1700_v9  ;;  %v1712_v9 = vld [vmem:[%s2347_s8 + $0x88] sm:$0xff] }
  0x9e   : > { %v713_v12 = vpop.f32.mrf.mxu1  ;;  %v743_v42 = vpop.f32.mrf.mxu2 }
  0x9f   : > { %v714_v13 = vadd.f32 %v1767_v10, %v713_v12  ;;  %v744_v43 = vadd.f32 %v1768_v41, %v743_v42  ;;  %v1059_v41 = vld [vmem:[%s2347_s8 + $0x8] sm:$0xff]  ;;  %v1058_v42 = vld [vmem:[%s2347_s8] sm:$0xff] }
  0xa1   : > { %1675 = vmatpush.xpose.msk.msra.mxu3 %vm746_vm1, %v714_v13  ;;  %v1699_v13 = vld [vmem:[%s2375_s29 + $0x10] sm:$0xff] }
  0xa2   : > { %985 = vmatpush.msrb.mxu1 %v1699_v13 }
  0xa4   : > { %1676 = vmatmul.msk.f32.vlgmr.msra.gmra.mxu3 %vm746_vm1, %v684_v14 }
  0xa5   : > { %805 = vmatpush.msrb.mxu3 %v744_v43 }
  0xa6   : > { %v869_v45 = vpop.f32.mrf.mxu1  ;;  %v839_v56 = vpop.f32.mrf.mxu2 }
  0xa7   : > { %v870_v46 = vadd.f32 %v1769_v44, %v869_v45  ;;  %v840_v57 = vadd.f32 %v1770_v55, %v839_v56  ;;  %v1774_v55 = vld [vmem:[%s2346_s7] ss:$0 sm:$0xff] }
  0xa9   : > { %1696 = vmatpush.xpose.msk.msra.mxu3 %vm746_vm1, %v870_v46 }
  0xae   : > { %v899_v7 = vpop.f32.mrf.mxu2 }
  0xaf   : > { %v900_v8 = vadd.f32 %v1771_v6, %v899_v7  ;;  %v1714_v7 = vld [vmem:[%s2347_s8 + $0x98] sm:$0xff] }
  0xb0   : > { %1150 = vmatpush.msra.mxu1 %v1714_v7 }
  0xb1   : > { %959 = vmatpush.msra.mxu0 %v900_v8  ;;  %v1713_v8 = vld [vmem:[%s2347_s8 + $0x90] sm:$0xff] }
  0xb2   : > { %1151 = vmatpush.msra.mxu1 %v1713_v8 }
  0xb3   : > { %1117 = vmatpush.msrb.mxu0 %v1707_v33  ;;  %v1779_v33 = vld [vmem:[%s2348_s9 + $0x3] ss:$0 sm:$0xff] }
  0xb4   : > { %1152 = vmatpush.msra.mxu1 %v1712_v9 }
  0xb5   : > { %1118 = vmatpush.msrb.mxu0 %v1706_v34 }
  0xb7   : > { %1119 = vmatpush.msrb.mxu0 %v1705_v35 }
 0x127   : > { %v770_v21 = vpop.f32.mrf.mxu3 }
 0x128   : > { %v773_v24 = vmul.f32 0.25, %v770_v21 }
 0x12a   : > { %v774_v25 = vadd.f32 %v773_v24, %v1990_v23 }
 0x12c   : > { %v776_v26 = vsel %vm775_vm3, %v774_v25, -inf }
 0x12d   : > { %777 = vmax.xlane.f32.xlu0 %v776_v26 }
 0x1a0   : > { %v778_v36 = vpop.xlane.xlu0 %777 }
 0x1a1   : > { %v779_v37 = vsub.f32 %v774_v25, %v778_v36  ;;  %v1704_v36 = vld [vmem:[%s2347_s8 + $0x40] sm:$0xff] }
 0x1a2   : > { %1120 = vmatpush.msrb.mxu0 %v1704_v36  ;;  %v1777_v36 = vld [vmem:[%s2348_s9 + $0x1] ss:$0 sm:$0xff] }
 0x1a3   : > { %v780_v38 = vmul.f32 1.442695, %v779_v37  ;;  %v2100_v37 = vld [vmem:[%s640_s2] sm:$0xff] }
 0x1a5   : > { %1788 = vpow2.f32 %v780_v38  ;;  %v2104_v38 = vld [vmem:[%s640_s2 + $0x8] sm:$0x3] }
 0x1ab   : > { %v1789_v39 = vpop.eup %1788 }
 0x1ac   : > { %v782_v40 = vsel %vm775_vm3, %v1789_v39, 0.0 }
 0x1ad   : > { %783 = vadd.xlane.f32.xlu0 %v782_v40  ;;  %v1060_v40 = vld [vmem:[%s2347_s8 + $0x10] sm:$0xff] }
 0x220   : > { %v784_v52 = vpop.xlane.xlu0 %783 }
 0x221   : > { %1790 = vrcp.f32 %v784_v52  ;;  %v1773_v52 = vld [vmem:[%s2345_s6] ss:$0 sm:$0xff] }
 0x227   : > { %v1791_v53 = vpop.eup %1790 }
 0x228   : > { %v786_v54 = vmul.f32 %v1791_v53, %v1789_v39  ;;  %v1061_v39 = vld [vmem:[%s2347_s8 + $0x18] sm:$0xff] }
 0x22a   : > { %1677 = vmatmul.msk.f32.vlgmr.msrb.gmra.mxu3 %vm775_vm3, %v786_v54 }
 0x22b   : > { %1081 = vmatpush.msrb.mxu3 %v1061_v39 }
 0x22d   : > { %1082 = vmatpush.msrb.mxu3 %v1060_v40 }
 0x22f   : > { %1083 = vmatpush.msrb.mxu3 %v1059_v41 }
 0x231   : > { %1084 = vmatpush.msrb.mxu3 %v1058_v42  ;;  %v1739_v42 = vld [vmem:[%s2347_s8 + $0xb8] sm:$0xff] }
 0x232   : > { %1697 = vmatmul.msk.f32.vlgmr.msra.gmra.mxu3 %vm746_vm1, %v840_v57 }
 0x2ad   : > { %v807_v59 = vpop.f32.mrf.mxu3 }
 0x2ae   : > { %1702 = vmatmul.msk.f32.vlgmr.msrb.gmra.mxu2 %vm746_vm1, %v807_v59  ;;  %v1775_v59 = vld [vmem:[%s2348_s9 + $0x2] ss:$0 sm:$0xff] }
 0x2b5   : > { %v925_v60 = vpop.f32.mrf.mxu3 }
 0x2b6   : > { %v928_v61 = vmul.f32 0.25, %v925_v60 }
 0x2b8   : > { %v929_v62 = vadd.f32 %v928_v61, %v1990_v23 }
 0x2ba   : > { %v930_v63 = vsel %vm775_vm3, %v929_v62, -inf }
 0x2bb   : > { %931 = vmax.xlane.f32.xlu1 %v930_v63  ;;  %v1726_v63 = vld [vmem:[%s2347_s8 + $0x38] sm:$0xff] }
 0x32e   : > { %v932_v0 = vpop.xlane.xlu1 %931 }
 0x32f   : > { %v933_v1 = vsub.f32 %v929_v62, %v932_v0  ;;  %v1725_v0 = vld [vmem:[%s2347_s8 + $0x30] sm:$0xff] }
 0x331   : > { %v934_v2 = vmul.f32 1.442695, %v933_v1  ;;  %v1010_v16 = vpop.f32.mrf.mxu2  ;;  %v1724_v1 = vld [vmem:[%s2347_s8 + $0x28] sm:$0xff] }
 0x333   : > { %1792 = vpow2.f32 %v934_v2  ;;  %v1723_v2 = vld [vmem:[%s2347_s8 + $0x20] sm:$0xff] }
 0x339   : > { %v1793_v3 = vpop.eup %1792 }
 0x33a   : > { %v936_v4 = vsel %vm775_vm3, %v1793_v3, 0.0 }
 0x33b   : > { %937 = vadd.xlane.f32.xlu1 %v936_v4 }
 0x3ae   : > { %v938_v10 = vpop.xlane.xlu1 %937 }
 0x3af   : > { %1794 = vrcp.f32 %v938_v10  ;;  %v1711_v10 = vld [vmem:[%s2347_s8 + $0x80] sm:$0xff] }
 0x3b0   : > { %1796 = vrcp.f32 %v1821_v22  ;;  %1153 = vmatpush.msra.mxu1 %v1711_v10 }
 0x3b5   : > { %v1795_v11 = vpop.eup %1794 }
 0x3b6   : > { %v940_v12 = vmul.f32 %v1795_v11, %v1793_v3  ;;  %v1797_v23 = vpop.eup %1796  ;;  %v1776_v3 = vld [vmem:[%s2348_s9] ss:$0 sm:$0xff] }
 0x3b7   : > { %v1025_v24 = vmul.f32 32.0, %v1797_v23  ;;  %vm1029_vm4 = vweird.f32 %v1797_v23 }
 0x3b8   : > { %1698 = vmatmul.msk.f32.vlgmr.msra.gmra.mxu0 %vm775_vm3, %v940_v12 }
 0x3b9   : > { %v1026_v25 = vsub.f32 1.0, %v1025_v24  ;;  %v1732_v24 = vld [vmem:[%s2347_s8 + $0x78] sm:$0xff]  ;;  %1317 = vmatpush.msra.mxu0 %v1739_v42  ;;  %v1782_v42 = vld [vmem:[%s2351_s12] ss:$0 sm:$0xff] }
 0x3bb   : > { %v1027_v26 = vmul.f32 %v1797_v23, %v1026_v25  ;;  %v1731_v25 = vld [vmem:[%s2347_s8 + $0x70] sm:$0xff] }
 0x3bd   : > { %v1028_v27 = vadd.f32 %v1797_v23, %v1027_v26  ;;  %v1730_v26 = vld [vmem:[%s2347_s8 + $0x68] sm:$0xff] }
 0x3bf   : > { %v2080_v28 = vsel %vm1029_vm4, %v1797_v23, %v1028_v27  ;;  %v1729_v27 = vld [vmem:[%s2347_s8 + $0x60] sm:$0xff] }
 0x3c0   : > { %1709 = vmatmul.msk.f32.vlgmr.msrb.gmra.mxu0 %vm662_vm0, %v2100_v37 }
 0x3c8   : > { %1710 = vmatmul.msk.f32.gmra.mxu0 %vm662_vm0, %v2104_v38 }
 0x435   : > { %v961_v14 = vpop.f32.mrf.mxu0 }
 0x436   : > { %1701 = vmatmul.msk.f32.vlgmr.msrb.gmra.mxu1 %vm746_vm1, %v961_v14 }
 0x43d   : > { %v1122_v58 = vpop.f32.mrf.mxu0 }
 0x43e   : > { %v1123_v62 = vadd.f32 %v1775_v59, %v1122_v58  ;;  %1716 = vmatmul.msk.f32.vlgmr.msra.gmra.mxu1 %vm662_vm0, %v2100_v37  ;;  %v1231_v58 = vld [vmem:[%s2349_s10 + $0x8] sm:$0xff] }
 0x445   : > { %v1125_v60 = vpop.f32.mrf.mxu0 }
 0x446   : > { %v1126_v61 = vadd.f32 %v1775_v59, %v1125_v60  ;;  %1717 = vmatmul.msk.f32.gmra.mxu1 %vm662_vm0, %v2104_v38  ;;  %v1230_v59 = vld [vmem:[%s2349_s10] sm:$0xff]  ;;  %v1749_v60 = vld [vmem:[%s2349_s10 + $0x18] sm:$0xff] }
 0x448   : > { %1718 = vmatpush.xpose.msk.msra.mxu2 %vm746_vm1, %v1126_v61 }
 0x44c   : > { %1719 = vmatpush.xpose.msk.msra.mxu2 %vm746_vm1, %v1123_v62 }
 0x450   : > { %1254 = vmatpush.msrb.mxu2 %v1726_v63 }
 0x452   : > { %1255 = vmatpush.msrb.mxu2 %v1725_v0  ;;  %v1748_v0 = vld [vmem:[%s2349_s10 + $0x10] sm:$0xff] }
 0x454   : > { %1256 = vmatpush.msrb.mxu2 %v1724_v1 }
 0x456   : > { %1257 = vmatpush.msrb.mxu2 %v1723_v2  ;;  %v1781_v2 = vld [vmem:[%s2350_s11] ss:$0 sm:$0xff] }
 0x4b3   : > { %v987_v17 = vpop.f32.mrf.mxu1 }
 0x4b4   : > { %v1011_v18 = vadd.f32 %v1010_v16, %v987_v17 }
 0x4b6   : > { %v1017_v19 = vadd.f32 %v1772_v15, %v1011_v18  ;;  %v1778_v15 = vld [vmem:[%s2348_s9 + $0x4] ss:$0 sm:$0xff] }
 0x4b8   : > { %v1018_v20 = vadd.f32 %v1017_v19, %v1958_v5 }
 0x4ba   : > { %v1021_v21 = vsel %vm662_vm0, %v1018_v20, 0.0 }
 0x4bb   : > { %1022 = vadd.xlane.f32.xlu2 %v1021_v21  ;;  %v1155_v14 = vpop.f32.mrf.mxu1 }
 0x4bc   : > { %v1156_v18 = vadd.f32 %v1778_v15, %v1155_v14 }
 0x4c3   : > { %v1158_v16 = vpop.f32.mrf.mxu1 }
 0x4c4   : > { %v1159_v19 = vadd.f32 %v1778_v15, %v1158_v16  ;;  %v1485_v15 = vld [vmem:[%s2353_s14 + $0x18] sm:$0xff]  ;;  %v1483_v16 = vld [vmem:[%s2353_s14 + $0x8] sm:$0xff] }
 0x4c6   : > { %1721 = vmatpush.msk.msra.mxu3 %vm1206_vm9, %v1159_v19  ;;  %v1528_v19 = vld [vmem:[%s2355_s16 + $0x70] sm:$0xff] }
 0x4c8   : > { %1225 = vmatpush.msra.mxu3 %v1156_v18  ;;  %v1529_v18 = vld [vmem:[%s2355_s16 + $0x78] sm:$0xff] }
 0x52e   : > { %v1023_v29 = vpop.xlane.xlu2 %1022 }
 0x52f   : > { %v1031_v30 = vmul.f32 %v2080_v28, %v1023_v29 }
 0x531   : > { %v1032_v31 = vsub.f32 %v1018_v20, %v1031_v30 }
 0x533   : > { %v1033_v32 = vmul.f32 %v1032_v31, %v1032_v31 }
 0x535   : > { %v1034_v5 = vsel %vm662_vm0, %v1033_v32, 0.0 }
 0x536   : > { %1035 = vadd.xlane.f32.xlu2 %v1034_v5 }
 0x5a9   : > { %v1036_v43 = vpop.xlane.xlu2 %1035 }
 0x5aa   : > { %v1037_v44 = vmul.f32 %v1036_v43, %v2080_v28  ;;  %v1738_v43 = vld [vmem:[%s2347_s8 + $0xb0] sm:$0xff] }
 0x5ab   : > { %1318 = vmatpush.msra.mxu0 %v1738_v43 }
 0x5ac   : > { %v1038_v45 = vadd.f32 1e-05, %v1037_v44  ;;  %v1737_v44 = vld [vmem:[%s2347_s8 + $0xa8] sm:$0xff] }
 0x5ad   : > { %1319 = vmatpush.msra.mxu0 %v1737_v44 }
 0x5ae   : > { %1798 = vrsqrt.f32 %v1038_v45  ;;  %vm1045_vm6 = vweird.f32 %v1038_v45 }
 0x5b4   : > { %v1799_v46 = vpop.eup %1798 }
 0x5b5   : > { %v1040_v47 = vmul.f32 %v1799_v46, %v1038_v45  ;;  %vm1046_vm5 = vweird.f32 %v1799_v46  ;;  %v1736_v45 = vld [vmem:[%s2347_s8 + $0xa0] sm:$0xff] }
 0x5b6   : > { %vm1047_vm7 = vmor %vm1045_vm6, %vm1046_vm5  ;;  %1320 = vmatpush.msra.mxu0 %v1736_v45  ;;  %v1783_v45 = vld [vmem:[%s2352_s13] ss:$0 sm:$0xff] }
 0x5b7   : > { %v1041_v48 = vmul.f32 %v1799_v46, %v1040_v47  ;;  %1741 = vmatmul.msk.f32.vlgmr.msra.gmra.mxu0 %vm662_vm0, %v2100_v37 }
 0x5b8   : > { %1534 = vmatpush.msrb.mxu0 %v1529_v18 }
 0x5b9   : > { %v1042_v49 = vmul.f32 0.5, %v1041_v48 }
 0x5ba   : > { %1535 = vmatpush.msrb.mxu0 %v1528_v19 }
 0x5bb   : > { %v1043_v50 = vsub.f32 1.5, %v1042_v49 }
 0x5bd   : > { %v1044_v51 = vmul.f32 %v1799_v46, %v1043_v50  ;;  %v1780_v50 = vld [vmem:[%s2348_s9 + $0x5] ss:$0 sm:$0xff] }
 0x5bf   : > { %v1048_v53 = vsel %vm1047_vm7, %v1799_v46, %v1044_v51  ;;  %1742 = vmatmul.msk.f32.gmra.mxu0 %vm662_vm0, %v2104_v38 }
 0x5c0   : > { %v1049_v54 = vmul.f32 %v1048_v53, %v1032_v31 }
 0x5c2   : > { %v1053_v56 = vmul.f32 %v1773_v52, %v1049_v54 }
 0x5c4   : > { %v2127_v57 = vadd.f32 %v1774_v55, %v1053_v56 }
 0x5c6   : > { %1703 = vmatmul.msk.f32.vlgmr.msrb.gmra.mxu3 %vm662_vm0, %v2127_v57 }
 0x5c7   : > { %1284 = vmatpush.msrb.mxu3 %v1732_v24 }
 0x5c9   : > { %1285 = vmatpush.msrb.mxu3 %v1731_v25  ;;  %v1525_v25 = vld [vmem:[%s2355_s16 + $0x58] sm:$0xff] }
 0x5cb   : > { %1286 = vmatpush.msrb.mxu3 %v1730_v26  ;;  %v1524_v26 = vld [vmem:[%s2355_s16 + $0x50] sm:$0xff] }
 0x5cd   : > { %1287 = vmatpush.msrb.mxu3 %v1729_v27  ;;  %v1523_v27 = vld [vmem:[%s2355_s16 + $0x48] sm:$0xff] }
 0x634   : > { %v1322_v49 = vpop.f32.mrf.mxu0 }
 0x635   : > { %v1323_v52 = vadd.f32 %v1780_v50, %v1322_v49  ;;  %v1515_v49 = vld [vmem:[%s2355_s16 + $0x8] sm:$0xff] }
 0x63c   : > { %v1325_v51 = vpop.f32.mrf.mxu0 }
 0x63d   : > { %v1326_v53 = vadd.f32 %v1780_v50, %v1325_v51  ;;  %v1514_v50 = vld [vmem:[%s2355_s16] sm:$0xff] }
 0x63e   : > { %v1784_v51 = vld [vmem:[%s2354_s15] ss:$0 sm:$0xff] }
 0x649   : > { %v1086_v4 = vpop.f32.mrf.mxu3 }
 0x64a   : > { %v1087_v6 = vadd.f32 %v1776_v3, %v1086_v4 }
 0x64c   : > { %1720 = vmatmul.msk.f32.vlgmr.msra.gmra.mxu2 %vm746_vm1, %v1087_v6 }
 0x64d   : > { %1746 = vmatpush.msk.msra.mxu2 %vm1206_vm9, %v1326_v53 }
 0x64f   : > { %1390 = vmatpush.msra.mxu2 %v1323_v52 }
 0x654   : > { %1728 = vmatmul.msk.f32.vlgmr.msrb.gmra.mxu2 %vm662_vm0, %v2127_v57 }
 0x655   : > { %1438 = vmatpush.msrb.mxu2 %v1231_v58 }
 0x657   : > { %1439 = vmatpush.msrb.mxu2 %v1230_v59 }
 0x6cf   : > { %v1187_v11 = vpop.f32.mrf.mxu2 }
 0x6d0   : > { %v1190_v12 = vmul.f32 0.25, %v1187_v11 }
 0x6d2   : > { %v1192_v13 = vsel %vm1191_vm8, %v1190_v12, -inf }
 0x6d3   : > { %1193 = vmax.xlane.f32.xlu0 %v1192_v13 }
 0x6d7   : > { %v1259_v39 = vpop.f32.mrf.mxu2 }
 0x6d8   : > { %v1260_v41 = vadd.f32 %v1777_v36, %v1259_v39  ;;  %v1518_v36 = vld [vmem:[%s2355_s16 + $0x20] sm:$0xff] }
 0x746   : > { %v1194_v17 = vpop.xlane.xlu0 %1193 }
 0x747   : > { %v1195_v20 = vsub.f32 %v1190_v12, %v1194_v17  ;;  %v1482_v17 = vld [vmem:[%s2353_s14] sm:$0xff] }
 0x749   : > { %v1196_v21 = vmul.f32 1.442695, %v1195_v20  ;;  %v1527_v20 = vld [vmem:[%s2355_s16 + $0x68] sm:$0xff] }
 0x74a   : > { %1536 = vmatpush.msrb.mxu0 %v1527_v20 }
 0x74b   : > { %1800 = vpow2.f32 %v1196_v21 }
 0x751   : > { %v1801_v22 = vpop.eup %1800 }
 0x752   : > { %v1198_v23 = vsel %vm1191_vm8, %v1801_v22, 0.0 }
 0x753   : > { %1199 = vadd.xlane.f32.xlu1 %v1198_v23  ;;  %v1526_v23 = vld [vmem:[%s2355_s16 + $0x60] sm:$0xff] }
 0x754   : > { %1537 = vmatpush.msrb.mxu0 %v1526_v23 }
 0x756   : > { %1538 = vmatpush.msrb.mxu0 %v1525_v25 }
 0x758   : > { %1539 = vmatpush.msrb.mxu0 %v1524_v26 }
 0x75a   : > { %1540 = vmatpush.msrb.mxu0 %v1523_v27 }
 0x7c6   : > { %v1200_v29 = vpop.xlane.xlu1 %1199 }
 0x7c7   : > { %1802 = vrcp.f32 %v1200_v29  ;;  %v1522_v29 = vld [vmem:[%s2355_s16 + $0x40] sm:$0xff] }
 0x7c8   : > { %1541 = vmatpush.msrb.mxu0 %v1522_v29 }
 0x7cd   : > { %v1803_v30 = vpop.eup %1802 }
 0x7ce   : > { %v1202_v31 = vmul.f32 %v1803_v30, %v1801_v22 }
 0x7d0   : > { %1722 = vmatmul.msk.f32.vlgmr.msra.gmra.mxu3 %vm1191_vm8, %v1202_v31  ;;  %v1521_v31 = vld [vmem:[%s2355_s16 + $0x38] sm:$0xff] }
 0x7d1   : > { %1505 = vmatpush.msra.mxu3 %v1485_v15  ;;  %1542 = vmatpush.msrb.mxu0 %v1521_v31 }
 0x7d8   : > { %1734 = vmatmul.msk.f32.vlgmr.msrb.gmra.mxu3 %vm662_vm0, %v2100_v37 }
 0x7e0   : > { %1735 = vmatmul.msk.f32.gmra.mxu3 %vm662_vm0, %v2104_v38 }
 0x853   : > { %v1227_v32 = vpop.f32.mrf.mxu3 }
 0x85b   : > { %v1289_v5 = vpop.f32.mrf.mxu3 }
 0x85c   : > { %v1290_v40 = vadd.f32 %v1779_v33, %v1289_v5  ;;  %v1520_v5 = vld [vmem:[%s2355_s16 + $0x30] sm:$0xff] }
 0x85d   : > { %1543 = vmatpush.msrb.mxu0 %v1520_v5 }
 0x863   : > { %v1292_v34 = vpop.f32.mrf.mxu3 }
 0x864   : > { %v1293_v35 = vadd.f32 %v1779_v33, %v1292_v34  ;;  %v1519_v34 = vld [vmem:[%s2355_s16 + $0x28] sm:$0xff] }
 0x865   : > { %1544 = vmatpush.msrb.mxu0 %v1519_v34 }
 0x866   : > { %1743 = vmatpush.xpose.msk.msrb.mxu1 %vm746_vm1, %v1293_v35 }
 0x867   : > { %1545 = vmatpush.msrb.mxu0 %v1518_v36 }
 0x86a   : > { %1744 = vmatpush.xpose.msk.msrb.mxu1 %vm746_vm1, %v1290_v40  ;;  %v1517_v40 = vld [vmem:[%s2355_s16 + $0x18] sm:$0xff] }
 0x86b   : > { %1546 = vmatpush.msrb.mxu0 %v1517_v40 }
 0x86d   : > { %1745 = vmatmul.msk.f32.vlgmr.msrb.gmra.mxu1 %vm746_vm1, %v1260_v41 }
 0x86e   : > { %1415 = vmatpush.msra.mxu1 %v1749_v60 }
 0x870   : > { %1416 = vmatpush.msra.mxu1 %v1748_v0 }
 0x8ea   : > { %v1354_v46 = vpop.f32.mrf.mxu1 }
 0x8eb   : > { %v1357_v47 = vmul.f32 0.25, %v1354_v46 }
 0x8ed   : > { %v1358_v48 = vsel %vm1191_vm8, %v1357_v47, -inf }
 0x8ee   : > { %1359 = vmax.xlane.f32.xlu2 %v1358_v48  ;;  %v1516_v48 = vld [vmem:[%s2355_s16 + $0x10] sm:$0xff] }
 0x8ef   : > { %1547 = vmatpush.msrb.mxu0 %v1516_v48 }
 0x8f1   : > { %1548 = vmatpush.msrb.mxu0 %v1515_v49 }
 0x8f3   : > { %1549 = vmatpush.msrb.mxu0 %v1514_v50 }
 0x961   : > { %v1360_v37 = vpop.xlane.xlu2 %1359 }
 0x962   : > { %v1361_v54 = vsub.f32 %v1357_v47, %v1360_v37 }
 0x964   : > { %v1362_v55 = vmul.f32 1.442695, %v1361_v54  ;;  %v1785_v54 = vld [vmem:[%s2356_s17] ss:$0 sm:$0xff] }
 0x966   : > { %1804 = vpow2.f32 %v1362_v55 }
 0x96c   : > { %v1805_v38 = vpop.eup %1804 }
 0x96d   : > { %v1364_v56 = vsel %vm1191_vm8, %v1805_v38, 0.0 }
 0x96e   : > { %1365 = vadd.xlane.f32.xlu0 %v1364_v56 }
 0x9e1   : > { %v1366_v61 = vpop.xlane.xlu0 %1365 }
 0x9e2   : > { %1806 = vrcp.f32 %v1366_v61 }
 0x9e8   : > { %v1807_v62 = vpop.eup %1806 }
 0x9e9   : > { %v1368_v63 = vmul.f32 %v1807_v62, %v1805_v38 }
 0x9eb   : > { %1747 = vmatmul.msk.f32.vlgmr.msra.gmra.mxu2 %vm1191_vm8, %v1368_v63 }
 0x9f3   : > { %1751 = vmatmul.msk.f32.vlgmr.msrb.gmra.mxu2 %vm746_vm1, %v1227_v32 }
 0xa6e   : > { %v1392_v1 = vpop.f32.mrf.mxu2 }
 0xa6f   : > { %1750 = vmatmul.msk.f32.vlgmr.msra.gmra.mxu1 %vm746_vm1, %v1392_v1 }
 0xa76   : > { %v1441_v3 = vpop.f32.mrf.mxu2 }
 0xaec   : > { %v1418_v4 = vpop.f32.mrf.mxu1 }
 0xaed   : > { %v1442_v6 = vadd.f32 %v1441_v3, %v1418_v4 }
 0xaef   : > { %v1448_v7 = vadd.f32 %v1781_v2, %v1442_v6 }
 0xaf1   : > { %v1449_v8 = vadd.f32 %v1448_v7, %v2127_v57  ;;  %v1484_v57 = vld [vmem:[%s2353_s14 + $0x10] sm:$0xff] }
 0xaf2   : > { %1506 = vmatpush.msra.mxu3 %v1484_v57 }
 0xaf3   : > { %v1452_v9 = vsel %vm662_vm0, %v1449_v8, 0.0 }
 0xaf4   : > { %1453 = vadd.xlane.f32.xlu1 %v1452_v9  ;;  %1507 = vmatpush.msra.mxu3 %v1483_v16 }
 0xaf6   : > { %1508 = vmatpush.msra.mxu3 %v1482_v17 }
 0xb67   : > { %v1454_v10 = vpop.xlane.xlu1 %1453 }
 0xb68   : > { %v1455_v11 = vmul.f32 %v1454_v10, %v2080_v28  ;;  %v1786_v10 = vld [vmem:[%s2357_s18] ss:$0 sm:$0xff] }
 0xb6a   : > { %v1456_v12 = vsub.f32 %v1449_v8, %v1455_v11 }
 0xb6c   : > { %v1457_v13 = vmul.f32 %v1456_v12, %v1456_v12 }
 0xb6e   : > { %v1458_v14 = vsel %vm662_vm0, %v1457_v13, 0.0 }
 0xb6f   : > { %1459 = vadd.xlane.f32.xlu2 %v1458_v14 }
 0xbe2   : > { %v1460_v21 = vpop.xlane.xlu2 %1459 }
 0xbe3   : > { %v1461_v22 = vmul.f32 %v1460_v21, %v2080_v28 }
 0xbe5   : > { %v1462_v24 = vadd.f32 1e-05, %v1461_v22 }
 0xbe7   : > { %1808 = vrsqrt.f32 %v1462_v24  ;;  %vm1469_vm11 = vweird.f32 %v1462_v24 }
 0xbed   : > { %v1809_v30 = vpop.eup %1808 }
 0xbee   : > { %v1464_v32 = vmul.f32 %v1809_v30, %v1462_v24  ;;  %vm1470_vm10 = vweird.f32 %v1809_v30 }
 0xbef   : > { %vm1471_vm12 = vmor %vm1469_vm11, %vm1470_vm10 }
 0xbf0   : > { %v1465_v33 = vmul.f32 %v1809_v30, %v1464_v32 }
 0xbf2   : > { %v1466_v35 = vmul.f32 0.5, %v1465_v33 }
 0xbf4   : > { %v1467_v39 = vsub.f32 1.5, %v1466_v35 }
 0xbf6   : > { %v1468_v41 = vmul.f32 %v1809_v30, %v1467_v39 }
 0xbf8   : > { %v1472_v43 = vsel %vm1471_vm12, %v1809_v30, %v1468_v41 }
 0xbf9   : > { %v1473_v44 = vmul.f32 %v1472_v43, %v1456_v12 }
 0xbfb   : > { %v1477_v46 = vmul.f32 %v1782_v42, %v1473_v44 }
 0xbfd   : > { %v1481_v47 = vadd.f32 %v1783_v45, %v1477_v46 }
 0xbff   : > { %1752 = vmatmul.msk.f32.vlgmr.msra.gmra.mxu3 %vm662_vm0, %v1481_v47 }
 0xc82   : > { %v1510_v52 = vpop.f32.mrf.mxu3 }
 0xc83   : > { %v1511_v53 = vadd.f32 %v1784_v51, %v1510_v52 }
 0xc85   : > { %v1513_v37 = vmax.f32 %v1511_v53, 0.0 }
 0xc87   : > { %1550 = vmatmul.f32.vlgmr.msrb.gmra.mxu0 %v1513_v37 }
 0xd04   : > { %v1551_v55 = vpop.f32.mrf.mxu0 }
 0xd05   : > { %v1552_v38 = vadd.f32 %v1785_v54, %v1551_v55 }
 0xd07   : > { %v1554_v56 = vadd.f32 %v1552_v38, %v1481_v47 }
 0xd09   : > { %v1557_v58 = vsel %vm662_vm0, %v1554_v56, 0.0 }
 0xd0a   : > { %1558 = vadd.xlane.f32.xlu0 %v1557_v58 }
 0xd7d   : > { %v1559_v59 = vpop.xlane.xlu0 %1558 }
 0xd7e   : > { %v1560_v60 = vmul.f32 %v1559_v59, %v2080_v28 }
 0xd80   : > { %v1561_v61 = vsub.f32 %v1554_v56, %v1560_v60 }
 0xd82   : > { %v1562_v62 = vmul.f32 %v1561_v61, %v1561_v61 }
 0xd84   : > { %v1563_v63 = vsel %vm662_vm0, %v1562_v62, 0.0 }
 0xd85   : > { %1564 = vadd.xlane.f32.xlu1 %v1563_v63 }
 0xdf8   : > { %v1565_v0 = vpop.xlane.xlu1 %1564 }
 0xdf9   : > { %v1566_v1 = vmul.f32 %v1565_v0, %v2080_v28  ;;  %v1787_v28 = vld [vmem:[%s2358_s19] ss:$0 sm:$0xff] }
 0xdfb   : > { %v1567_v2 = vadd.f32 1e-05, %v1566_v1 }
 0xdfd   : > { %1810 = vrsqrt.f32 %v1567_v2  ;;  %vm1574_vm14 = vweird.f32 %v1567_v2 }
 0xe03   : > { %v1811_v3 = vpop.eup %1810 }
 0xe04   : > { %v1569_v4 = vmul.f32 %v1811_v3, %v1567_v2  ;;  %vm1575_vm13 = vweird.f32 %v1811_v3 }
 0xe05   : > { %vm1576_vm15 = vmor %vm1574_vm14, %vm1575_vm13 }
 0xe06   : > { %v1570_v6 = vmul.f32 %v1811_v3, %v1569_v4 }
 0xe08   : > { %v1571_v7 = vmul.f32 0.5, %v1570_v6 }
 0xe0a   : > { %v1572_v8 = vsub.f32 1.5, %v1571_v7 }
 0xe0c   : > { %v1573_v9 = vmul.f32 %v1811_v3, %v1572_v8 }
 0xe0e   : > { %v1577_v11 = vsel %vm1576_vm15, %v1811_v3, %v1573_v9 }
 0xe0f   : > { %v1578_v12 = vmul.f32 %v1577_v11, %v1561_v61 }
 0xe11   : > { %v1582_v13 = vmul.f32 %v1786_v10, %v1578_v12 }
 0xe13   : > { %v1586_v14 = vadd.f32 %v1787_v28, %v1582_v13 }
 0xe15   : > { %1587 = vst.msk [vmem:[%s644_s5] sm:$0xff] %vm662_vm0, %v1586_v14 }
 0xe16 PF: > { %s30_s1 = sadd.s32 1, %s1818_s1  }
 0xe17   : > { %p27_p4 = scmp.ge.s32.totalorder %s30_s1, 4  }
 0xe19   :  { %29 = sbr.rel (!%p27_p4) target bundleno = 7 (0x7), region = 155 }

</bundles_post_ra>
